<compile_context>
chip_gen: v5e
topology: v5e:2x2
jax: 0.10.0
libtpu: 0.0.40
codegen_flags: <defaults>
</compile_context>

<pallas_src>
import functools
import math

import jax
import jax.numpy as jnp
from jax.experimental import pallas as pl
from jax.experimental.pallas import tpu as pltpu

EPS = 1e-6    # RMSNorm eps
NEG = -1e9    # masked_fill value (matches torch)


# ------------------------------ small helpers --------------------------------

def _round_up(n, m):
    return (n + m - 1) // m * m


def _choose_rows(n, cap=256):
    """Token-row tiling: (padded row count, tile size). Tile is a multiple of 8."""
    n8 = _round_up(n, 8)
    tm = min(cap, n8)
    return _round_up(n8, tm), tm


def _pad_rows(x, n_pad):
    n = x.shape[0]
    if n_pad == n:
        return x
    return jnp.pad(x, ((0, n_pad - n),) + ((0, 0),) * (x.ndim - 1))


def _vmem_limit(*arrays):
    """Explicit scoped-VMEM request (v5e default is only 16 MiB).  4x covers
    double-buffered inputs/outputs + scratch; capped below v7x's 64 MiB."""
    nbytes = sum(int(a.size) * a.dtype.itemsize for a in arrays)
    return int(min(max(4 * nbytes + (2 << 20), 16 << 20), 56 << 20))


# ----------------------------- in-kernel helpers ------------------------------

def _dot_nt(a, b):
    """2-D a @ b.T with bf16 MXU operands, f32 accumulation (no XLA transpose)."""
    return jax.lax.dot_general(
        a.astype(jnp.bfloat16), b.astype(jnp.bfloat16),
        (((1,), (1,)), ((), ())), preferred_element_type=jnp.float32)


def _bdot_nt(a, b):
    """Head-batched (h,M,K) x (h,N,K) -> (h,M,N)   ('bqd,bkd->bqk' form)."""
    return jax.lax.dot_general(
        a.astype(jnp.bfloat16), b.astype(jnp.bfloat16),
        (((2,), (2,)), ((0,), (0,))), preferred_element_type=jnp.float32)


def _bdot_nn(a, b):
    """Head-batched (h,M,K) x (h,K,N) -> (h,M,N)   ('bqk,bkd->bqd' form)."""
    return jax.lax.dot_general(
        a.astype(jnp.bfloat16), b.astype(jnp.bfloat16),
        (((2,), (1,)), ((0,), (0,))), preferred_element_type=jnp.float32)


def _rms(x, g):
    """RMSNorm in f32: g * x * rsqrt(mean(x^2) + eps)."""
    x = x.astype(jnp.float32)
    ms = jnp.mean(x * x, axis=-1, keepdims=True)
    return (g.astype(jnp.float32) * x) * jax.lax.rsqrt(ms + EPS)


def _erf(x):
    # Abramowitz & Stegun 7.1.26, |err| < 1.5e-7 (~f32 ulp); exp/mul/where only.
    t = 1.0 / (1.0 + 0.3275911 * jnp.abs(x))
    poly = t * (0.254829592 + t * (-0.284496736 + t * (1.421413741
                + t * (-1.453152027 + t * 1.061405429))))
    y = 1.0 - poly * jnp.exp(-x * x)
    return jnp.where(x >= 0.0, y, -y)


def _gelu(x):
    # erf-based exact GELU (nn.GELU() default), evaluated in f32.
    return 0.5 * x * (1.0 + _erf(x * 0.7071067811865476))


# ------------------------- fused MLA attention block --------------------------

def _mla_block_kernel(x_ref, g_ref, wq_ref, wk_ref, wv_ref, pk_ref, pv_ref,
                      wo_ref, pad_ref, o_ref, *, n_heads):
    x = x_ref[0]                                      # (T, D) f32
    T, D = x.shape
    h = n_heads
    Lp = pk_ref.shape[0]                              # latent length, padded to 128

    xn = _rms(x, g_ref[...]).astype(jnp.bfloat16)     # attn_norm fused
    xn_b = jnp.broadcast_to(xn, (h, T, D))            # head-batched operand

    # Per-head projections as ONE batched dot each (no lane-offset slicing);
    # 1/sqrt(dk) is folded into wq at init time.
    q = _bdot_nt(xn_b, wq_ref[...])                   # (h, T, dq)
    kh = _bdot_nt(xn_b, wk_ref[...])                  # (h, T, dk)
    vh = _bdot_nt(xn_b, wv_ref[...])                  # (h, T, dk)

    # Linformer latent projections: k_lat[h,l,c] = sum_t Pk[l,t] * kh[h,t,c]
    pk_b = jnp.broadcast_to(pk_ref[...], (h, Lp, T))
    pv_b = jnp.broadcast_to(pv_ref[...], (h, Lp, T))
    k_lat = _bdot_nn(pk_b, kh)                        # (h, Lp, dk)
    v_lat = _bdot_nn(pv_b, vh)                        # (h, Lp, dk)

    # Causal + key-padding mask built in-kernel from iota (padding of L -> Lp
    # and latent rows >= T are both killed by this mask).
    row = jax.lax.broadcasted_iota(jnp.int32, (T, Lp), 0)
    col = jax.lax.broadcasted_iota(jnp.int32, (T, Lp), 1)
    mask = jnp.logical_and(col <= row, pad_ref[0] > 0.5)      # (T, Lp)
    mask3 = jnp.broadcast_to(mask[None], (h, T, Lp))

    s = _bdot_nt(q, k_lat)                            # (h, T, Lp) scores
    s = jnp.where(mask3, s, NEG)                      # masked_fill(~mask, -1e9)
    s = s - jnp.max(s, axis=-1, keepdims=True)
    p = jnp.exp(s)
    p = p / jnp.sum(p, axis=-1, keepdims=True)        # exact softmax (torch parity)

    out = _bdot_nn(p, v_lat)                          # (h, T, dk)
    # Head-major concat -> single o_proj matmul with K = h*dk (MXU-friendly).
    oh_all = jnp.concatenate([out[i] for i in range(h)], axis=-1)   # (T, h*dk)
    o_ref[0] = x + _dot_nt(oh_all, wo_ref[...])       # fused residual add


def mla_block(x, pad_l, g, attn_p, cfg):
    """x:(B,T,D) -> x + o_proj(MLA(rmsnorm(x))); one pallas_call, grid over B."""
    B, T, D = x.shape
    h, dk, dq = cfg["n_heads"], cfg["dk"], cfg["dq"]
    assert dq == dk, "q @ k requires dq == dk (as in the torch defaults)"
    Lp = attn_p["P_k"].shape[0]
    pk = attn_p["P_k"][:, :T]                         # (Lp, T) bf16
    pv = attn_p["P_v"][:, :T]
    g2 = g.reshape(1, D)
    kern = functools.partial(_mla_block_kernel, n_heads=h)
    # TODO(synk): at real T, tile q-rows / fold several batches per grid step
    # so the MXU sees M >= 256 on the projections.
    return pl.pallas_call(
        kern,
        out_shape=jax.ShapeDtypeStruct((B, T, D), jnp.float32),
        grid=(B,),
        in_specs=[
            pl.BlockSpec((1, T, D), lambda b: (b, 0, 0)),
            pl.BlockSpec((1, D), lambda b: (0, 0)),
            pl.BlockSpec(attn_p["w_q3"].shape, lambda b: (0, 0, 0)),
            pl.BlockSpec(attn_p["w_k3"].shape, lambda b: (0, 0, 0)),
            pl.BlockSpec(attn_p["w_v3"].shape, lambda b: (0, 0, 0)),
            pl.BlockSpec(pk.shape, lambda b: (0, 0)),
            pl.BlockSpec(pv.shape, lambda b: (0, 0)),
            pl.BlockSpec(attn_p["w_o"].shape, lambda b: (0, 0)),
            pl.BlockSpec((1, 1, Lp), lambda b: (b, 0, 0)),
        ],
        out_specs=pl.BlockSpec((1, T, D), lambda b: (b, 0, 0)),
        compiler_params=pltpu.CompilerParams(
            dimension_semantics=("parallel",),
            vmem_limit_bytes=_vmem_limit(x, attn_p["w_q3"], attn_p["w_k3"],
                                         attn_p["w_v3"], pk, pv,
                                         attn_p["w_o"], pad_l)),
    )(x, g2, attn_p["w_q3"], attn_p["w_k3"], attn_p["w_v3"], pk, pv,
      attn_p["w_o"], pad_l)


# ------------------------------ fused dense FFN --------------------------------

def _ffn_block_kernel(x_ref, g_ref, w1_ref, w2_ref, o_ref):
    x = x_ref[...]
    xn = _rms(x, g_ref[...])                          # ffn_norm fused
    hdn = _gelu(_dot_nt(xn, w1_ref[...]))             # linear -> GELU in VMEM
    o_ref[...] = x + _dot_nt(hdn, w2_ref[...])        # second linear + residual


def ffn_block(x, g, w1, w2):
    B, T, D = x.shape
    n = B * T
    n_pad, tm = _choose_rows(n)
    xf = _pad_rows(x.reshape(n, D), n_pad)
    out = pl.pallas_call(
        _ffn_block_kernel,
        out_shape=jax.ShapeDtypeStruct((n_pad, D), jnp.float32),
        grid=(n_pad // tm,),
        in_specs=[pl.BlockSpec((tm, D), lambda i: (i, 0)),
                  pl.BlockSpec((1, D), lambda i: (0, 0)),
                  pl.BlockSpec(w1.shape, lambda i: (0, 0)),
                  pl.BlockSpec(w2.shape, lambda i: (0, 0))],
        out_specs=pl.BlockSpec((tm, D), lambda i: (i, 0)),
        compiler_params=pltpu.CompilerParams(
            dimension_semantics=("parallel",),
            vmem_limit_bytes=_vmem_limit(xf, w1, w2)),
    )(xf, g.reshape(1, D), w1, w2)
    return out[:n].reshape(B, T, D)


# ---------------------- fused rmsnorm + matmul (tiled) -------------------------

def _norm_matmul_kernel(x_ref, g_ref, w_ref, o_ref, xn_ref):
    @pl.when(pl.program_id(1) == 0)
    def _():
        xn_ref[...] = _rms(x_ref[...], g_ref[...]).astype(jnp.bfloat16)
    o_ref[...] = _dot_nt(xn_ref[...], w_ref[...])


def norm_matmul(x2d, g, w, tn_cap=512):
    """rmsnorm(x) @ w.T, tiled over tokens ('parallel') and output columns
    ('arbitrary', rmsnorm cached in VMEM scratch).  w:(O,D) bf16, O % 128 == 0."""
    n, D = x2d.shape
    O = w.shape[0]
    assert O % 128 == 0, "output dim must be padded to a multiple of 128"
    n_pad, tm = _choose_rows(n)
    xf = _pad_rows(x2d, n_pad)
    tn = max(c for c in (128, 256, 512) if c <= min(tn_cap, O) and O % c == 0)
    out = pl.pallas_call(
        _norm_matmul_kernel,
        out_shape=jax.ShapeDtypeStruct((n_pad, O), jnp.float32),
        grid=(n_pad // tm, O // tn),
        in_specs=[pl.BlockSpec((tm, D), lambda i, j: (i, 0)),
                  pl.BlockSpec((1, D), lambda i, j: (0, 0)),
                  pl.BlockSpec((tn, D), lambda i, j: (j, 0))],
        out_specs=pl.BlockSpec((tm, tn), lambda i, j: (i, j)),
        scratch_shapes=[pltpu.VMEM((tm, D), jnp.bfloat16)],
        compiler_params=pltpu.CompilerParams(
            dimension_semantics=("parallel", "arbitrary"),
            vmem_limit_bytes=_vmem_limit(xf, w)),
    )(xf, g.reshape(1, D), w)
    return out[:n]


# ------------------------------------ MoE --------------------------------------

def _moe_block_kernel(x_ref, g_ref, w1_ref, w2_ref, gate_ref, o_ref, xn_ref):
    e = pl.program_id(1)

    @pl.when(e == 0)
    def _():
        x = x_ref[...]
        xn_ref[...] = _rms(x, g_ref[...]).astype(jnp.bfloat16)  # norm ONCE per tile
        o_ref[...] = x                                # residual: out = x + sum_e ...

    hdn = _gelu(_dot_nt(xn_ref[...], w1_ref[0]))
    eo = _dot_nt(hdn, w2_ref[0])
    o_ref[...] += eo * gate_ref[0]                    # gate == 0 for unselected tokens


def moe_block(x, g, ffn_p, cfg):
    """Top-k MoE (eval): dense masked dispatch == token-gather loop result, since
    unselected tokens get gate 0.  Grid = (token tiles 'parallel', experts 'arbitrary')."""
    B, T, D = x.shape
    E, K, hid = cfg["n_experts"], cfg["top_k"], cfg["d_ff"]
    n = B * T
    xf = x.reshape(n, D)

    # Router: rmsnorm fused into the matmul, lane-dense (128-padded) output;
    # softmax / top-k / gating stays in XLA (tiny N x E scalars, eval: no noise).
    logits = norm_matmul(xf, g, ffn_p["w_router"])[:, :E]
    probs = jax.nn.softmax(logits, axis=-1)
    top_p, top_i = jax.lax.top_k(probs, K)
    top_p = top_p / (jnp.sum(top_p, axis=-1, keepdims=True) + 1e-9)
    onehot = jax.nn.one_hot(top_i, E, dtype=jnp.float32)        # (N, K, E)
    gates_ne = jnp.sum(onehot * top_p[:, :, None], axis=1)      # (N, E) dense gates
    expert_mask = jnp.max(onehot, axis=1)                       # (N, E) in {0,1}

    n_pad, tm = _choose_rows(n)
    xf_p = _pad_rows(xf, n_pad)
    gates = jnp.transpose(_pad_rows(gates_ne, n_pad))[:, :, None]   # (E, N_pad, 1)

    # TODO(synk): replace dense masked dispatch with PrefetchScalarGridSpec
    # token-group dispatch (router group offsets as scalar prefetch); tile d_ff
    # for v7x's 64 MiB VMEM at real sizes.
    out = pl.pallas_call(
        _moe_block_kernel,
        out_shape=jax.ShapeDtypeStruct((n_pad, D), jnp.float32),
        grid=(n_pad // tm, E),
        in_specs=[pl.BlockSpec((tm, D), lambda i, e: (i, 0)),
                  pl.BlockSpec((1, D), lambda i, e: (0, 0)),
                  pl.BlockSpec((1, hid, D), lambda i, e: (e, 0, 0)),
                  pl.BlockSpec((1, D, hid), lambda i, e: (e, 0, 0)),
                  pl.BlockSpec((1, tm, 1), lambda i, e: (e, i, 0))],
        out_specs=pl.BlockSpec((tm, D), lambda i, e: (i, 0)),
        scratch_shapes=[pltpu.VMEM((tm, D), jnp.bfloat16)],
        compiler_params=pltpu.CompilerParams(
            dimension_semantics=("parallel", "arbitrary"),
            vmem_limit_bytes=_vmem_limit(xf_p, ffn_p["W1"], ffn_p["W2"], gates)),
    )(xf_p, g.reshape(1, D), ffn_p["W1"], ffn_p["W2"], gates)

    # Switch-style load-balancing loss (matches MoEBlock._lb_loss), real tokens only.
    imp = probs.sum(axis=0)
    load = expert_mask.sum(axis=0)
    imp = imp / (imp.sum() + 1e-9)
    load = load / (load.sum() + 1e-9)
    lb = (imp * load).sum() * E
    return out[:n].reshape(B, T, D), lb


# ----------------------------------- model -------------------------------------

def model_forward(params, ids, attention_mask, cfg):
    B, T = ids.shape
    D, V, L = cfg["d_model"], cfg["vocab"], cfg["target_L"]
    L_pad = _round_up(L, 128)

    x = params["embed"][ids].astype(jnp.float32) + params["pos"][:, :T, :]

    # Key-side padding mask over latent positions, padded to L_pad: (B, 1, L_pad).
    if attention_mask is None:
        pad = jnp.ones((B, T), jnp.float32)
    else:
        pad = attention_mask.astype(jnp.float32)
    pad_k = jnp.pad(pad, ((0, 0), (0, L - T))) if L > T else pad[:, :L]
    pad_l = jnp.pad(pad_k, ((0, 0), (0, L_pad - pad_k.shape[1]))).reshape(B, 1, L_pad)

    lb_total = jnp.asarray(0.0, jnp.float32)
    for lp in params["layers"]:
        x = mla_block(x, pad_l, lp["attn_norm"], lp["attn"], cfg)
        if lp["use_moe"]:
            x, lb = moe_block(x, lp["ffn_norm"], lp["ffn"], cfg)
            lb_total = lb_total + lb
        else:
            x = ffn_block(x, lp["ffn_norm"], lp["ffn"]["w1"], lp["ffn"]["w2"])

    # Final RMSNorm fused with the tied (bf16, vocab-padded) lm_head, tiled over
    # tokens and vocab columns; computed ONCE and reused for "mtp".
    logits = norm_matmul(x.reshape(B * T, D), params["norm"], params["embed"])
    logits = logits[:, :V].reshape(B, T, V)

    out = {"main": logits, "lb": lb_total}
    if cfg["use_mtp"]:
        out["mtp"] = logits
    return out


# ------------------------------ parameter init ---------------------------------

def init_params(key, cfg):
    D, V = cfg["d_model"], cfg["vocab"]
    h, dk, dq, L = cfg["n_heads"], cfg["dk"], cfg["dq"], cfg["target_L"]
    hid, E = cfg["d_ff"], cfg["n_experts"]
    ml = cfg["attn_max_len"]
    L_pad = _round_up(L, 128)
    E_pad = _round_up(E, 128)
    V_pad = _round_up(V, 128)
    assert D % h == 0 and dq == D // h and dq == dk

    keys = iter(jax.random.split(key, 1024))

    def w(shape, scale=0.02):
        return scale * jax.random.normal(next(keys), shape, jnp.float32)

    def bf(a):
        return a.astype(jnp.bfloat16)

    params = {
        # bf16 tied embedding / lm_head, vocab padded to a lane-dense multiple of 128.
        "embed": bf(jnp.pad(w((V, D)), ((0, V_pad - V), (0, 0)))),
        "pos": jnp.zeros((1, cfg["max_len"], D), jnp.float32),
        "norm": jnp.ones((D,), jnp.float32),
        "layers": [],
    }
    scale = dk ** (-0.5)
    for li in range(cfg["n_layers"]):
        use_moe = li >= cfg["moe_start"]
        # torch q_proj.weight (h*dq, D) reshaped head-major -> (h, dq, D); kv_proj
        # split into k/v halves, each (h, dk, D).  1/sqrt(dk) folded into w_q3.
        attn = {
            "w_q3": bf(w((h, dq, D)) * scale),
            "w_k3": bf(w((h, dk, D))),
            "w_v3": bf(w((h, dk, D))),
            "w_o": bf(w((D, h * dq))),
            # TODO(synk): torch uses xavier_uniform_ for P_k/P_v; scaled normals here.
            "P_k": bf(jnp.pad(w((L, ml), 1.0 / math.sqrt(L + ml)),
                              ((0, L_pad - L), (0, 0)))),
            "P_v": bf(jnp.pad(w((L, ml), 1.0 / math.sqrt(L + ml)),
                              ((0, L_pad - L), (0, 0)))),
        }
        if use_moe:
            ffn = {
                "w_router": bf(jnp.pad(w((E, D)), ((0, E_pad - E), (0, 0)))),
                "W1": bf(w((E, hid, D))),       # stacked expert weights, bf16
                "W2": bf(w((E, D, hid))),
            }
        else:
            ffn = {"w1": bf(w((hid, D))), "w2": bf(w((D, hid)))}
        params["layers"].append({
            "attn_norm": jnp.ones((D,), jnp.float32),
            "ffn_norm": jnp.ones((D,), jnp.float32),
            "attn": attn,
            "ffn": ffn,
            "use_moe": use_moe,
        })
    return params


# ------------------------------------ main --------------------------------------

if __name__ == "__main__":
    cfg = dict(
        vocab=64,
        max_len=32,          # positional table length (>= T)
        attn_max_len=32,     # stored P_k / P_v length (only [:, :T] used)
        d_model=128,
        n_layers=2,
        n_heads=2,           # dq = d_model / n_heads = 64 == dk (as in 768/12)
        dk=64,
        dq=64,
        target_L=64,         # Linformer latent length (padded to 128 internally)
        d_ff=256,
        moe_start=1,         # layer 0: FeedForward, layer 1: MoE
        n_experts=4,
        top_k=2,
        use_mtp=True,
    )

    key = jax.random.PRNGKey(0)
    pkey, ikey = jax.random.split(key)
    params = init_params(pkey, cfg)

    B, T = 2, 8
    ids = jax.random.randint(ikey, (B, T), 0, cfg["vocab"], dtype=jnp.int32)
    attention_mask = jnp.ones((B, T), dtype=jnp.int32)

    fwd = jax.jit(lambda i, a: model_forward(params, i, a, cfg))
    out = fwd(ids, attention_mask)
    jax.block_until_ready(out["main"])
    jax.block_until_ready(out["mtp"])
    jax.block_until_ready(out["lb"])

    assert out["main"].shape == (B, T, cfg["vocab"])
    assert out["mtp"].shape == (B, T, cfg["vocab"])
    assert bool(jnp.all(jnp.isfinite(out["main"])))
    assert bool(jnp.isfinite(out["lb"]))
    print("KERNEL_OK")
</pallas_src>

<mosaic_0001>
module attributes {stable_mosaic.version = 11 : i64} {
  func.func @_mla_block_kernel(%arg0: i32, %arg1: memref<1x8x128xf32, #tpu.memory_space<vmem>>, %arg2: memref<1x128xf32, #tpu.memory_space<vmem>>, %arg3: memref<2x64x128xbf16, #tpu.memory_space<vmem>>, %arg4: memref<2x64x128xbf16, #tpu.memory_space<vmem>>, %arg5: memref<2x64x128xbf16, #tpu.memory_space<vmem>>, %arg6: memref<128x8xbf16, #tpu.memory_space<vmem>>, %arg7: memref<128x8xbf16, #tpu.memory_space<vmem>>, %arg8: memref<128x128xbf16, #tpu.memory_space<vmem>>, %arg9: memref<1x1x128xf32, #tpu.memory_space<vmem>>, %arg10: memref<1x8x128xf32, #tpu.memory_space<vmem>>) attributes {dimension_semantics = [#tpu.dimension_semantics<parallel>], iteration_bounds = array<i64: 2>, scalar_prefetch = 0 : i64, scratch_operands = 0 : i64, tpu.core_type = #tpu.core_type<tc>, window_params = [{transform_indices = @transform_0, window_bounds = array<i64: 1, 8, 128>}, {pipeline_mode = #tpu.pipeline_mode<synchronous>, transform_indices = @transform_1, window_bounds = array<i64: 1, 128>}, {pipeline_mode = #tpu.pipeline_mode<synchronous>, transform_indices = @transform_2, window_bounds = array<i64: 2, 64, 128>}, {pipeline_mode = #tpu.pipeline_mode<synchronous>, transform_indices = @transform_3, window_bounds = array<i64: 2, 64, 128>}, {pipeline_mode = #tpu.pipeline_mode<synchronous>, transform_indices = @transform_4, window_bounds = array<i64: 2, 64, 128>}, {pipeline_mode = #tpu.pipeline_mode<synchronous>, transform_indices = @transform_5, window_bounds = array<i64: 128, 8>}, {pipeline_mode = #tpu.pipeline_mode<synchronous>, transform_indices = @transform_6, window_bounds = array<i64: 128, 8>}, {pipeline_mode = #tpu.pipeline_mode<synchronous>, transform_indices = @transform_7, window_bounds = array<i64: 128, 128>}, {transform_indices = @transform_8, window_bounds = array<i64: 1, 1, 128>}, {transform_indices = @transform_9, window_bounds = array<i64: 1, 8, 128>}]} {
    %c0 = arith.constant 0 : index
    %c0_0 = arith.constant 0 : index
    %c0_1 = arith.constant 0 : index
    %0 = vector.load %arg1[%c0, %c0_0, %c0_1] : memref<1x8x128xf32, #tpu.memory_space<vmem>>, vector<1x8x128xf32>
    %1 = vector.shape_cast %0 : vector<1x8x128xf32> to vector<8x128xf32>
    %c0_2 = arith.constant 0 : index
    %c0_3 = arith.constant 0 : index
    %2 = vector.load %arg2[%c0_2, %c0_3] : memref<1x128xf32, #tpu.memory_space<vmem>>, vector<1x128xf32>
    %3 = arith.mulf %1, %1 : vector<8x128xf32>
    %cst = arith.constant dense<0.000000e+00> : vector<8xf32>
    %4 = vector.multi_reduction <add>, %3, %cst [1] : vector<8x128xf32> to vector<8xf32>
    %5 = vector.shape_cast %4 : vector<8xf32> to vector<8x1xf32>
    %cst_4 = arith.constant 1.280000e+02 : f32
    %6 = vector.broadcast %cst_4 : f32 to vector<8x1xf32>
    %7 = arith.divf %5, %6 : vector<8x1xf32>
    %8 = vector.broadcast %2 : vector<1x128xf32> to vector<8x128xf32>
    %9 = arith.mulf %8, %1 : vector<8x128xf32>
    %cst_5 = arith.constant 9.99999997E-7 : f32
    %10 = vector.broadcast %cst_5 : f32 to vector<8x1xf32>
    %11 = arith.addf %7, %10 : vector<8x1xf32>
    %12 = math.rsqrt %11 : vector<8x1xf32>
    %13 = vector.broadcast %12 : vector<8x1xf32> to vector<8x128xf32>
    %14 = arith.mulf %9, %13 : vector<8x128xf32>
    %15 = arith.truncf %14 : vector<8x128xf32> to vector<8x128xbf16>
    %16 = vector.shape_cast %15 : vector<8x128xbf16> to vector<1x8x128xbf16>
    %17 = vector.broadcast %16 : vector<1x8x128xbf16> to vector<2x8x128xbf16>
    %c0_6 = arith.constant 0 : index
    %c0_7 = arith.constant 0 : index
    %c0_8 = arith.constant 0 : index
    %18 = vector.load %arg3[%c0_6, %c0_7, %c0_8] : memref<2x64x128xbf16, #tpu.memory_space<vmem>>, vector<2x64x128xbf16>
    %cst_9 = arith.constant dense<0.000000e+00> : vector<2x8x64xf32>
    %19 = tpu.matmul %17, %18, %cst_9 {dimension_numbers = #tpu.dot_dimension_numbers<[2], [2], [1], [1], [0, 0, 0, 1, 1, 1], [0], [0]>} : vector<2x8x128xbf16>, vector<2x64x128xbf16>, vector<2x8x64xf32> -> vector<2x8x64xf32>
    %c0_10 = arith.constant 0 : index
    %c0_11 = arith.constant 0 : index
    %c0_12 = arith.constant 0 : index
    %20 = vector.load %arg4[%c0_10, %c0_11, %c0_12] : memref<2x64x128xbf16, #tpu.memory_space<vmem>>, vector<2x64x128xbf16>
    %cst_13 = arith.constant dense<0.000000e+00> : vector<2x8x64xf32>
    %21 = tpu.matmul %17, %20, %cst_13 {dimension_numbers = #tpu.dot_dimension_numbers<[2], [2], [1], [1], [0, 0, 0, 1, 1, 1], [0], [0]>} : vector<2x8x128xbf16>, vector<2x64x128xbf16>, vector<2x8x64xf32> -> vector<2x8x64xf32>
    %c0_14 = arith.constant 0 : index
    %c0_15 = arith.constant 0 : index
    %c0_16 = arith.constant 0 : index
    %22 = vector.load %arg5[%c0_14, %c0_15, %c0_16] : memref<2x64x128xbf16, #tpu.memory_space<vmem>>, vector<2x64x128xbf16>
    %cst_17 = arith.constant dense<0.000000e+00> : vector<2x8x64xf32>
    %23 = tpu.matmul %17, %22, %cst_17 {dimension_numbers = #tpu.dot_dimension_numbers<[2], [2], [1], [1], [0, 0, 0, 1, 1, 1], [0], [0]>} : vector<2x8x128xbf16>, vector<2x64x128xbf16>, vector<2x8x64xf32> -> vector<2x8x64xf32>
    %c0_18 = arith.constant 0 : index
    %c0_19 = arith.constant 0 : index
    %24 = vector.load %arg6[%c0_18, %c0_19] : memref<128x8xbf16, #tpu.memory_space<vmem>>, vector<128x8xbf16>
    %25 = vector.shape_cast %24 : vector<128x8xbf16> to vector<1x128x8xbf16>
    %26 = vector.broadcast %25 : vector<1x128x8xbf16> to vector<2x128x8xbf16>
    %c0_20 = arith.constant 0 : index
    %c0_21 = arith.constant 0 : index
    %27 = vector.load %arg7[%c0_20, %c0_21] : memref<128x8xbf16, #tpu.memory_space<vmem>>, vector<128x8xbf16>
    %28 = vector.shape_cast %27 : vector<128x8xbf16> to vector<1x128x8xbf16>
    %29 = vector.broadcast %28 : vector<1x128x8xbf16> to vector<2x128x8xbf16>
    %30 = arith.truncf %21 : vector<2x8x64xf32> to vector<2x8x64xbf16>
    %cst_22 = arith.constant dense<0.000000e+00> : vector<2x128x64xf32>
    %31 = tpu.matmul %26, %30, %cst_22 {dimension_numbers = #tpu.dot_dimension_numbers<[2], [1], [1], [2], [0, 0, 0, 1, 1, 2], [0], [0]>} : vector<2x128x8xbf16>, vector<2x8x64xbf16>, vector<2x128x64xf32> -> vector<2x128x64xf32>
    %32 = arith.truncf %23 : vector<2x8x64xf32> to vector<2x8x64xbf16>
    %cst_23 = arith.constant dense<0.000000e+00> : vector<2x128x64xf32>
    %33 = tpu.matmul %29, %32, %cst_23 {dimension_numbers = #tpu.dot_dimension_numbers<[2], [1], [1], [2], [0, 0, 0, 1, 1, 2], [0], [0]>} : vector<2x128x8xbf16>, vector<2x8x64xbf16>, vector<2x128x64xf32> -> vector<2x128x64xf32>
    %34 = tpu.iota {dimensions = array<i32: 0>} : vector<8x128xi32>
    %35 = tpu.iota {dimensions = array<i32: 1>} : vector<8x128xi32>
    %36 = arith.cmpi sle, %35, %34 : vector<8x128xi32>
    %c0_24 = arith.constant 0 : index
    %c0_25 = arith.constant 0 : index
    %c0_26 = arith.constant 0 : index
    %37 = vector.load %arg9[%c0_24, %c0_25, %c0_26] : memref<1x1x128xf32, #tpu.memory_space<vmem>>, vector<1x1x128xf32>
    %38 = vector.shape_cast %37 : vector<1x1x128xf32> to vector<1x128xf32>
    %cst_27 = arith.constant 5.000000e-01 : f32
    %39 = vector.broadcast %cst_27 : f32 to vector<1x128xf32>
    %40 = arith.cmpf ogt, %38, %39 : vector<1x128xf32>
    %41 = vector.broadcast %40 : vector<1x128xi1> to vector<8x128xi1>
    %42 = arith.andi %36, %41 : vector<8x128xi1>
    %43 = vector.shape_cast %42 : vector<8x128xi1> to vector<1x8x128xi1>
    %44 = vector.shape_cast %43 : vector<1x8x128xi1> to vector<1x8x128xi1>
    %45 = vector.broadcast %44 : vector<1x8x128xi1> to vector<2x8x128xi1>
    %46 = arith.truncf %19 : vector<2x8x64xf32> to vector<2x8x64xbf16>
    %47 = arith.truncf %31 : vector<2x128x64xf32> to vector<2x128x64xbf16>
    %cst_28 = arith.constant dense<0.000000e+00> : vector<2x8x128xf32>
    %48 = tpu.matmul %46, %47, %cst_28 {dimension_numbers = #tpu.dot_dimension_numbers<[2], [2], [1], [1], [0, 0, 0, 1, 1, 1], [0], [0]>} : vector<2x8x64xbf16>, vector<2x128x64xbf16>, vector<2x8x128xf32> -> vector<2x8x128xf32>
    %cst_29 = arith.constant -1.000000e+09 : f32
    %49 = vector.broadcast %cst_29 : f32 to vector<2x8x128xf32>
    %50 = arith.select %45, %48, %49 : vector<2x8x128xi1>, vector<2x8x128xf32>
    %cst_30 = arith.constant dense<0xFF800000> : vector<2x8xf32>
    %51 = vector.multi_reduction <maximumf>, %50, %cst_30 [2] : vector<2x8x128xf32> to vector<2x8xf32>
    %52 = vector.shape_cast %51 : vector<2x8xf32> to vector<2x8x1xf32>
    %53 = vector.broadcast %52 : vector<2x8x1xf32> to vector<2x8x128xf32>
    %54 = arith.subf %50, %53 : vector<2x8x128xf32>
    %55 = math.exp %54 : vector<2x8x128xf32>
    %cst_31 = arith.constant dense<0.000000e+00> : vector<2x8xf32>
    %56 = vector.multi_reduction <add>, %55, %cst_31 [2] : vector<2x8x128xf32> to vector<2x8xf32>
    %57 = vector.shape_cast %56 : vector<2x8xf32> to vector<2x8x1xf32>
    %58 = vector.broadcast %57 : vector<2x8x1xf32> to vector<2x8x128xf32>
    %59 = arith.divf %55, %58 : vector<2x8x128xf32>
    %60 = arith.truncf %59 : vector<2x8x128xf32> to vector<2x8x128xbf16>
    %61 = arith.truncf %33 : vector<2x128x64xf32> to vector<2x128x64xbf16>
    %cst_32 = arith.constant dense<0.000000e+00> : vector<2x8x64xf32>
    %62 = tpu.matmul %60, %61, %cst_32 {dimension_numbers = #tpu.dot_dimension_numbers<[2], [1], [1], [2], [0, 0, 0, 1, 1, 2], [0], [0]>} : vector<2x8x128xbf16>, vector<2x128x64xbf16>, vector<2x8x64xf32> -> vector<2x8x64xf32>
    %63 = vector.extract_strided_slice %62 {offsets = [0, 0, 0], sizes = [1, 8, 64], strides = [1, 1, 1]} : vector<2x8x64xf32> to vector<1x8x64xf32>
    %64 = vector.shape_cast %63 : vector<1x8x64xf32> to vector<8x64xf32>
    %65 = vector.extract_strided_slice %62 {offsets = [1, 0, 0], sizes = [1, 8, 64], strides = [1, 1, 1]} : vector<2x8x64xf32> to vector<1x8x64xf32>
    %66 = vector.shape_cast %65 : vector<1x8x64xf32> to vector<8x64xf32>
    %67 = tpu.concatenate %64, %66 in 1 : vector<8x64xf32>, vector<8x64xf32> -> vector<8x128xf32>
    %c0_33 = arith.constant 0 : index
    %c0_34 = arith.constant 0 : index
    %68 = vector.load %arg8[%c0_33, %c0_34] : memref<128x128xbf16, #tpu.memory_space<vmem>>, vector<128x128xbf16>
    %69 = arith.truncf %67 : vector<8x128xf32> to vector<8x128xbf16>
    %cst_35 = arith.constant dense<0.000000e+00> : vector<8x128xf32>
    %70 = tpu.matmul %69, %68, %cst_35 {dimension_numbers = #tpu.dot_dimension_numbers<[1], [1], [0], [0], [0, 0, 1, 0], [], []>} : vector<8x128xbf16>, vector<128x128xbf16>, vector<8x128xf32> -> vector<8x128xf32>
    %71 = arith.addf %1, %70 : vector<8x128xf32>
    %c0_36 = arith.constant 0 : index
    %c0_37 = arith.constant 0 : index
    %c0_38 = arith.constant 0 : index
    %72 = vector.load %arg10[%c0_36, %c0_37, %c0_38] : memref<1x8x128xf32, #tpu.memory_space<vmem>>, vector<1x8x128xf32>
    %73 = vector.shape_cast %72 : vector<1x8x128xf32> to vector<8x128xf32>
    %74 = vector.shape_cast %71 : vector<8x128xf32> to vector<1x8x128xf32>
    tpu.vector_store %arg10[%c0_36, %c0_37, %c0_38], %74 {strides = array<i32>} : memref<1x8x128xf32, #tpu.memory_space<vmem>>, vector<1x8x128xf32>,
    return
  }
  func.func @transform_0(%arg0: i32) -> (i32, i32, i32) {
    %c0_i32 = arith.constant 0 : i32
    %c0_i32_0 = arith.constant 0 : i32
    %c0_i32_1 = arith.constant 0 : i32
    return %arg0, %c0_i32, %c0_i32_0 : i32, i32, i32
  }
  func.func @transform_1(%arg0: i32) -> (i32, i32) {
    %c0_i32 = arith.constant 0 : i32
    %c0_i32_0 = arith.constant 0 : i32
    %c0_i32_1 = arith.constant 0 : i32
    return %c0_i32, %c0_i32_0 : i32, i32
  }
  func.func @transform_2(%arg0: i32) -> (i32, i32, i32) {
    %c0_i32 = arith.constant 0 : i32
    %c0_i32_0 = arith.constant 0 : i32
    %c0_i32_1 = arith.constant 0 : i32
    %c0_i32_2 = arith.constant 0 : i32
    return %c0_i32, %c0_i32_0, %c0_i32_1 : i32, i32, i32
  }
  func.func @transform_3(%arg0: i32) -> (i32, i32, i32) {
    %c0_i32 = arith.constant 0 : i32
    %c0_i32_0 = arith.constant 0 : i32
    %c0_i32_1 = arith.constant 0 : i32
    %c0_i32_2 = arith.constant 0 : i32
    return %c0_i32, %c0_i32_0, %c0_i32_1 : i32, i32, i32
  }
  func.func @transform_4(%arg0: i32) -> (i32, i32, i32) {
    %c0_i32 = arith.constant 0 : i32
    %c0_i32_0 = arith.constant 0 : i32
    %c0_i32_1 = arith.constant 0 : i32
    %c0_i32_2 = arith.constant 0 : i32
    return %c0_i32, %c0_i32_0, %c0_i32_1 : i32, i32, i32
  }
  func.func @transform_5(%arg0: i32) -> (i32, i32) {
    %c0_i32 = arith.constant 0 : i32
    %c0_i32_0 = arith.constant 0 : i32
    %c0_i32_1 = arith.constant 0 : i32
    return %c0_i32, %c0_i32_0 : i32, i32
  }
  func.func @transform_6(%arg0: i32) -> (i32, i32) {
    %c0_i32 = arith.constant 0 : i32
    %c0_i32_0 = arith.constant 0 : i32
    %c0_i32_1 = arith.constant 0 : i32
    return %c0_i32, %c0_i32_0 : i32, i32
  }
  func.func @transform_7(%arg0: i32) -> (i32, i32) {
    %c0_i32 = arith.constant 0 : i32
    %c0_i32_0 = arith.constant 0 : i32
    %c0_i32_1 = arith.constant 0 : i32
    return %c0_i32, %c0_i32_0 : i32, i32
  }
  func.func @transform_8(%arg0: i32) -> (i32, i32, i32) {
    %c0_i32 = arith.constant 0 : i32
    %c0_i32_0 = arith.constant 0 : i32
    %c0_i32_1 = arith.constant 0 : i32
    return %arg0, %c0_i32, %c0_i32_0 : i32, i32, i32
  }
  func.func @transform_9(%arg0: i32) -> (i32, i32, i32) {
    %c0_i32 = arith.constant 0 : i32
    %c0_i32_0 = arith.constant 0 : i32
    %c0_i32_1 = arith.constant 0 : i32
    return %arg0, %c0_i32, %c0_i32_0 : i32, i32, i32
  }
}

module attributes {stable_mosaic.version = 11 : i64} {
  func.func @_norm_matmul_kernel(%arg0: i32, %arg1: i32, %arg2: memref<16x128xf32, #tpu.memory_space<vmem>>, %arg3: memref<1x128xf32, #tpu.memory_space<vmem>>, %arg4: memref<128x128xbf16, #tpu.memory_space<vmem>>, %arg5: memref<16x128xf32, #tpu.memory_space<vmem>>, %arg6: memref<16x128xbf16, #tpu.memory_space<vmem>>) attributes {dimension_semantics = [#tpu.dimension_semantics<parallel>, #tpu.dimension_semantics<arbitrary>], iteration_bounds = array<i64: 1, 1>, scalar_prefetch = 0 : i64, scratch_operands = 1 : i64, tpu.core_type = #tpu.core_type<tc>, window_params = [{transform_indices = @transform_0, window_bounds = array<i64: 16, 128>}, {pipeline_mode = #tpu.pipeline_mode<synchronous>, transform_indices = @transform_1, window_bounds = array<i64: 1, 128>}, {transform_indices = @transform_2, window_bounds = array<i64: 128, 128>}, {transform_indices = @transform_3, window_bounds = array<i64: 16, 128>}]} {
    %c0_i32 = arith.constant 0 : i32
    %0 = arith.cmpi eq, %arg1, %c0_i32 : i32
    %1 = arith.extui %0 : i1 to i32
    %c0_i32_0 = arith.constant 0 : i32
    %2 = arith.cmpi ne, %1, %c0_i32_0 : i32
    scf.if %2 {
      %c0_6 = arith.constant 0 : index
      %c0_7 = arith.constant 0 : index
      %7 = vector.load %arg2[%c0_6, %c0_7] : memref<16x128xf32, #tpu.memory_space<vmem>>, vector<16x128xf32>
      %c0_8 = arith.constant 0 : index
      %c0_9 = arith.constant 0 : index
      %8 = vector.load %arg3[%c0_8, %c0_9] : memref<1x128xf32, #tpu.memory_space<vmem>>, vector<1x128xf32>
      %9 = arith.mulf %7, %7 : vector<16x128xf32>
      %cst_10 = arith.constant dense<0.000000e+00> : vector<16xf32>
      %10 = vector.multi_reduction <add>, %9, %cst_10 [1] : vector<16x128xf32> to vector<16xf32>
      %11 = vector.shape_cast %10 : vector<16xf32> to vector<16x1xf32>
      %cst_11 = arith.constant 1.280000e+02 : f32
      %12 = vector.broadcast %cst_11 : f32 to vector<16x1xf32>
      %13 = arith.divf %11, %12 : vector<16x1xf32>
      %14 = vector.broadcast %8 : vector<1x128xf32> to vector<16x128xf32>
      %15 = arith.mulf %14, %7 : vector<16x128xf32>
      %cst_12 = arith.constant 9.99999997E-7 : f32
      %16 = vector.broadcast %cst_12 : f32 to vector<16x1xf32>
      %17 = arith.addf %13, %16 : vector<16x1xf32>
      %18 = math.rsqrt %17 : vector<16x1xf32>
      %19 = vector.broadcast %18 : vector<16x1xf32> to vector<16x128xf32>
      %20 = arith.mulf %15, %19 : vector<16x128xf32>
      %21 = arith.truncf %20 : vector<16x128xf32> to vector<16x128xbf16>
      %c0_13 = arith.constant 0 : index
      %c0_14 = arith.constant 0 : index
      %22 = vector.load %arg6[%c0_13, %c0_14] : memref<16x128xbf16, #tpu.memory_space<vmem>>, vector<16x128xbf16>
      tpu.vector_store %arg6[%c0_13, %c0_14], %21 {strides = array<i32>} : memref<16x128xbf16, #tpu.memory_space<vmem>>, vector<16x128xbf16>,
    } else {
    }
    %c0 = arith.constant 0 : index
    %c0_1 = arith.constant 0 : index
    %3 = vector.load %arg6[%c0, %c0_1] : memref<16x128xbf16, #tpu.memory_space<vmem>>, vector<16x128xbf16>
    %c0_2 = arith.constant 0 : index
    %c0_3 = arith.constant 0 : index
    %4 = vector.load %arg4[%c0_2, %c0_3] : memref<128x128xbf16, #tpu.memory_space<vmem>>, vector<128x128xbf16>
    %cst = arith.constant dense<0.000000e+00> : vector<16x128xf32>
    %5 = tpu.matmul %3, %4, %cst {dimension_numbers = #tpu.dot_dimension_numbers<[1], [1], [0], [0], [0, 0, 1, 0], [], []>} : vector<16x128xbf16>, vector<128x128xbf16>, vector<16x128xf32> -> vector<16x128xf32>
    %c0_4 = arith.constant 0 : index
    %c0_5 = arith.constant 0 : index
    %6 = vector.load %arg5[%c0_4, %c0_5] : memref<16x128xf32, #tpu.memory_space<vmem>>, vector<16x128xf32>
    tpu.vector_store %arg5[%c0_4, %c0_5], %5 {strides = array<i32>} : memref<16x128xf32, #tpu.memory_space<vmem>>, vector<16x128xf32>,
    return
  }
  func.func @transform_0(%arg0: i32, %arg1: i32) -> (i32, i32) {
    %c0_i32 = arith.constant 0 : i32
    %c0_i32_0 = arith.constant 0 : i32
    return %arg0, %c0_i32 : i32, i32
  }
  func.func @transform_1(%arg0: i32, %arg1: i32) -> (i32, i32) {
    %c0_i32 = arith.constant 0 : i32
    %c0_i32_0 = arith.constant 0 : i32
    %c0_i32_1 = arith.constant 0 : i32
    return %c0_i32, %c0_i32_0 : i32, i32
  }
  func.func @transform_2(%arg0: i32, %arg1: i32) -> (i32, i32) {
    %c0_i32 = arith.constant 0 : i32
    %c0_i32_0 = arith.constant 0 : i32
    return %arg1, %c0_i32 : i32, i32
  }
  func.func @transform_3(%arg0: i32, %arg1: i32) -> (i32, i32) {
    %c0_i32 = arith.constant 0 : i32
    return %arg0, %arg1 : i32, i32
  }
}

module attributes {stable_mosaic.version = 11 : i64} {
  func.func @_ffn_block_kernel(%arg0: i32, %arg1: memref<16x128xf32, #tpu.memory_space<vmem>>, %arg2: memref<1x128xf32, #tpu.memory_space<vmem>>, %arg3: memref<256x128xbf16, #tpu.memory_space<vmem>>, %arg4: memref<128x256xbf16, #tpu.memory_space<vmem>>, %arg5: memref<16x128xf32, #tpu.memory_space<vmem>>) attributes {dimension_semantics = [#tpu.dimension_semantics<parallel>], iteration_bounds = array<i64: 1>, scalar_prefetch = 0 : i64, scratch_operands = 0 : i64, tpu.core_type = #tpu.core_type<tc>, window_params = [{transform_indices = @transform_0, window_bounds = array<i64: 16, 128>}, {pipeline_mode = #tpu.pipeline_mode<synchronous>, transform_indices = @transform_1, window_bounds = array<i64: 1, 128>}, {pipeline_mode = #tpu.pipeline_mode<synchronous>, transform_indices = @transform_2, window_bounds = array<i64: 256, 128>}, {pipeline_mode = #tpu.pipeline_mode<synchronous>, transform_indices = @transform_3, window_bounds = array<i64: 128, 256>}, {transform_indices = @transform_4, window_bounds = array<i64: 16, 128>}]} {
    %c0 = arith.constant 0 : index
    %c0_0 = arith.constant 0 : index
    %0 = vector.load %arg1[%c0, %c0_0] : memref<16x128xf32, #tpu.memory_space<vmem>>, vector<16x128xf32>
    %c0_1 = arith.constant 0 : index
    %c0_2 = arith.constant 0 : index
    %1 = vector.load %arg2[%c0_1, %c0_2] : memref<1x128xf32, #tpu.memory_space<vmem>>, vector<1x128xf32>
    %2 = arith.mulf %0, %0 : vector<16x128xf32>
    %cst = arith.constant dense<0.000000e+00> : vector<16xf32>
    %3 = vector.multi_reduction <add>, %2, %cst [1] : vector<16x128xf32> to vector<16xf32>
    %4 = vector.shape_cast %3 : vector<16xf32> to vector<16x1xf32>
    %cst_3 = arith.constant 1.280000e+02 : f32
    %5 = vector.broadcast %cst_3 : f32 to vector<16x1xf32>
    %6 = arith.divf %4, %5 : vector<16x1xf32>
    %7 = vector.broadcast %1 : vector<1x128xf32> to vector<16x128xf32>
    %8 = arith.mulf %7, %0 : vector<16x128xf32>
    %cst_4 = arith.constant 9.99999997E-7 : f32
    %9 = vector.broadcast %cst_4 : f32 to vector<16x1xf32>
    %10 = arith.addf %6, %9 : vector<16x1xf32>
    %11 = math.rsqrt %10 : vector<16x1xf32>
    %12 = vector.broadcast %11 : vector<16x1xf32> to vector<16x128xf32>
    %13 = arith.mulf %8, %12 : vector<16x128xf32>
    %c0_5 = arith.constant 0 : index
    %c0_6 = arith.constant 0 : index
    %14 = vector.load %arg3[%c0_5, %c0_6] : memref<256x128xbf16, #tpu.memory_space<vmem>>, vector<256x128xbf16>
    %15 = arith.truncf %13 : vector<16x128xf32> to vector<16x128xbf16>
    %cst_7 = arith.constant dense<0.000000e+00> : vector<16x256xf32>
    %16 = tpu.matmul %15, %14, %cst_7 {dimension_numbers = #tpu.dot_dimension_numbers<[1], [1], [0], [0], [0, 0, 1, 0], [], []>} : vector<16x128xbf16>, vector<256x128xbf16>, vector<16x256xf32> -> vector<16x256xf32>
    %cst_8 = arith.constant 5.000000e-01 : f32
    %17 = vector.broadcast %cst_8 : f32 to vector<16x256xf32>
    %18 = arith.mulf %17, %16 : vector<16x256xf32>
    %cst_9 = arith.constant 0.707106769 : f32
    %19 = vector.broadcast %cst_9 : f32 to vector<16x256xf32>
    %20 = arith.mulf %16, %19 : vector<16x256xf32>
    %21 = math.absf %20 : vector<16x256xf32>
    %cst_10 = arith.constant 0.327591091 : f32
    %22 = vector.broadcast %cst_10 : f32 to vector<16x256xf32>
    %23 = arith.mulf %22, %21 : vector<16x256xf32>
    %cst_11 = arith.constant 1.000000e+00 : f32
    %24 = vector.broadcast %cst_11 : f32 to vector<16x256xf32>
    %25 = arith.addf %24, %23 : vector<16x256xf32>
    %cst_12 = arith.constant 1.000000e+00 : f32
    %26 = vector.broadcast %cst_12 : f32 to vector<16x256xf32>
    %27 = arith.divf %26, %25 : vector<16x256xf32>
    %cst_13 = arith.constant 1.06140542 : f32
    %28 = vector.broadcast %cst_13 : f32 to vector<16x256xf32>
    %29 = arith.mulf %27, %28 : vector<16x256xf32>
    %cst_14 = arith.constant -1.45315206 : f32
    %30 = vector.broadcast %cst_14 : f32 to vector<16x256xf32>
    %31 = arith.addf %30, %29 : vector<16x256xf32>
    %32 = arith.mulf %27, %31 : vector<16x256xf32>
    %cst_15 = arith.constant 1.42141378 : f32
    %33 = vector.broadcast %cst_15 : f32 to vector<16x256xf32>
    %34 = arith.addf %33, %32 : vector<16x256xf32>
    %35 = arith.mulf %27, %34 : vector<16x256xf32>
    %cst_16 = arith.constant -0.284496725 : f32
    %36 = vector.broadcast %cst_16 : f32 to vector<16x256xf32>
    %37 = arith.addf %36, %35 : vector<16x256xf32>
    %38 = arith.mulf %27, %37 : vector<16x256xf32>
    %cst_17 = arith.constant 0.254829586 : f32
    %39 = vector.broadcast %cst_17 : f32 to vector<16x256xf32>
    %40 = arith.addf %39, %38 : vector<16x256xf32>
    %41 = arith.mulf %27, %40 : vector<16x256xf32>
    %cst_18 = arith.constant 0.000000e+00 : f32
    %42 = vector.broadcast %cst_18 : f32 to vector<16x256xf32>
    %43 = arith.subf %42, %20 : vector<16x256xf32>
    %44 = arith.mulf %43, %20 : vector<16x256xf32>
    %45 = math.exp %44 : vector<16x256xf32>
    %46 = arith.mulf %41, %45 : vector<16x256xf32>
    %cst_19 = arith.constant 1.000000e+00 : f32
    %47 = vector.broadcast %cst_19 : f32 to vector<16x256xf32>
    %48 = arith.subf %47, %46 : vector<16x256xf32>
    %cst_20 = arith.constant 0.000000e+00 : f32
    %49 = vector.broadcast %cst_20 : f32 to vector<16x256xf32>
    %50 = arith.cmpf oge, %20, %49 : vector<16x256xf32>
    %cst_21 = arith.constant 0.000000e+00 : f32
    %51 = vector.broadcast %cst_21 : f32 to vector<16x256xf32>
    %52 = arith.subf %51, %48 : vector<16x256xf32>
    %53 = arith.select %50, %48, %52 : vector<16x256xi1>, vector<16x256xf32>
    %cst_22 = arith.constant 1.000000e+00 : f32
    %54 = vector.broadcast %cst_22 : f32 to vector<16x256xf32>
    %55 = arith.addf %54, %53 : vector<16x256xf32>
    %56 = arith.mulf %18, %55 : vector<16x256xf32>
    %c0_23 = arith.constant 0 : index
    %c0_24 = arith.constant 0 : index
    %57 = vector.load %arg4[%c0_23, %c0_24] : memref<128x256xbf16, #tpu.memory_space<vmem>>, vector<128x256xbf16>
    %58 = arith.truncf %56 : vector<16x256xf32> to vector<16x256xbf16>
    %cst_25 = arith.constant dense<0.000000e+00> : vector<16x128xf32>
    %59 = tpu.matmul %58, %57, %cst_25 {dimension_numbers = #tpu.dot_dimension_numbers<[1], [1], [0], [0], [0, 0, 1, 0], [], []>} : vector<16x256xbf16>, vector<128x256xbf16>, vector<16x128xf32> -> vector<16x128xf32>
    %60 = arith.addf %0, %59 : vector<16x128xf32>
    %c0_26 = arith.constant 0 : index
    %c0_27 = arith.constant 0 : index
    %61 = vector.load %arg5[%c0_26, %c0_27] : memref<16x128xf32, #tpu.memory_space<vmem>>, vector<16x128xf32>
    tpu.vector_store %arg5[%c0_26, %c0_27], %60 {strides = array<i32>} : memref<16x128xf32, #tpu.memory_space<vmem>>, vector<16x128xf32>,
    return
  }
  func.func @transform_0(%arg0: i32) -> (i32, i32) {
    %c0_i32 = arith.constant 0 : i32
    %c0_i32_0 = arith.constant 0 : i32
    return %arg0, %c0_i32 : i32, i32
  }
  func.func @transform_1(%arg0: i32) -> (i32, i32) {
    %c0_i32 = arith.constant 0 : i32
    %c0_i32_0 = arith.constant 0 : i32
    %c0_i32_1 = arith.constant 0 : i32
    return %c0_i32, %c0_i32_0 : i32, i32
  }
  func.func @transform_2(%arg0: i32) -> (i32, i32) {
    %c0_i32 = arith.constant 0 : i32
    %c0_i32_0 = arith.constant 0 : i32
    %c0_i32_1 = arith.constant 0 : i32
    return %c0_i32, %c0_i32_0 : i32, i32
  }
  func.func @transform_3(%arg0: i32) -> (i32, i32) {
    %c0_i32 = arith.constant 0 : i32
    %c0_i32_0 = arith.constant 0 : i32
    %c0_i32_1 = arith.constant 0 : i32
    return %c0_i32, %c0_i32_0 : i32, i32
  }
  func.func @transform_4(%arg0: i32) -> (i32, i32) {
    %c0_i32 = arith.constant 0 : i32
    %c0_i32_0 = arith.constant 0 : i32
    return %arg0, %c0_i32 : i32, i32
  }
}

module attributes {stable_mosaic.version = 11 : i64} {
  func.func @_mla_block_kernel(%arg0: i32, %arg1: memref<1x8x128xf32, #tpu.memory_space<vmem>>, %arg2: memref<1x128xf32, #tpu.memory_space<vmem>>, %arg3: memref<2x64x128xbf16, #tpu.memory_space<vmem>>, %arg4: memref<2x64x128xbf16, #tpu.memory_space<vmem>>, %arg5: memref<2x64x128xbf16, #tpu.memory_space<vmem>>, %arg6: memref<128x8xbf16, #tpu.memory_space<vmem>>, %arg7: memref<128x8xbf16, #tpu.memory_space<vmem>>, %arg8: memref<128x128xbf16, #tpu.memory_space<vmem>>, %arg9: memref<1x1x128xf32, #tpu.memory_space<vmem>>, %arg10: memref<1x8x128xf32, #tpu.memory_space<vmem>>) attributes {dimension_semantics = [#tpu.dimension_semantics<parallel>], iteration_bounds = array<i64: 2>, scalar_prefetch = 0 : i64, scratch_operands = 0 : i64, tpu.core_type = #tpu.core_type<tc>, window_params = [{transform_indices = @transform_0, window_bounds = array<i64: 1, 8, 128>}, {pipeline_mode = #tpu.pipeline_mode<synchronous>, transform_indices = @transform_1, window_bounds = array<i64: 1, 128>}, {pipeline_mode = #tpu.pipeline_mode<synchronous>, transform_indices = @transform_2, window_bounds = array<i64: 2, 64, 128>}, {pipeline_mode = #tpu.pipeline_mode<synchronous>, transform_indices = @transform_3, window_bounds = array<i64: 2, 64, 128>}, {pipeline_mode = #tpu.pipeline_mode<synchronous>, transform_indices = @transform_4, window_bounds = array<i64: 2, 64, 128>}, {pipeline_mode = #tpu.pipeline_mode<synchronous>, transform_indices = @transform_5, window_bounds = array<i64: 128, 8>}, {pipeline_mode = #tpu.pipeline_mode<synchronous>, transform_indices = @transform_6, window_bounds = array<i64: 128, 8>}, {pipeline_mode = #tpu.pipeline_mode<synchronous>, transform_indices = @transform_7, window_bounds = array<i64: 128, 128>}, {transform_indices = @transform_8, window_bounds = array<i64: 1, 1, 128>}, {transform_indices = @transform_9, window_bounds = array<i64: 1, 8, 128>}]} {
    %c0 = arith.constant 0 : index
    %c0_0 = arith.constant 0 : index
    %c0_1 = arith.constant 0 : index
    %0 = vector.load %arg1[%c0, %c0_0, %c0_1] : memref<1x8x128xf32, #tpu.memory_space<vmem>>, vector<1x8x128xf32>
    %1 = vector.shape_cast %0 : vector<1x8x128xf32> to vector<8x128xf32>
    %c0_2 = arith.constant 0 : index
    %c0_3 = arith.constant 0 : index
    %2 = vector.load %arg2[%c0_2, %c0_3] : memref<1x128xf32, #tpu.memory_space<vmem>>, vector<1x128xf32>
    %3 = arith.mulf %1, %1 : vector<8x128xf32>
    %cst = arith.constant dense<0.000000e+00> : vector<8xf32>
    %4 = vector.multi_reduction <add>, %3, %cst [1] : vector<8x128xf32> to vector<8xf32>
    %5 = vector.shape_cast %4 : vector<8xf32> to vector<8x1xf32>
    %cst_4 = arith.constant 1.280000e+02 : f32
    %6 = vector.broadcast %cst_4 : f32 to vector<8x1xf32>
    %7 = arith.divf %5, %6 : vector<8x1xf32>
    %8 = vector.broadcast %2 : vector<1x128xf32> to vector<8x128xf32>
    %9 = arith.mulf %8, %1 : vector<8x128xf32>
    %cst_5 = arith.constant 9.99999997E-7 : f32
    %10 = vector.broadcast %cst_5 : f32 to vector<8x1xf32>
    %11 = arith.addf %7, %10 : vector<8x1xf32>
    %12 = math.rsqrt %11 : vector<8x1xf32>
    %13 = vector.broadcast %12 : vector<8x1xf32> to vector<8x128xf32>
    %14 = arith.mulf %9, %13 : vector<8x128xf32>
    %15 = arith.truncf %14 : vector<8x128xf32> to vector<8x128xbf16>
    %16 = vector.shape_cast %15 : vector<8x128xbf16> to vector<1x8x128xbf16>
    %17 = vector.broadcast %16 : vector<1x8x128xbf16> to vector<2x8x128xbf16>
    %c0_6 = arith.constant 0 : index
    %c0_7 = arith.constant 0 : index
    %c0_8 = arith.constant 0 : index
    %18 = vector.load %arg3[%c0_6, %c0_7, %c0_8] : memref<2x64x128xbf16, #tpu.memory_space<vmem>>, vector<2x64x128xbf16>
    %cst_9 = arith.constant dense<0.000000e+00> : vector<2x8x64xf32>
    %19 = tpu.matmul %17, %18, %cst_9 {dimension_numbers = #tpu.dot_dimension_numbers<[2], [2], [1], [1], [0, 0, 0, 1, 1, 1], [0], [0]>} : vector<2x8x128xbf16>, vector<2x64x128xbf16>, vector<2x8x64xf32> -> vector<2x8x64xf32>
    %c0_10 = arith.constant 0 : index
    %c0_11 = arith.constant 0 : index
    %c0_12 = arith.constant 0 : index
    %20 = vector.load %arg4[%c0_10, %c0_11, %c0_12] : memref<2x64x128xbf16, #tpu.memory_space<vmem>>, vector<2x64x128xbf16>
    %cst_13 = arith.constant dense<0.000000e+00> : vector<2x8x64xf32>
    %21 = tpu.matmul %17, %20, %cst_13 {dimension_numbers = #tpu.dot_dimension_numbers<[2], [2], [1], [1], [0, 0, 0, 1, 1, 1], [0], [0]>} : vector<2x8x128xbf16>, vector<2x64x128xbf16>, vector<2x8x64xf32> -> vector<2x8x64xf32>
    %c0_14 = arith.constant 0 : index
    %c0_15 = arith.constant 0 : index
    %c0_16 = arith.constant 0 : index
    %22 = vector.load %arg5[%c0_14, %c0_15, %c0_16] : memref<2x64x128xbf16, #tpu.memory_space<vmem>>, vector<2x64x128xbf16>
    %cst_17 = arith.constant dense<0.000000e+00> : vector<2x8x64xf32>
    %23 = tpu.matmul %17, %22, %cst_17 {dimension_numbers = #tpu.dot_dimension_numbers<[2], [2], [1], [1], [0, 0, 0, 1, 1, 1], [0], [0]>} : vector<2x8x128xbf16>, vector<2x64x128xbf16>, vector<2x8x64xf32> -> vector<2x8x64xf32>
    %c0_18 = arith.constant 0 : index
    %c0_19 = arith.constant 0 : index
    %24 = vector.load %arg6[%c0_18, %c0_19] : memref<128x8xbf16, #tpu.memory_space<vmem>>, vector<128x8xbf16>
    %25 = vector.shape_cast %24 : vector<128x8xbf16> to vector<1x128x8xbf16>
    %26 = vector.broadcast %25 : vector<1x128x8xbf16> to vector<2x128x8xbf16>
    %c0_20 = arith.constant 0 : index
    %c0_21 = arith.constant 0 : index
    %27 = vector.load %arg7[%c0_20, %c0_21] : memref<128x8xbf16, #tpu.memory_space<vmem>>, vector<128x8xbf16>
    %28 = vector.shape_cast %27 : vector<128x8xbf16> to vector<1x128x8xbf16>
    %29 = vector.broadcast %28 : vector<1x128x8xbf16> to vector<2x128x8xbf16>
    %30 = arith.truncf %21 : vector<2x8x64xf32> to vector<2x8x64xbf16>
    %cst_22 = arith.constant dense<0.000000e+00> : vector<2x128x64xf32>
    %31 = tpu.matmul %26, %30, %cst_22 {dimension_numbers = #tpu.dot_dimension_numbers<[2], [1], [1], [2], [0, 0, 0, 1, 1, 2], [0], [0]>} : vector<2x128x8xbf16>, vector<2x8x64xbf16>, vector<2x128x64xf32> -> vector<2x128x64xf32>
    %32 = arith.truncf %23 : vector<2x8x64xf32> to vector<2x8x64xbf16>
    %cst_23 = arith.constant dense<0.000000e+00> : vector<2x128x64xf32>
    %33 = tpu.matmul %29, %32, %cst_23 {dimension_numbers = #tpu.dot_dimension_numbers<[2], [1], [1], [2], [0, 0, 0, 1, 1, 2], [0], [0]>} : vector<2x128x8xbf16>, vector<2x8x64xbf16>, vector<2x128x64xf32> -> vector<2x128x64xf32>
    %34 = tpu.iota {dimensions = array<i32: 0>} : vector<8x128xi32>
    %35 = tpu.iota {dimensions = array<i32: 1>} : vector<8x128xi32>
    %36 = arith.cmpi sle, %35, %34 : vector<8x128xi32>
    %c0_24 = arith.constant 0 : index
    %c0_25 = arith.constant 0 : index
    %c0_26 = arith.constant 0 : index
    %37 = vector.load %arg9[%c0_24, %c0_25, %c0_26] : memref<1x1x128xf32, #tpu.memory_space<vmem>>, vector<1x1x128xf32>
    %38 = vector.shape_cast %37 : vector<1x1x128xf32> to vector<1x128xf32>
    %cst_27 = arith.constant 5.000000e-01 : f32
    %39 = vector.broadcast %cst_27 : f32 to vector<1x128xf32>
    %40 = arith.cmpf ogt, %38, %39 : vector<1x128xf32>
    %41 = vector.broadcast %40 : vector<1x128xi1> to vector<8x128xi1>
    %42 = arith.andi %36, %41 : vector<8x128xi1>
    %43 = vector.shape_cast %42 : vector<8x128xi1> to vector<1x8x128xi1>
    %44 = vector.shape_cast %43 : vector<1x8x128xi1> to vector<1x8x128xi1>
    %45 = vector.broadcast %44 : vector<1x8x128xi1> to vector<2x8x128xi1>
    %46 = arith.truncf %19 : vector<2x8x64xf32> to vector<2x8x64xbf16>
    %47 = arith.truncf %31 : vector<2x128x64xf32> to vector<2x128x64xbf16>
    %cst_28 = arith.constant dense<0.000000e+00> : vector<2x8x128xf32>
    %48 = tpu.matmul %46, %47, %cst_28 {dimension_numbers = #tpu.dot_dimension_numbers<[2], [2], [1], [1], [0, 0, 0, 1, 1, 1], [0], [0]>} : vector<2x8x64xbf16>, vector<2x128x64xbf16>, vector<2x8x128xf32> -> vector<2x8x128xf32>
    %cst_29 = arith.constant -1.000000e+09 : f32
    %49 = vector.broadcast %cst_29 : f32 to vector<2x8x128xf32>
    %50 = arith.select %45, %48, %49 : vector<2x8x128xi1>, vector<2x8x128xf32>
    %cst_30 = arith.constant dense<0xFF800000> : vector<2x8xf32>
    %51 = vector.multi_reduction <maximumf>, %50, %cst_30 [2] : vector<2x8x128xf32> to vector<2x8xf32>
    %52 = vector.shape_cast %51 : vector<2x8xf32> to vector<2x8x1xf32>
    %53 = vector.broadcast %52 : vector<2x8x1xf32> to vector<2x8x128xf32>
    %54 = arith.subf %50, %53 : vector<2x8x128xf32>
    %55 = math.exp %54 : vector<2x8x128xf32>
    %cst_31 = arith.constant dense<0.000000e+00> : vector<2x8xf32>
    %56 = vector.multi_reduction <add>, %55, %cst_31 [2] : vector<2x8x128xf32> to vector<2x8xf32>
    %57 = vector.shape_cast %56 : vector<2x8xf32> to vector<2x8x1xf32>
    %58 = vector.broadcast %57 : vector<2x8x1xf32> to vector<2x8x128xf32>
    %59 = arith.divf %55, %58 : vector<2x8x128xf32>
    %60 = arith.truncf %59 : vector<2x8x128xf32> to vector<2x8x128xbf16>
    %61 = arith.truncf %33 : vector<2x128x64xf32> to vector<2x128x64xbf16>
    %cst_32 = arith.constant dense<0.000000e+00> : vector<2x8x64xf32>
    %62 = tpu.matmul %60, %61, %cst_32 {dimension_numbers = #tpu.dot_dimension_numbers<[2], [1], [1], [2], [0, 0, 0, 1, 1, 2], [0], [0]>} : vector<2x8x128xbf16>, vector<2x128x64xbf16>, vector<2x8x64xf32> -> vector<2x8x64xf32>
    %63 = vector.extract_strided_slice %62 {offsets = [0, 0, 0], sizes = [1, 8, 64], strides = [1, 1, 1]} : vector<2x8x64xf32> to vector<1x8x64xf32>
    %64 = vector.shape_cast %63 : vector<1x8x64xf32> to vector<8x64xf32>
    %65 = vector.extract_strided_slice %62 {offsets = [1, 0, 0], sizes = [1, 8, 64], strides = [1, 1, 1]} : vector<2x8x64xf32> to vector<1x8x64xf32>
    %66 = vector.shape_cast %65 : vector<1x8x64xf32> to vector<8x64xf32>
    %67 = tpu.concatenate %64, %66 in 1 : vector<8x64xf32>, vector<8x64xf32> -> vector<8x128xf32>
    %c0_33 = arith.constant 0 : index
    %c0_34 = arith.constant 0 : index
    %68 = vector.load %arg8[%c0_33, %c0_34] : memref<128x128xbf16, #tpu.memory_space<vmem>>, vector<128x128xbf16>
    %69 = arith.truncf %67 : vector<8x128xf32> to vector<8x128xbf16>
    %cst_35 = arith.constant dense<0.000000e+00> : vector<8x128xf32>
    %70 = tpu.matmul %69, %68, %cst_35 {dimension_numbers = #tpu.dot_dimension_numbers<[1], [1], [0], [0], [0, 0, 1, 0], [], []>} : vector<8x128xbf16>, vector<128x128xbf16>, vector<8x128xf32> -> vector<8x128xf32>
    %71 = arith.addf %1, %70 : vector<8x128xf32>
    %c0_36 = arith.constant 0 : index
    %c0_37 = arith.constant 0 : index
    %c0_38 = arith.constant 0 : index
    %72 = vector.load %arg10[%c0_36, %c0_37, %c0_38] : memref<1x8x128xf32, #tpu.memory_space<vmem>>, vector<1x8x128xf32>
    %73 = vector.shape_cast %72 : vector<1x8x128xf32> to vector<8x128xf32>
    %74 = vector.shape_cast %71 : vector<8x128xf32> to vector<1x8x128xf32>
    tpu.vector_store %arg10[%c0_36, %c0_37, %c0_38], %74 {strides = array<i32>} : memref<1x8x128xf32, #tpu.memory_space<vmem>>, vector<1x8x128xf32>,
    return
  }
  func.func @transform_0(%arg0: i32) -> (i32, i32, i32) {
    %c0_i32 = arith.constant 0 : i32
    %c0_i32_0 = arith.constant 0 : i32
    %c0_i32_1 = arith.constant 0 : i32
    return %arg0, %c0_i32, %c0_i32_0 : i32, i32, i32
  }
  func.func @transform_1(%arg0: i32) -> (i32, i32) {
    %c0_i32 = arith.constant 0 : i32
    %c0_i32_0 = arith.constant 0 : i32
    %c0_i32_1 = arith.constant 0 : i32
    return %c0_i32, %c0_i32_0 : i32, i32
  }
  func.func @transform_2(%arg0: i32) -> (i32, i32, i32) {
    %c0_i32 = arith.constant 0 : i32
    %c0_i32_0 = arith.constant 0 : i32
    %c0_i32_1 = arith.constant 0 : i32
    %c0_i32_2 = arith.constant 0 : i32
    return %c0_i32, %c0_i32_0, %c0_i32_1 : i32, i32, i32
  }
  func.func @transform_3(%arg0: i32) -> (i32, i32, i32) {
    %c0_i32 = arith.constant 0 : i32
    %c0_i32_0 = arith.constant 0 : i32
    %c0_i32_1 = arith.constant 0 : i32
    %c0_i32_2 = arith.constant 0 : i32
    return %c0_i32, %c0_i32_0, %c0_i32_1 : i32, i32, i32
  }
  func.func @transform_4(%arg0: i32) -> (i32, i32, i32) {
    %c0_i32 = arith.constant 0 : i32
    %c0_i32_0 = arith.constant 0 : i32
    %c0_i32_1 = arith.constant 0 : i32
    %c0_i32_2 = arith.constant 0 : i32
    return %c0_i32, %c0_i32_0, %c0_i32_1 : i32, i32, i32
  }
  func.func @transform_5(%arg0: i32) -> (i32, i32) {
    %c0_i32 = arith.constant 0 : i32
    %c0_i32_0 = arith.constant 0 : i32
    %c0_i32_1 = arith.constant 0 : i32
    return %c0_i32, %c0_i32_0 : i32, i32
  }
  func.func @transform_6(%arg0: i32) -> (i32, i32) {
    %c0_i32 = arith.constant 0 : i32
    %c0_i32_0 = arith.constant 0 : i32
    %c0_i32_1 = arith.constant 0 : i32
    return %c0_i32, %c0_i32_0 : i32, i32
  }
  func.func @transform_7(%arg0: i32) -> (i32, i32) {
    %c0_i32 = arith.constant 0 : i32
    %c0_i32_0 = arith.constant 0 : i32
    %c0_i32_1 = arith.constant 0 : i32
    return %c0_i32, %c0_i32_0 : i32, i32
  }
  func.func @transform_8(%arg0: i32) -> (i32, i32, i32) {
    %c0_i32 = arith.constant 0 : i32
    %c0_i32_0 = arith.constant 0 : i32
    %c0_i32_1 = arith.constant 0 : i32
    return %arg0, %c0_i32, %c0_i32_0 : i32, i32, i32
  }
  func.func @transform_9(%arg0: i32) -> (i32, i32, i32) {
    %c0_i32 = arith.constant 0 : i32
    %c0_i32_0 = arith.constant 0 : i32
    %c0_i32_1 = arith.constant 0 : i32
    return %arg0, %c0_i32, %c0_i32_0 : i32, i32, i32
  }
}

module attributes {stable_mosaic.version = 11 : i64} {
  func.func @_moe_block_kernel(%arg0: i32, %arg1: i32, %arg2: memref<16x128xf32, #tpu.memory_space<vmem>>, %arg3: memref<1x128xf32, #tpu.memory_space<vmem>>, %arg4: memref<1x256x128xbf16, #tpu.memory_space<vmem>>, %arg5: memref<1x128x256xbf16, #tpu.memory_space<vmem>>, %arg6: memref<1x16x1xf32, #tpu.memory_space<vmem>>, %arg7: memref<16x128xf32, #tpu.memory_space<vmem>>, %arg8: memref<16x128xbf16, #tpu.memory_space<vmem>>) attributes {dimension_semantics = [#tpu.dimension_semantics<parallel>, #tpu.dimension_semantics<arbitrary>], iteration_bounds = array<i64: 1, 4>, scalar_prefetch = 0 : i64, scratch_operands = 1 : i64, tpu.core_type = #tpu.core_type<tc>, window_params = [{transform_indices = @transform_0, window_bounds = array<i64: 16, 128>}, {pipeline_mode = #tpu.pipeline_mode<synchronous>, transform_indices = @transform_1, window_bounds = array<i64: 1, 128>}, {transform_indices = @transform_2, window_bounds = array<i64: 1, 256, 128>}, {transform_indices = @transform_3, window_bounds = array<i64: 1, 128, 256>}, {transform_indices = @transform_4, window_bounds = array<i64: 1, 16, 1>}, {transform_indices = @transform_5, window_bounds = array<i64: 16, 128>}]} {
    %c0_i32 = arith.constant 0 : i32
    %0 = arith.cmpi eq, %arg1, %c0_i32 : i32
    %1 = arith.extui %0 : i1 to i32
    %c0_i32_0 = arith.constant 0 : i32
    %2 = arith.cmpi ne, %1, %c0_i32_0 : i32
    scf.if %2 {
      %c0_31 = arith.constant 0 : index
      %c0_32 = arith.constant 0 : index
      %58 = vector.load %arg2[%c0_31, %c0_32] : memref<16x128xf32, #tpu.memory_space<vmem>>, vector<16x128xf32>
      %c0_33 = arith.constant 0 : index
      %c0_34 = arith.constant 0 : index
      %59 = vector.load %arg3[%c0_33, %c0_34] : memref<1x128xf32, #tpu.memory_space<vmem>>, vector<1x128xf32>
      %60 = arith.mulf %58, %58 : vector<16x128xf32>
      %cst_35 = arith.constant dense<0.000000e+00> : vector<16xf32>
      %61 = vector.multi_reduction <add>, %60, %cst_35 [1] : vector<16x128xf32> to vector<16xf32>
      %62 = vector.shape_cast %61 : vector<16xf32> to vector<16x1xf32>
      %cst_36 = arith.constant 1.280000e+02 : f32
      %63 = vector.broadcast %cst_36 : f32 to vector<16x1xf32>
      %64 = arith.divf %62, %63 : vector<16x1xf32>
      %65 = vector.broadcast %59 : vector<1x128xf32> to vector<16x128xf32>
      %66 = arith.mulf %65, %58 : vector<16x128xf32>
      %cst_37 = arith.constant 9.99999997E-7 : f32
      %67 = vector.broadcast %cst_37 : f32 to vector<16x1xf32>
      %68 = arith.addf %64, %67 : vector<16x1xf32>
      %69 = math.rsqrt %68 : vector<16x1xf32>
      %70 = vector.broadcast %69 : vector<16x1xf32> to vector<16x128xf32>
      %71 = arith.mulf %66, %70 : vector<16x128xf32>
      %72 = arith.truncf %71 : vector<16x128xf32> to vector<16x128xbf16>
      %c0_38 = arith.constant 0 : index
      %c0_39 = arith.constant 0 : index
      %73 = vector.load %arg8[%c0_38, %c0_39] : memref<16x128xbf16, #tpu.memory_space<vmem>>, vector<16x128xbf16>
      tpu.vector_store %arg8[%c0_38, %c0_39], %72 {strides = array<i32>} : memref<16x128xbf16, #tpu.memory_space<vmem>>, vector<16x128xbf16>,
      %c0_40 = arith.constant 0 : index
      %c0_41 = arith.constant 0 : index
      %74 = vector.load %arg7[%c0_40, %c0_41] : memref<16x128xf32, #tpu.memory_space<vmem>>, vector<16x128xf32>
      tpu.vector_store %arg7[%c0_40, %c0_41], %58 {strides = array<i32>} : memref<16x128xf32, #tpu.memory_space<vmem>>, vector<16x128xf32>,
    } else {
    }
    %c0 = arith.constant 0 : index
    %c0_1 = arith.constant 0 : index
    %3 = vector.load %arg8[%c0, %c0_1] : memref<16x128xbf16, #tpu.memory_space<vmem>>, vector<16x128xbf16>
    %c0_2 = arith.constant 0 : index
    %c0_3 = arith.constant 0 : index
    %c0_4 = arith.constant 0 : index
    %4 = vector.load %arg4[%c0_2, %c0_3, %c0_4] : memref<1x256x128xbf16, #tpu.memory_space<vmem>>, vector<1x256x128xbf16>
    %5 = vector.shape_cast %4 : vector<1x256x128xbf16> to vector<256x128xbf16>
    %cst = arith.constant dense<0.000000e+00> : vector<16x256xf32>
    %6 = tpu.matmul %3, %5, %cst {dimension_numbers = #tpu.dot_dimension_numbers<[1], [1], [0], [0], [0, 0, 1, 0], [], []>} : vector<16x128xbf16>, vector<256x128xbf16>, vector<16x256xf32> -> vector<16x256xf32>
    %cst_5 = arith.constant 5.000000e-01 : f32
    %7 = vector.broadcast %cst_5 : f32 to vector<16x256xf32>
    %8 = arith.mulf %7, %6 : vector<16x256xf32>
    %cst_6 = arith.constant 0.707106769 : f32
    %9 = vector.broadcast %cst_6 : f32 to vector<16x256xf32>
    %10 = arith.mulf %6, %9 : vector<16x256xf32>
    %11 = math.absf %10 : vector<16x256xf32>
    %cst_7 = arith.constant 0.327591091 : f32
    %12 = vector.broadcast %cst_7 : f32 to vector<16x256xf32>
    %13 = arith.mulf %12, %11 : vector<16x256xf32>
    %cst_8 = arith.constant 1.000000e+00 : f32
    %14 = vector.broadcast %cst_8 : f32 to vector<16x256xf32>
    %15 = arith.addf %14, %13 : vector<16x256xf32>
    %cst_9 = arith.constant 1.000000e+00 : f32
    %16 = vector.broadcast %cst_9 : f32 to vector<16x256xf32>
    %17 = arith.divf %16, %15 : vector<16x256xf32>
    %cst_10 = arith.constant 1.06140542 : f32
    %18 = vector.broadcast %cst_10 : f32 to vector<16x256xf32>
    %19 = arith.mulf %17, %18 : vector<16x256xf32>
    %cst_11 = arith.constant -1.45315206 : f32
    %20 = vector.broadcast %cst_11 : f32 to vector<16x256xf32>
    %21 = arith.addf %20, %19 : vector<16x256xf32>
    %22 = arith.mulf %17, %21 : vector<16x256xf32>
    %cst_12 = arith.constant 1.42141378 : f32
    %23 = vector.broadcast %cst_12 : f32 to vector<16x256xf32>
    %24 = arith.addf %23, %22 : vector<16x256xf32>
    %25 = arith.mulf %17, %24 : vector<16x256xf32>
    %cst_13 = arith.constant -0.284496725 : f32
    %26 = vector.broadcast %cst_13 : f32 to vector<16x256xf32>
    %27 = arith.addf %26, %25 : vector<16x256xf32>
    %28 = arith.mulf %17, %27 : vector<16x256xf32>
    %cst_14 = arith.constant 0.254829586 : f32
    %29 = vector.broadcast %cst_14 : f32 to vector<16x256xf32>
    %30 = arith.addf %29, %28 : vector<16x256xf32>
    %31 = arith.mulf %17, %30 : vector<16x256xf32>
    %cst_15 = arith.constant 0.000000e+00 : f32
    %32 = vector.broadcast %cst_15 : f32 to vector<16x256xf32>
    %33 = arith.subf %32, %10 : vector<16x256xf32>
    %34 = arith.mulf %33, %10 : vector<16x256xf32>
    %35 = math.exp %34 : vector<16x256xf32>
    %36 = arith.mulf %31, %35 : vector<16x256xf32>
    %cst_16 = arith.constant 1.000000e+00 : f32
    %37 = vector.broadcast %cst_16 : f32 to vector<16x256xf32>
    %38 = arith.subf %37, %36 : vector<16x256xf32>
    %cst_17 = arith.constant 0.000000e+00 : f32
    %39 = vector.broadcast %cst_17 : f32 to vector<16x256xf32>
    %40 = arith.cmpf oge, %10, %39 : vector<16x256xf32>
    %cst_18 = arith.constant 0.000000e+00 : f32
    %41 = vector.broadcast %cst_18 : f32 to vector<16x256xf32>
    %42 = arith.subf %41, %38 : vector<16x256xf32>
    %43 = arith.select %40, %38, %42 : vector<16x256xi1>, vector<16x256xf32>
    %cst_19 = arith.constant 1.000000e+00 : f32
    %44 = vector.broadcast %cst_19 : f32 to vector<16x256xf32>
    %45 = arith.addf %44, %43 : vector<16x256xf32>
    %46 = arith.mulf %8, %45 : vector<16x256xf32>
    %c0_20 = arith.constant 0 : index
    %c0_21 = arith.constant 0 : index
    %c0_22 = arith.constant 0 : index
    %47 = vector.load %arg5[%c0_20, %c0_21, %c0_22] : memref<1x128x256xbf16, #tpu.memory_space<vmem>>, vector<1x128x256xbf16>
    %48 = vector.shape_cast %47 : vector<1x128x256xbf16> to vector<128x256xbf16>
    %49 = arith.truncf %46 : vector<16x256xf32> to vector<16x256xbf16>
    %cst_23 = arith.constant dense<0.000000e+00> : vector<16x128xf32>
    %50 = tpu.matmul %49, %48, %cst_23 {dimension_numbers = #tpu.dot_dimension_numbers<[1], [1], [0], [0], [0, 0, 1, 0], [], []>} : vector<16x256xbf16>, vector<128x256xbf16>, vector<16x128xf32> -> vector<16x128xf32>
    %c0_24 = arith.constant 0 : index
    %c0_25 = arith.constant 0 : index
    %51 = vector.load %arg7[%c0_24, %c0_25] : memref<16x128xf32, #tpu.memory_space<vmem>>, vector<16x128xf32>
    %c0_26 = arith.constant 0 : index
    %c0_27 = arith.constant 0 : index
    %c0_28 = arith.constant 0 : index
    %52 = vector.load %arg6[%c0_26, %c0_27, %c0_28] : memref<1x16x1xf32, #tpu.memory_space<vmem>>, vector<1x16x1xf32>
    %53 = vector.shape_cast %52 : vector<1x16x1xf32> to vector<16x1xf32>
    %54 = vector.broadcast %53 : vector<16x1xf32> to vector<16x128xf32>
    %55 = arith.mulf %50, %54 : vector<16x128xf32>
    %56 = arith.addf %51, %55 : vector<16x128xf32>
    %c0_29 = arith.constant 0 : index
    %c0_30 = arith.constant 0 : index
    %57 = vector.load %arg7[%c0_29, %c0_30] : memref<16x128xf32, #tpu.memory_space<vmem>>, vector<16x128xf32>
    tpu.vector_store %arg7[%c0_29, %c0_30], %56 {strides = array<i32>} : memref<16x128xf32, #tpu.memory_space<vmem>>, vector<16x128xf32>,
    return
  }
  func.func @transform_0(%arg0: i32, %arg1: i32) -> (i32, i32) {
    %c0_i32 = arith.constant 0 : i32
    %c0_i32_0 = arith.constant 0 : i32
    return %arg0, %c0_i32 : i32, i32
  }
  func.func @transform_1(%arg0: i32, %arg1: i32) -> (i32, i32) {
    %c0_i32 = arith.constant 0 : i32
    %c0_i32_0 = arith.constant 0 : i32
    %c0_i32_1 = arith.constant 0 : i32
    return %c0_i32, %c0_i32_0 : i32, i32
  }
  func.func @transform_2(%arg0: i32, %arg1: i32) -> (i32, i32, i32) {
    %c0_i32 = arith.constant 0 : i32
    %c0_i32_0 = arith.constant 0 : i32
    %c0_i32_1 = arith.constant 0 : i32
    return %arg1, %c0_i32, %c0_i32_0 : i32, i32, i32
  }
  func.func @transform_3(%arg0: i32, %arg1: i32) -> (i32, i32, i32) {
    %c0_i32 = arith.constant 0 : i32
    %c0_i32_0 = arith.constant 0 : i32
    %c0_i32_1 = arith.constant 0 : i32
    return %arg1, %c0_i32, %c0_i32_0 : i32, i32, i32
  }
  func.func @transform_4(%arg0: i32, %arg1: i32) -> (i32, i32, i32) {
    %c0_i32 = arith.constant 0 : i32
    %c0_i32_0 = arith.constant 0 : i32
    return %arg1, %arg0, %c0_i32 : i32, i32, i32
  }
  func.func @transform_5(%arg0: i32, %arg1: i32) -> (i32, i32) {
    %c0_i32 = arith.constant 0 : i32
    %c0_i32_0 = arith.constant 0 : i32
    return %arg0, %c0_i32 : i32, i32
  }
}

</mosaic_0001>

<bundles_post_ra>
// kernel: _lambda_.9
= control target key start
LH: loop header
LB: loop body
LE: loop exit
PB: predicated region body
PF: predicated region fallthrough
CT: control target
= control target key end

     0   :  { %v219_v11 = vmov 128.0   ;;  %s279_s0 = inlined_call_operand.vmem [shape: f32[16,128], index: 0, kind: input, shape index: {}]   ;;  %s280_s1 = inlined_call_operand.vmem [shape: f32[1,128], index: 1, kind: input, shape index: {}]   ;;  %s281_s2 = inlined_call_operand.vmem [shape: bf16[128,128], index: 2, kind: input, shape index: {}]   ;;  %s282_s3 = inlined_call_operand.vmem [shape: f32[16,128], index: 3, kind: output, shape index: {}]  }
   0x1   :  { %v18_v0 = vld [vmem:[%s279_s0] sm:$0xff]  ;;  %v19_v3 = vld [vmem:[%s279_s0 + $0x8] sm:$0xff]  ;;  %v205_v4 = vld [vmem:[%s281_s2 + $0x38] sm:$0xff]  ;;  %213 = vrcp.f32 %v219_v11 }
   0x2   :  { %v212_v1 = vld [vmem:[%s280_s1] ss:$0 sm:$0xff]  ;;  %v21_v2 = vmul.f32 %v18_v0, %v18_v0  ;;  %141 = vmatpush.bf16.xpose.msra.mxu0 %v205_v4  ;;  %v22_v7 = vmul.f32 %v19_v3, %v19_v3  ;;  %v204_v8 = vld [vmem:[%s281_s2 + $0x30] sm:$0xff]  ;;  %v203_v9 = vld [vmem:[%s281_s2 + $0x28] sm:$0xff] }
   0x3   :  { %v39_v5 = vmul.f32 %v212_v1, %v18_v0  ;;  %v40_v6 = vmul.f32 %v212_v1, %v19_v3  ;;  %v202_v10 = vld [vmem:[%s281_s2 + $0x20] sm:$0xff]  ;;  %v201_v13 = vld [vmem:[%s281_s2 + $0x18] sm:$0xff]  ;;  %v200_v16 = vld [vmem:[%s281_s2 + $0x10] sm:$0xff] }
   0x4   :  { %23 = vadd.xlane.f32.xlu0 %v21_v2  ;;  %v199_v19 = vld [vmem:[%s281_s2 + $0x8] sm:$0xff]  ;;  %v198_v24 = vld [vmem:[%s281_s2] sm:$0xff] }
   0x7   :  { %v214_v12 = vpop.eup %213 }
   0x8   :  { %v28_v14 = vmul.f32 128.0, %v214_v12  ;;  %vm32_vm0 = vweird.f32 %v214_v12 }
   0xa   :  { %142 = vmatpush.bf16.xpose.msra.mxu0 %v204_v8  ;;  %v29_v15 = vsub.f32 1.0, %v28_v14 }
   0xc   :  { %25 = vadd.xlane.f32.xlu0 %v22_v7  ;;  %v30_v17 = vmul.f32 %v214_v12, %v29_v15 }
   0xe   :  { %v31_v18 = vadd.f32 %v214_v12, %v30_v17 }
  0x10   :  { %v33_v20 = vsel %vm32_vm0, %v214_v12, %v31_v18 }
  0x12   :  { %143 = vmatpush.bf16.xpose.msra.mxu0 %v203_v9 }
  0x1a   :  { %144 = vmatpush.bf16.xpose.msra.mxu0 %v202_v10 }
  0x22   :  { %145 = vmatpush.bf16.xpose.msra.mxu0 %v201_v13 }
  0x2a   :  { %146 = vmatpush.bf16.xpose.msra.mxu0 %v200_v16 }
  0x32   :  { %147 = vmatpush.bf16.xpose.msra.mxu0 %v199_v19 }
  0x3a   :  { %148 = vmatpush.bf16.xpose.msra.mxu0 %v198_v24 }
  0x77   :  { %v24_v21 = vpop.xlane.xlu0 %23 }
  0x78   :  { %v34_v22 = vmul.f32 %v33_v20, %v24_v21 }
  0x7a   :  { %v41_v23 = vadd.f32 1e-06, %v34_v22 }
  0x7c   :  { %215 = vrsqrt.f32 %v41_v23  ;;  %vm49_vm2 = vweird.f32 %v41_v23 }
  0x7f   :  { %v26_v25 = vpop.xlane.xlu0 %25 }
  0x80   :  { %v35_v26 = vmul.f32 %v33_v20, %v26_v25 }
  0x82   :  { %v216_v27 = vpop.eup %215  ;;  %v42_v28 = vadd.f32 1e-06, %v35_v26 }
  0x83   :  { %v44_v29 = vmul.f32 %v216_v27, %v41_v23  ;;  %vm50_vm1 = vweird.f32 %v216_v27 }
  0x84   :  { %217 = vrsqrt.f32 %v42_v28  ;;  %vm51_vm4 = vmor %vm49_vm2, %vm50_vm1  ;;  %vm59_vm5 = vweird.f32 %v42_v28 }
  0x85   :  { %v45_v30 = vmul.f32 %v216_v27, %v44_v29 }
  0x87   :  { %v46_v31 = vmul.f32 0.5, %v45_v30 }
  0x89   :  { %v47_v33 = vsub.f32 1.5, %v46_v31 }
  0x8a   :  { %v218_v32 = vpop.eup %217 }
  0x8b   :  { %v54_v34 = vmul.f32 %v218_v32, %v42_v28  ;;  %v48_v36 = vmul.f32 %v216_v27, %v47_v33  ;;  %vm60_vm3 = vweird.f32 %v218_v32 }
  0x8c   :  { %vm61_vm6 = vmor %vm59_vm5, %vm60_vm3 }
  0x8d   :  { %v55_v35 = vmul.f32 %v218_v32, %v54_v34  ;;  %v52_v39 = vsel %vm51_vm4, %v216_v27, %v48_v36 }
  0x8e   :  { %v63_v42 = vmul.f32 %v52_v39, %v39_v5 }
  0x8f   :  { %v56_v37 = vmul.f32 0.5, %v55_v35 }
  0x91   :  { %v57_v38 = vsub.f32 1.5, %v56_v37 }
  0x93   :  { %v58_v40 = vmul.f32 %v218_v32, %v57_v38 }
  0x95   :  { %v62_v41 = vsel %vm61_vm6, %v218_v32, %v58_v40 }
  0x96   :  { %v64_v43 = vmul.f32 %v62_v41, %v40_v6 }
  0x98   :  { %v209_v44 = vpack.c.bf16 %v64_v43, %v63_v42 }
  0x9a   :  { %210 = vst [vmem:[#allocation2] sm:$0xff] %v209_v44  }
  0xa1   :  { %v197_v45 = vld [vmem:[#allocation2] sm:$0xff] }
  0xa2   :  { %149 = vmatmul.bf16.vlgmr.msra.gmra.mxu0 %v197_v45 }
 0x11f   :  { %v150_v46 = vpop.f32.mrf.mxu0 }
 0x120   :  { %155 = vst [vmem:[%s282_s3] sm:$0xff] %v150_v46 }
 0x127   :  { %v152_v47 = vpop.f32.mrf.mxu0 }
 0x128   :  { %156 = vst [vmem:[%s282_s3 + $0x8] sm:$0xff] %v152_v47 }

// kernel: _lambda_.7
= control target key start
LH: loop header
LB: loop body
LE: loop exit
PB: predicated region body
PF: predicated region fallthrough
CT: control target
= control target key end

     0   :  { %9 = vsyncpa [#allocation3], 0  ;;  %s933_s0 = inlined_call_operand.vmem [shape: f32[16,128], index: 0, kind: input, shape index: {}]   ;;  %s934_s1 = inlined_call_operand.vmem [shape: f32[1,128], index: 1, kind: input, shape index: {}]   ;;  %s935_s2 = inlined_call_operand.hbm [shape: bf16[256,128], index: 2, kind: input, shape index: {}]   ;;  %s936_s3 = inlined_call_operand.hbm [shape: bf16[128,256], index: 3, kind: input, shape index: {}]   ;;  %s937_s4 = inlined_call_operand.vmem [shape: f32[16,128], index: 4, kind: output, shape index: {}]  }
   0x1   :  { %s19_s17 = sshll.u32 %s935_s2, 4  ;;  %s20_s17 = int_to_ptr.hbm [resolvable:$true] %s19_s17 }
   0x2   :  { %10 = vsyncpa [#allocation5], 0  ;;  %s791_s18 = smov [#allocation2]   ;;  %s32_s22 = sshll.u32 %s936_s3, 4  ;;  %s33_s22 = int_to_ptr.hbm [resolvable:$true] %s32_s22 }
   0x3   :  { %s21_s19 = sshll.u32 %s791_s18, 4  ;;  %s792_s23 = smov 64   ;;  %s22_s19 = int_to_ptr.vmem [resolvable:$true] %s21_s19 }
   0x4   :  { %s793_s24 = smov 4   ;;  %s794_s25 = smov [#allocation4]  }
   0x5   :  { %27 = dma.hbm_to_vmem [thread:$0]  %s20_s17, 2048, %s22_s19, [#allocation3], %s792_s23, %s792_s23, %s793_s24  }
   0x6   :  { %s34_s26 = sshll.u32 %s794_s25, 4  ;;  %s795_s27 = smov 128   ;;  %s35_s26 = int_to_ptr.vmem [resolvable:$true] %s34_s26 }
   0x7   :  { %s796_s28 = smov 8  }
   0x8   :  { %40 = dma.hbm_to_vmem [thread:$0]  %s33_s22, 2048, %s35_s26, [#allocation5], %s795_s27, %s795_s27, %s796_s28  }
   0x9   :  { %787 = dma.done.wait [#allocation3], 2048  }
   0xa   :  { %788 = vsyncadd [#allocation3], 4294965248 }
   0xb   :  { %789 = dma.done.wait [#allocation5], 2048  }
   0xc   :  { %790 = vsyncadd [#allocation5], 4294965248  ;;  %v832_v0 = vld [vmem:[%s933_s0] sm:$0xff]  ;;  %v684_v2 = vld [vmem:[#allocation2 + $0x38] sm:$0xff]  ;;  %v797_v14 = vmov 128.0  }
   0xd   :  { %v52_v1 = vmul.f32 %v832_v0, %v832_v0  ;;  %v692_v3 = vld [vmem:[#allocation2 + $0x78] sm:$0xff]  ;;  %225 = vmatpush.bf16.xpose.msra.mxu0 %v684_v2  ;;  %v839_v4 = vld [vmem:[%s933_s0 + $0x8] sm:$0xff]  ;;  %v683_v6 = vld [vmem:[#allocation2 + $0x30] sm:$0xff]  ;;  %717 = vrcp.f32 %v797_v14 }
   0xe   :  { %239 = vmatpush.bf16.xpose.msra.mxu1 %v692_v3  ;;  %v53_v5 = vmul.f32 %v839_v4, %v839_v4  ;;  %v691_v7 = vld [vmem:[#allocation2 + $0x70] sm:$0xff]  ;;  %v682_v8 = vld [vmem:[#allocation2 + $0x28] sm:$0xff]  ;;  %v681_v10 = vld [vmem:[#allocation2 + $0x20] sm:$0xff] }
   0xf   :  { %54 = vadd.xlane.f32.xlu0 %v52_v1  ;;  %v690_v9 = vld [vmem:[#allocation2 + $0x68] sm:$0xff]  ;;  %v689_v11 = vld [vmem:[#allocation2 + $0x60] sm:$0xff]  ;;  %v680_v12 = vld [vmem:[#allocation2 + $0x18] sm:$0xff] }
  0x10   :  { %v688_v13 = vld [vmem:[#allocation2 + $0x58] sm:$0xff]  ;;  %v679_v15 = vld [vmem:[#allocation2 + $0x10] sm:$0xff]  ;;  %v678_v20 = vld [vmem:[#allocation2 + $0x8] sm:$0xff] }
  0x11   :  { %v687_v16 = vld [vmem:[#allocation2 + $0x50] sm:$0xff]  ;;  %v686_v21 = vld [vmem:[#allocation2 + $0x48] sm:$0xff]  ;;  %v677_v24 = vld [vmem:[#allocation2] sm:$0xff] }
  0x12   :  { %v685_v25 = vld [vmem:[#allocation2 + $0x40] sm:$0xff]  ;;  %v671_v53 = vld [vmem:[#allocation4 + $0x70] sm:$0xf]  ;;  %v708_v54 = vld [vmem:[#allocation4 + $0x74] sm:$0xf0] }
  0x13   :  { %v718_v17 = vpop.eup %717  ;;  %v716_v41 = vld [vmem:[%s934_s1] ss:$0 sm:$0xff]  ;;  %v707_v55 = vld [vmem:[#allocation4 + $0x74] sm:$0xf]  ;;  %v672_v56 = vor.u32 %v708_v54, %v671_v53  ;;  %v673_v57 = vld [vmem:[#allocation4 + $0x78] sm:$0xf0] }
  0x14   :  { %v59_v18 = vmul.f32 128.0, %v718_v17  ;;  %vm63_vm0 = vweird.f32 %v718_v17  ;;  %v70_v45 = vmul.f32 %v716_v41, %v832_v0  ;;  %v71_v46 = vmul.f32 %v716_v41, %v839_v4  ;;  %v663_v59 = vld [vmem:[#allocation4 + $0x60] sm:$0xf]  ;;  %v706_v60 = vld [vmem:[#allocation4 + $0x64] sm:$0xf0] }
  0x15   :  { %226 = vmatpush.bf16.xpose.msra.mxu0 %v683_v6  ;;  %v676_v58 = vor.u32 %v707_v55, %v673_v57  ;;  %511 = vmatpush.bf16.xpose.msra.mxu2 %v672_v56  ;;  %v705_v61 = vld [vmem:[#allocation4 + $0x64] sm:$0xf]  ;;  %v664_v62 = vor.u32 %v706_v60, %v663_v59  ;;  %v665_v63 = vld [vmem:[#allocation4 + $0x68] sm:$0xf0]  ;;  %v655_v2 = vld [vmem:[#allocation4 + $0x50] sm:$0xf] }
  0x16   :  { %240 = vmatpush.bf16.xpose.msra.mxu1 %v691_v7  ;;  %v60_v19 = vsub.f32 1.0, %v59_v18  ;;  %v668_v1 = vor.u32 %v705_v61, %v665_v63  ;;  %v704_v3 = vld [vmem:[#allocation4 + $0x54] sm:$0xf0]  ;;  %v657_v7 = vld [vmem:[#allocation4 + $0x58] sm:$0xf0] }
  0x17   :  { %56 = vadd.xlane.f32.xlu0 %v53_v5  ;;  %525 = vmatpush.bf16.xpose.msra.mxu3 %v676_v58  ;;  %v703_v5 = vld [vmem:[#allocation4 + $0x54] sm:$0xf]  ;;  %v656_v6 = vor.u32 %v704_v3, %v655_v2  ;;  %v623_v53 = vld [vmem:[#allocation4 + $0x10] sm:$0xf]  ;;  %v696_v57 = vld [vmem:[#allocation4 + $0x14] sm:$0xf0] }
  0x18   :  { %v61_v22 = vmul.f32 %v718_v17, %v60_v19  ;;  %v695_v60 = vld [vmem:[#allocation4 + $0x14] sm:$0xf]  ;;  %v625_v63 = vld [vmem:[#allocation4 + $0x18] sm:$0xf0] }
  0x1a   :  { %v62_v23 = vadd.f32 %v718_v17, %v61_v22  ;;  %v700_v22 = vld [vmem:[#allocation4 + $0x34] sm:$0xf0] }
  0x1c   :  { %v64_v26 = vsel %vm63_vm0, %v718_v17, %v62_v23  ;;  %v699_v23 = vld [vmem:[#allocation4 + $0x34] sm:$0xf] }
  0x1d   :  { %227 = vmatpush.bf16.xpose.msra.mxu0 %v682_v8  ;;  %512 = vmatpush.bf16.xpose.msra.mxu2 %v664_v62  ;;  %v660_v8 = vor.u32 %v703_v5, %v657_v7  ;;  %v624_v62 = vor.u32 %v696_v57, %v623_v53  ;;  %v628_v5 = vor.u32 %v695_v60, %v625_v63 }
  0x1e   :  { %241 = vmatpush.bf16.xpose.msra.mxu1 %v690_v9  ;;  %v647_v9 = vld [vmem:[#allocation4 + $0x40] sm:$0xf] }
  0x1f   :  { %526 = vmatpush.bf16.xpose.msra.mxu3 %v668_v1 }
  0x25   :  { %228 = vmatpush.bf16.xpose.msra.mxu0 %v681_v10  ;;  %513 = vmatpush.bf16.xpose.msra.mxu2 %v656_v6  ;;  %v702_v10 = vld [vmem:[#allocation4 + $0x44] sm:$0xf0] }
  0x26   :  { %242 = vmatpush.bf16.xpose.msra.mxu1 %v689_v11  ;;  %v701_v11 = vld [vmem:[#allocation4 + $0x44] sm:$0xf] }
  0x27   :  { %527 = vmatpush.bf16.xpose.msra.mxu3 %v660_v8 }
  0x2d   :  { %229 = vmatpush.bf16.xpose.msra.mxu0 %v680_v12  ;;  %v648_v12 = vor.u32 %v702_v10, %v647_v9 }
  0x2e   :  { %243 = vmatpush.bf16.xpose.msra.mxu1 %v688_v13  ;;  %v649_v13 = vld [vmem:[#allocation4 + $0x48] sm:$0xf0] }
  0x2f   :  { %v652_v14 = vor.u32 %v701_v11, %v649_v13  ;;  %514 = vmatpush.bf16.xpose.msra.mxu2 %v648_v12 }
  0x31   :  { %528 = vmatpush.bf16.xpose.msra.mxu3 %v652_v14 }
  0x35   :  { %230 = vmatpush.bf16.xpose.msra.mxu0 %v679_v15 }
  0x36   :  { %244 = vmatpush.bf16.xpose.msra.mxu1 %v687_v16 }
  0x3d   :  { %231 = vmatpush.bf16.xpose.msra.mxu0 %v678_v20 }
  0x3e   :  { %245 = vmatpush.bf16.xpose.msra.mxu1 %v686_v21  ;;  %v639_v21 = vld [vmem:[#allocation4 + $0x30] sm:$0xf] }
  0x45   :  { %232 = vmatpush.bf16.xpose.msra.mxu0 %v677_v24 }
  0x46   :  { %246 = vmatpush.bf16.xpose.msra.mxu1 %v685_v25 }
  0x82   :  { %v55_v27 = vpop.xlane.xlu0 %54 }
  0x83   :  { %v65_v28 = vmul.f32 %v64_v26, %v55_v27  ;;  %v640_v27 = vor.u32 %v700_v22, %v639_v21 }
  0x85   :  { %v72_v29 = vadd.f32 1e-06, %v65_v28  ;;  %515 = vmatpush.bf16.xpose.msra.mxu2 %v640_v27 }
  0x87   :  { %719 = vrsqrt.f32 %v72_v29  ;;  %vm80_vm2 = vweird.f32 %v72_v29 }
  0x8a   :  { %v57_v30 = vpop.xlane.xlu0 %56 }
  0x8b   :  { %v66_v31 = vmul.f32 %v64_v26, %v57_v30  ;;  %v641_v26 = vld [vmem:[#allocation4 + $0x38] sm:$0xf0] }
  0x8c   :  { %v644_v28 = vor.u32 %v699_v23, %v641_v26  ;;  %v694_v26 = vld [vmem:[#allocation4 + $0x4] sm:$0xf0] }
  0x8d   :  { %v720_v32 = vpop.eup %719  ;;  %v73_v33 = vadd.f32 1e-06, %v66_v31 }
  0x8e   :  { %v75_v34 = vmul.f32 %v720_v32, %v72_v29  ;;  %vm81_vm1 = vweird.f32 %v720_v32  ;;  %529 = vmatpush.bf16.xpose.msra.mxu3 %v644_v28 }
  0x8f   :  { %721 = vrsqrt.f32 %v73_v33  ;;  %vm82_vm4 = vmor %vm80_vm2, %vm81_vm1  ;;  %vm90_vm5 = vweird.f32 %v73_v33 }
  0x90   :  { %v76_v35 = vmul.f32 %v720_v32, %v75_v34 }
  0x92   :  { %v77_v36 = vmul.f32 0.5, %v76_v35  ;;  %v631_v35 = vld [vmem:[#allocation4 + $0x20] sm:$0xf] }
  0x94   :  { %v78_v38 = vsub.f32 1.5, %v77_v36 }
  0x95   :  { %v722_v37 = vpop.eup %721 }
  0x96   :  { %v85_v39 = vmul.f32 %v722_v37, %v73_v33  ;;  %v79_v43 = vmul.f32 %v720_v32, %v78_v38  ;;  %vm91_vm3 = vweird.f32 %v722_v37 }
  0x97   :  { %vm92_vm6 = vmor %vm90_vm5, %vm91_vm3 }
  0x98   :  { %v86_v40 = vmul.f32 %v722_v37, %v85_v39  ;;  %v83_v47 = vsel %vm82_vm4, %v720_v32, %v79_v43 }
  0x99   :  { %v94_v50 = vmul.f32 %v83_v47, %v70_v45 }
  0x9a   :  { %v87_v42 = vmul.f32 0.5, %v86_v40  ;;  %v697_v40 = vld [vmem:[#allocation4 + $0x24] sm:$0xf] }
  0x9c   :  { %v88_v44 = vsub.f32 1.5, %v87_v42  ;;  %v633_v42 = vld [vmem:[#allocation4 + $0x28] sm:$0xf0] }
  0x9d   :  { %v636_v45 = vor.u32 %v697_v40, %v633_v42 }
  0x9e   :  { %v89_v48 = vmul.f32 %v722_v37, %v88_v44 }
  0x9f   :  { %530 = vmatpush.bf16.xpose.msra.mxu3 %v636_v45 }
  0xa0   :  { %v93_v49 = vsel %vm92_vm6, %v722_v37, %v89_v48  ;;  %v698_v37 = vld [vmem:[#allocation4 + $0x24] sm:$0xf0] }
  0xa1   :  { %v95_v51 = vmul.f32 %v93_v49, %v71_v46  ;;  %v632_v39 = vor.u32 %v698_v37, %v631_v35  ;;  %v617_v35 = vld [vmem:[#allocation4 + $0x8] sm:$0xf0] }
  0xa3   :  { %v128_v52 = vpack.c.bf16 %v95_v51, %v94_v50  ;;  %516 = vmatpush.bf16.xpose.msra.mxu2 %v632_v39 }
  0xa5   :  { %233 = vmatmul.bf16.vlgmr.msra.gmra.mxu0 %v128_v52  ;;  %247 = vmatmul.bf16.vlgmr.msra.gmra.mxu1 %v128_v52 }
  0xa7   :  { %531 = vmatpush.bf16.xpose.msra.mxu3 %v628_v5 }
  0xab   :  { %517 = vmatpush.bf16.xpose.msra.mxu2 %v624_v62 }
 0x122   :  { %v848_v15 = vpop.f32.mrf.mxu0  ;;  %v850_v16 = vpop.f32.mrf.mxu1 }
 0x123   :  { %v853_v17 = vmul.f32 0.70710677, %v848_v15  ;;  %v856_v18 = vmul.f32 0.70710677, %v850_v16 }
 0x125   :  { %v261_v19 = vand.u32 2147483647, %v853_v17  ;;  %v262_v20 = vand.u32 2147483647, %v856_v18  ;;  %v369_v58 = vsub.f32 0.0, %v853_v17  ;;  %v370_v3 = vsub.f32 0.0, %v856_v18 }
 0x127   :  { %v265_v24 = vmul.f32 0.3275911, %v261_v19  ;;  %v266_v25 = vmul.f32 0.3275911, %v262_v20  ;;  %v373_v10 = vmul.f32 %v369_v58, %v853_v17  ;;  %v374_v28 = vmul.f32 %v370_v3, %v856_v18 }
 0x129   :  { %v269_v29 = vadd.f32 1.0, %v265_v24  ;;  %v860_v30 = vadd.f32 1.0, %v266_v25  ;;  %v615_v25 = vld [vmem:[#allocation4] sm:$0xf]  ;;  %v379_v60 = vmul.f32 1.442695, %v374_v28 }
 0x12a   :  { %v862_v31 = vpop.f32.mrf.mxu0  ;;  %v864_v32 = vpop.f32.mrf.mxu1 }
 0x12b   :  { %723 = vrcp.f32 %v269_v29  ;;  %v867_v33 = vmul.f32 0.70710677, %v862_v31  ;;  %v871_v34 = vmul.f32 0.70710677, %v864_v32  ;;  %v284_v52 = vand.u32 2147483648, %v269_v29 }
 0x12c   :  { %725 = vrcp.f32 %v860_v30  ;;  %v282_v54 = vand.u32 2147483647, %v269_v29  ;;  %vm278_vm8 = vweird.f32 %v269_v29  ;;  %v299_v59 = vand.u32 2147483648, %v860_v30 }
 0x12d   :  { %v263_v36 = vand.u32 2147483647, %v867_v33  ;;  %v264_v38 = vand.u32 2147483647, %v871_v34  ;;  %v297_v2 = vand.u32 2147483647, %v860_v30  ;;  %vm293_vm11 = vweird.f32 %v860_v30 }
 0x12e   :  { %v285_v6 = vor.u32 1.1754944e-38, %v284_v52  ;;  %vm283_vm12 = vcmp.eq.f32.partialorder %v282_v54, 8.507059e+37  ;;  %v300_v13 = vor.u32 1.1754944e-38, %v299_v59  ;;  %v372_v62 = vsub.f32 0.0, %v871_v34 }
 0x12f   :  { %v267_v41 = vmul.f32 0.3275911, %v263_v36  ;;  %v268_v44 = vmul.f32 0.3275911, %v264_v38  ;;  %vm298_vm14 = vcmp.eq.f32.partialorder %v297_v2, 8.507059e+37 }
 0x131   :  { %v724_v43 = vpop.eup %723  ;;  %v875_v47 = vadd.f32 1.0, %v267_v41  ;;  %v877_v49 = vadd.f32 1.0, %v268_v44 }
 0x132   :  { %v274_v46 = vmul.f32 %v724_v43, %v269_v29  ;;  %v726_v48 = vpop.eup %725  ;;  %vm279_vm7 = vweird.f32 %v724_v43  ;;  %v616_v29 = vor.u32 %v694_v26, %v615_v25 }
 0x133   :  { %v289_v51 = vmul.f32 %v726_v48, %v860_v30  ;;  %727 = vrcp.f32 %v875_v47  ;;  %vm280_vm9 = vmor %vm278_vm8, %vm279_vm7  ;;  %vm294_vm10 = vweird.f32 %v726_v48  ;;  %v312_v19 = vand.u32 2147483647, %v875_v47  ;;  %v693_v30 = vld [vmem:[#allocation4 + $0x4] sm:$0xf] }
 0x134   :  { %v275_v50 = vsub.f32 1.0, %v274_v46  ;;  %729 = vrcp.f32 %v877_v49  ;;  %vm295_vm13 = vmor %vm293_vm11, %vm294_vm10  ;;  %v314_v23 = vand.u32 2147483648, %v875_v47  ;;  %v620_v39 = vor.u32 %v693_v30, %v617_v35  ;;  %518 = vmatpush.bf16.xpose.msra.mxu2 %v616_v29 }
 0x135   :  { %v290_v56 = vsub.f32 1.0, %v289_v51  ;;  %vm308_vm0 = vweird.f32 %v875_v47  ;;  %v327_v41 = vand.u32 2147483647, %v877_v49  ;;  %v329_v42 = vand.u32 2147483648, %v877_v49 }
 0x136   :  { %v276_v55 = vmul.f32 %v724_v43, %v275_v50  ;;  %v315_v50 = vor.u32 1.1754944e-38, %v314_v23  ;;  %vm323_vm3 = vweird.f32 %v877_v49  ;;  %vm313_vm4 = vcmp.eq.f32.partialorder %v312_v19, 8.507059e+37  ;;  %532 = vmatpush.bf16.xpose.msra.mxu3 %v620_v39 }
 0x137   :  { %v291_v61 = vmul.f32 %v726_v48, %v290_v56  ;;  %v330_v56 = vor.u32 1.1754944e-38, %v329_v42  ;;  %vm328_vm6 = vcmp.eq.f32.partialorder %v327_v41, 8.507059e+37  ;;  %vm393_vm7 = vcmp.ge.f32.partialorder %v853_v17, 0.0 }
 0x138   :  { %v277_v1 = vadd.f32 %v724_v43, %v276_v55  ;;  %v371_v55 = vsub.f32 0.0, %v867_v33  ;;  %vm394_vm8 = vcmp.ge.f32.partialorder %v856_v18, 0.0  ;;  %vm396_vm10 = vcmp.ge.f32.partialorder %v871_v34, 0.0 }
 0x139   :  { %v728_v7 = vpop.eup %727  ;;  %v292_v9 = vadd.f32 %v726_v48, %v291_v61 }
 0x13a   :  { %v281_v8 = vsel %vm280_vm9, %v724_v43, %v277_v1  ;;  %v304_v11 = vmul.f32 %v728_v7, %v875_v47  ;;  %v730_v14 = vpop.eup %729  ;;  %vm309_vm15 = vweird.f32 %v728_v7  ;;  %v375_v5 = vmul.f32 %v371_v55, %v867_v33 }
 0x13b   :  { %v889_v12 = vsel %vm283_vm12, %v285_v6, %v281_v8  ;;  %v296_v21 = vsel %vm295_vm13, %v726_v48, %v292_v9  ;;  %v319_v24 = vmul.f32 %v730_v14, %v877_v49  ;;  %vm324_vm1 = vweird.f32 %v730_v14  ;;  %vm310_vm2 = vmor %vm308_vm0, %vm309_vm15 }
 0x13c   :  { %v333_v20 = vmul.f32 1.0614054, %v889_v12  ;;  %v305_v22 = vsub.f32 1.0, %v304_v11  ;;  %v895_v27 = vsel %vm298_vm14, %v300_v13, %v296_v21  ;;  %v377_v48 = vmul.f32 1.442695, %v373_v10  ;;  %vm325_vm5 = vmor %vm323_vm3, %vm324_vm1 }
 0x13d   :  { %v320_v38 = vsub.f32 1.0, %v319_v24  ;;  %v334_v40 = vmul.f32 1.0614054, %v895_v27  ;;  %v376_v10 = vmul.f32 %v372_v62, %v871_v34  ;;  %vm395_vm9 = vcmp.ge.f32.partialorder %v867_v33, 0.0 }
 0x13e   :  { %v337_v36 = vadd.f32 -1.4531521, %v333_v20  ;;  %v306_v37 = vmul.f32 %v728_v7, %v305_v22  ;;  %731 = vpow2.f32 %v377_v48  ;;  %v381_v20 = vmul.f32 1.442695, %v375_v5 }
 0x13f   :  { %v321_v45 = vmul.f32 %v730_v14, %v320_v38  ;;  %v338_v46 = vadd.f32 -1.4531521, %v334_v40  ;;  %733 = vpow2.f32 %v379_v60  ;;  %v383_v26 = vmul.f32 1.442695, %v376_v10 }
 0x140   :  { %v341_v43 = vmul.f32 %v337_v36, %v889_v12  ;;  %v307_v44 = vadd.f32 %v728_v7, %v306_v37  ;;  %735 = vpow2.f32 %v381_v20  ;;  %v255_v60 = vmul.f32 0.5, %v862_v31 }
 0x141   :  { %v322_v47 = vadd.f32 %v730_v14, %v321_v45  ;;  %v342_v53 = vmul.f32 %v338_v46, %v895_v27  ;;  %737 = vpow2.f32 %v383_v26  ;;  %v254_v62 = vmul.f32 0.5, %v850_v16 }
 0x142   :  { %v345_v51 = vadd.f32 1.4214138, %v341_v43  ;;  %v311_v52 = vsel %vm310_vm2, %v728_v7, %v307_v44 }
 0x143   :  { %v316_v54 = vsel %vm313_vm4, %v315_v50, %v311_v52  ;;  %v326_v59 = vsel %vm325_vm5, %v730_v14, %v322_v47  ;;  %v346_v49 = vadd.f32 1.4214138, %v342_v53 }
 0x144   :  { %v349_v57 = vmul.f32 %v345_v51, %v889_v12  ;;  %v335_v58 = vmul.f32 1.0614054, %v316_v54  ;;  %v331_v61 = vsel %vm328_vm6, %v330_v56, %v326_v59  ;;  %v732_v22 = vpop.eup %731 }
 0x145   :  { %v336_v2 = vmul.f32 1.0614054, %v331_v61  ;;  %v350_v3 = vmul.f32 %v346_v49, %v895_v27  ;;  %v734_v36 = vpop.eup %733 }
 0x146   :  { %v353_v63 = vadd.f32 -0.28449672, %v349_v57  ;;  %v339_v1 = vadd.f32 -1.4531521, %v335_v58  ;;  %v736_v46 = vpop.eup %735  ;;  %v253_v58 = vmul.f32 0.5, %v848_v15 }
 0x147   :  { %v340_v8 = vadd.f32 -1.4531521, %v336_v2  ;;  %v354_v9 = vadd.f32 -0.28449672, %v350_v3  ;;  %v738_v52 = vpop.eup %737 }
 0x148   :  { %v357_v6 = vmul.f32 %v353_v63, %v889_v12  ;;  %v343_v7 = vmul.f32 %v339_v1, %v316_v54  ;;  %v256_v1 = vmul.f32 0.5, %v864_v32 }
 0x149   :  { %v344_v14 = vmul.f32 %v340_v8, %v331_v61  ;;  %v358_v19 = vmul.f32 %v354_v9, %v895_v27 }
 0x14a   :  { %v361_v11 = vadd.f32 0.2548296, %v357_v6  ;;  %v347_v13 = vadd.f32 1.4214138, %v343_v7 }
 0x14b   :  { %v348_v24 = vadd.f32 1.4214138, %v344_v14  ;;  %v362_v25 = vadd.f32 0.2548296, %v358_v19 }
 0x14c   :  { %v365_v21 = vmul.f32 %v361_v11, %v889_v12  ;;  %v351_v23 = vmul.f32 %v347_v13, %v316_v54 }
 0x14d   :  { %v352_v30 = vmul.f32 %v348_v24, %v331_v61  ;;  %v366_v35 = vmul.f32 %v362_v25, %v895_v27 }
 0x14e   :  { %v385_v28 = vmul.f32 %v732_v22, %v365_v21  ;;  %v355_v29 = vadd.f32 -0.28449672, %v351_v23 }
 0x14f   :  { %v356_v38 = vadd.f32 -0.28449672, %v352_v30  ;;  %v386_v40 = vmul.f32 %v734_v36, %v366_v35 }
 0x150   :  { %v359_v37 = vmul.f32 %v355_v29, %v316_v54  ;;  %v389_v39 = vsub.f32 1.0, %v385_v28 }
 0x151   :  { %v360_v42 = vmul.f32 %v356_v38, %v331_v61  ;;  %v390_v12 = vsub.f32 1.0, %v386_v40 }
 0x152   :  { %v363_v41 = vadd.f32 0.2548296, %v359_v37  ;;  %v397_v45 = vsub.f32 0.0, %v389_v39 }
 0x153   :  { %v364_v44 = vadd.f32 0.2548296, %v360_v42  ;;  %v398_v51 = vsub.f32 0.0, %v390_v12 }
 0x154   :  { %v367_v43 = vmul.f32 %v363_v41, %v316_v54  ;;  %v401_v53 = vsel %vm393_vm7, %v389_v39, %v397_v45 }
 0x155   :  { %v368_v50 = vmul.f32 %v364_v44, %v331_v61  ;;  %v402_v57 = vsel %vm394_vm8, %v390_v12, %v398_v51  ;;  %v405_v54 = vadd.f32 1.0, %v401_v53 }
 0x156   :  { %v387_v48 = vmul.f32 %v736_v46, %v367_v43  ;;  %v406_v17 = vadd.f32 1.0, %v402_v57 }
 0x157   :  { %v388_v47 = vmul.f32 %v738_v52, %v368_v50  ;;  %v409_v3 = vmul.f32 %v405_v54, %v253_v58 }
 0x158   :  { %v391_v27 = vsub.f32 1.0, %v387_v48  ;;  %v410_v6 = vmul.f32 %v406_v17, %v254_v62 }
 0x159   :  { %v392_v56 = vsub.f32 1.0, %v388_v47 }
 0x15a   :  { %v399_v55 = vsub.f32 0.0, %v391_v27 }
 0x15b   :  { %v400_v49 = vsub.f32 0.0, %v392_v56 }
 0x15c   :  { %v403_v59 = vsel %vm395_vm9, %v391_v27, %v399_v55 }
 0x15d   :  { %v407_v61 = vadd.f32 1.0, %v403_v59  ;;  %v404_v63 = vsel %vm396_vm10, %v392_v56, %v400_v49 }
 0x15e   :  { %v408_v2 = vadd.f32 1.0, %v404_v63 }
 0x15f   :  { %v411_v18 = vmul.f32 %v407_v61, %v255_v60 }
 0x160   :  { %v412_v33 = vmul.f32 %v408_v2, %v256_v1 }
 0x161   :  { %v429_v5 = vpack.c.bf16 %v411_v18, %v409_v3 }
 0x162   :  { %v430_v15 = vpack.c.bf16 %v412_v33, %v410_v6 }
 0x163   :  { %519 = vmatmul.bf16.vlgmr.msra.gmra.mxu2 %v429_v5 }
 0x164   :  { %533 = vmatmul.bf16.vlgmr.msra.gmra.mxu3 %v430_v15 }
 0x1e6   :  { %v520_v7 = vpop.f32.mrf.mxu2 }
 0x1e7   :  { %v534_v31 = vpop.f32.mrf.mxu3 }
 0x1e8   :  { %v535_v8 = vadd.f32 %v534_v31, %v520_v7 }
 0x1ea   :  { %v539_v34 = vadd.f32 %v535_v8, %v832_v0 }
 0x1ec   :  { %541 = vst [vmem:[%s937_s4] sm:$0xff] %v539_v34 }
 0x1ee   :  { %v522_v16 = vpop.f32.mrf.mxu2 }
 0x1ef   :  { %v536_v9 = vpop.f32.mrf.mxu3 }
 0x1f0   :  { %v537_v32 = vadd.f32 %v536_v9, %v522_v16 }
 0x1f2   :  { %v540_v10 = vadd.f32 %v537_v32, %v839_v4 }
 0x1f4   :  { %542 = vst [vmem:[%s937_s4 + $0x8] sm:$0xff] %v540_v10 }
 0x1f5   :  { %547 = vsyncpa [#allocation3], 1 }
 0x1f6   :  { %548 = vsyncpa [#allocation5], 1 }

// kernel: _lambda_.8
= control target key start
LH: loop header
LB: loop body
LE: loop exit
PB: predicated region body
PF: predicated region fallthrough
CT: control target
= control target key end

     0   :  { %14 = vsyncpa [#allocation3], 0  ;;  %s2658_s0 = inlined_call_operand.vmem [shape: f32[2,8,128], index: 0, kind: input, shape index: {}]   ;;  %s2659_s1 = inlined_call_operand.vmem [shape: f32[1,128], index: 1, kind: input, shape index: {}]   ;;  %s2660_s2 = inlined_call_operand.hbm [shape: bf16[2,64,128], index: 2, kind: input, shape index: {}]   ;;  %s2661_s3 = inlined_call_operand.hbm [shape: bf16[2,64,128], index: 3, kind: input, shape index: {}]   ;;  %s2662_s4 = inlined_call_operand.hbm [shape: bf16[2,64,128], index: 4, kind: input, shape index: {}]   ;;  %s2663_s5 = inlined_call_operand.hbm [shape: bf16[128,8], index: 5, kind: input, shape index: {}]   ;;  %s2664_s6 = inlined_call_operand.hbm [shape: bf16[128,8], index: 6, kind: input, shape index: {}]   ;;  %s2665_s7 = inlined_call_operand.vmem [shape: bf16[128,128], index: 7, kind: input, shape index: {}]   ;;  %s2666_s8 = inlined_call_operand.vmem [shape: f32[2,1,128], index: 8, kind: input, shape index: {}]   ;;  %s2667_s9 = inlined_call_operand.vmem [shape: f32[2,8,128], index: 9, kind: output, shape index: {}]  }
   0x1   :  { %15 = vsyncpa [#allocation5], 0 }
   0x2   :  { %16 = vsyncpa [#allocation8], 0  ;;  %s2308_s30 = smov 0  }
   0x3 LB: > { %s2314_s10 = sadd.s32 4294967295, %s2246_s30   ;;  %p1709_p0 = scmp.ge.s32.totalorder %s2246_s30, 1  ;;  %s2246_s30 = sphi %s2308_s30, %s22_s30  }
   0x4   : > { %p252_p1 = scmp.lt.s32.totalorder %s2246_s30, 3  ;;  %p2036_p2 = scmp.eq.s32.totalorder %s2314_s10, 0 }
   0x5   : > { %s280_s13 = sshll.u32 %s2661_s3, 4  ;;  %s308_s17 = sshll.u32 %s2663_s5, 4  ;;  %s281_s13 = int_to_ptr.hbm [resolvable:$true] %s280_s13  ;;  %s309_s17 = int_to_ptr.hbm [resolvable:$true] %s308_s17 }
   0x6   : > { %p2322_p3 = pnand %p1709_p0, %p252_p1  ;;  %s2248_s18 = smov [#allocation4]  }
   0x7   : > { %s282_s19 = sshll.u32 %s2248_s18, 4  ;;  %s2249_s21 = smov [#allocation7]   ;;  %s283_s19 = int_to_ptr.vmem [resolvable:$true] %s282_s19 }
   0x8   : > { %p2020_p4 = pneg %p2322_p3  ;;  %s310_s22 = sshll.u32 %s2249_s21, 4  ;;  %s311_s22 = int_to_ptr.vmem [resolvable:$true] %s310_s22 }
   0x9   : > { %s266_s25 = sshll.u32 %s2660_s2, 4  ;;  %s2250_s26 = smov 64   ;;  %s267_s25 = int_to_ptr.hbm [resolvable:$true] %s266_s25 }
   0xa   : > { %p2333_p5 = pnand %p2036_p2, %p2020_p4  ;;  %s2251_s27 = smov 4  }
   0xb   : > { %s2252_s28 = smov [#allocation2]   ;;  %s294_s15 = sshll.u32 %s2662_s4, 4  ;;  %s295_s15 = int_to_ptr.hbm [resolvable:$true] %s294_s15 }
   0xc   : > { %2026 = dma.hbm_to_vmem [thread:$0]  (!%p2333_p5), %s281_s13, 1024, %s283_s19, [#allocation5], %s2250_s26, %s2250_s26, %s2251_s27  }
   0xd   : > { %2032 = dma.hbm_to_vmem [thread:$0]  (!%p2333_p5), %s309_s17, 1024, %s311_s22, [#allocation8], %s2250_s26, %s2250_s26, %s2251_s27  }
   0xe   : > { %s268_s29 = sshll.u32 %s2252_s28, 4  ;;  %s322_s21 = sshll.u32 %s2664_s6, 4  ;;  %s269_s29 = int_to_ptr.vmem [resolvable:$true] %s268_s29  ;;  %s323_s21 = int_to_ptr.hbm [resolvable:$true] %s322_s21 }
   0xf   : > { %2023 = dma.hbm_to_vmem [thread:$0]  (!%p2333_p5), %s267_s25, 1024, %s269_s29, [#allocation3], %s2250_s26, %s2250_s26, %s2251_s27  }
  0x10   : > { %s2253_s23 = smov [#allocation6]   ;;  %s2254_s17 = smov [#allocation9]  }
  0x11   : > { %s296_s13 = sshll.u32 %s2253_s23, 4  ;;  %s324_s19 = sshll.u32 %s2254_s17, 4  ;;  %s297_s13 = int_to_ptr.vmem [resolvable:$true] %s296_s13  ;;  %s325_s19 = int_to_ptr.vmem [resolvable:$true] %s324_s19 }
  0x12   : > { %2029 = dma.hbm_to_vmem [thread:$0]  (!%p2333_p5), %s295_s15, 1024, %s297_s13, [#allocation5], %s2250_s26, %s2250_s26, %s2251_s27  }
  0x13   : > { %2035 = dma.hbm_to_vmem [thread:$0]  (!%p2333_p5), %s323_s21, 1024, %s325_s19, [#allocation8], %s2250_s26, %s2250_s26, %s2251_s27  }
  0x14   : > { %356 = sbr.rel (%p2322_p3) target bundleno = 1414 (0x586), region = 56 }
  0x19   : > { %2233 = dma.done.wait (%p2036_p2), [#allocation3], 1024  }
  0x1a   : > { %2235 = vsyncadd (%p2036_p2), [#allocation3], 4294966272 }
  0x1b   : > { %2237 = dma.done.wait (%p2036_p2), [#allocation5], 2048  }
  0x1c   : > { %2239 = vsyncadd (%p2036_p2), [#allocation5], 4294965248 }
  0x1d   : > { %2241 = dma.done.wait (%p2036_p2), [#allocation8], 2048  }
  0x1e   : > { %2243 = vsyncadd (%p2036_p2), [#allocation8], 4294965248  ;;  %p414_p6 = scmp.lt.s32.totalorder %s2314_s10, 1  ;;  %v1955_v2 = vld [vmem:[#allocation2 + $0x18] sm:$0xff]  ;;  %v1954_v5 = vld [vmem:[#allocation2 + $0x10] sm:$0xff]  ;;  %v2255_v11 = vmov 128.0  }
  0x1f   : > { %v1959_v3 = vld [vmem:[#allocation2 + $0x38] sm:$0xff]  ;;  %500 = vmatpush.bf16.xpose.msra.mxu0 %v1955_v2  ;;  %v1958_v6 = vld [vmem:[#allocation2 + $0x30] sm:$0xff]  ;;  %v1953_v8 = vld [vmem:[#allocation2 + $0x8] sm:$0xff]  ;;  %2065 = vrcp.f32 %v2255_v11  ;;  %vm825_vm4 = vcmask 1043456   ;;  %vm800_vm5 = vcmask 64512   ;;  %vm1187_vm6 = vcmask 523264  }
  0x20   : > { %s2673_s10 = smov (!%p414_p6, %s2314_s10), 1  ;;  %v1963_v4 = vld [vmem:[#allocation4 + $0x18] sm:$0xff]  ;;  %537 = vmatpush.bf16.xpose.msra.mxu1 %v1959_v3  ;;  %v1962_v7 = vld [vmem:[#allocation4 + $0x10] sm:$0xff]  ;;  %v1957_v9 = vld [vmem:[#allocation2 + $0x28] sm:$0xff]  ;;  %s2257_s17 = smov 64  }
  0x21   : > { %s1722_s14 = sshll.u32 %s2673_s10, 3  ;;  %590 = vmatpush.bf16.xpose.msra.mxu3 %v1963_v4  ;;  %v1961_v10 = vld [vmem:[#allocation4 + $0x8] sm:$0xff]  ;;  %v1952_v12 = vld [vmem:[#allocation2] sm:$0xff]  ;;  %v1967_v15 = vld [vmem:[#allocation4 + $0x38] sm:$0xff]  ;;  %s420_s29 = scalar_lea.vmem %s2666_s8, %s2673_s10 }
  0x22   : > { %s2380_s24 = scalar_lea.vmem %s2658_s0, %s1722_s14  ;;  %v1956_v13 = vld [vmem:[#allocation2 + $0x20] sm:$0xff]  ;;  %v1971_v16 = vld [vmem:[#allocation6 + $0x18] sm:$0xff]  ;;  %v1966_v21 = vld [vmem:[#allocation4 + $0x30] sm:$0xff]  ;;  %s424_s15 = scalar_lea.vmem %s2667_s9, %s1722_s14 }
  0x23   : > { %v2383_v0 = vld [vmem:[%s2380_s24] sm:$0xff]  ;;  %v1975_v17 = vld [vmem:[#allocation6 + $0x38] sm:$0xff]  ;;  %v1970_v22 = vld [vmem:[#allocation6 + $0x10] sm:$0xff] }
  0x24   : > { %v428_v1 = vmul.f32 %v2383_v0, %v2383_v0  ;;  %v1960_v14 = vld [vmem:[#allocation4] sm:$0xff]  ;;  %v1974_v23 = vld [vmem:[#allocation6 + $0x30] sm:$0xff]  ;;  %v1965_v26 = vld [vmem:[#allocation4 + $0x28] sm:$0xff] }
  0x25   : > { %v2066_v18 = vpop.eup %2065  ;;  %v1969_v27 = vld [vmem:[#allocation6 + $0x8] sm:$0xff]  ;;  %v1964_v32 = vld [vmem:[#allocation4 + $0x20] sm:$0xff] }
  0x26   : > { %429 = vadd.xlane.f32.xlu0 %v428_v1  ;;  %v432_v19 = vmul.f32 128.0, %v2066_v18  ;;  %vm436_vm0 = vweird.f32 %v2066_v18  ;;  %v1973_v28 = vld [vmem:[#allocation6 + $0x28] sm:$0xff]  ;;  %v1968_v33 = vld [vmem:[#allocation6] sm:$0xff] }
  0x27   : > { %501 = vmatpush.bf16.xpose.msra.mxu0 %v1954_v5  ;;  %v1972_v34 = vld [vmem:[#allocation6 + $0x20] sm:$0xff]  ;;  %v1977_v3 = vld [vmem:[#allocation7 + $0x8] sm:$0xff]  ;;  %v1978_v5 = vld [vmem:[#allocation7 + $0x10] sm:$0xff] }
  0x28   : > { %538 = vmatpush.bf16.xpose.msra.mxu1 %v1958_v6  ;;  %v433_v20 = vsub.f32 1.0, %v432_v19  ;;  %v2064_v39 = vld [vmem:[%s2659_s1] ss:$0 sm:$0xff]  ;;  %v1979_v6 = vld [vmem:[#allocation7 + $0x18] sm:$0xff] }
  0x29   : > { %591 = vmatpush.bf16.xpose.msra.mxu3 %v1962_v7  ;;  %v442_v42 = vmul.f32 %v2064_v39, %v2383_v0  ;;  %v1976_v54 = vld [vmem:[#allocation7] sm:$0xff] }
  0x2a   : > { %v434_v24 = vmul.f32 %v2066_v18, %v433_v20  ;;  %v1980_v7 = vld [vmem:[#allocation7 + $0x20] sm:$0xff] }
  0x2c   : > { %v435_v25 = vadd.f32 %v2066_v18, %v434_v24 }
  0x2e   : > { %v437_v29 = vsel %vm436_vm0, %v2066_v18, %v435_v25 }
  0x2f   : > { %502 = vmatpush.bf16.xpose.msra.mxu0 %v1953_v8  ;;  %v1981_v8 = vld [vmem:[#allocation7 + $0x28] sm:$0xff] }
  0x30   : > { %539 = vmatpush.bf16.xpose.msra.mxu1 %v1957_v9  ;;  %v1982_v9 = vld [vmem:[#allocation7 + $0x30] sm:$0xff] }
  0x31   : > { %592 = vmatpush.bf16.xpose.msra.mxu3 %v1961_v10  ;;  %v1983_v10 = vld [vmem:[#allocation7 + $0x38] sm:$0xff] }
  0x37   : > { %503 = vmatpush.bf16.xpose.msra.mxu0 %v1952_v12 }
  0x38   : > { %540 = vmatpush.bf16.xpose.msra.mxu1 %v1956_v13 }
  0x39   : > { %593 = vmatpush.bf16.xpose.msra.mxu3 %v1960_v14 }
  0x3f   : > { %680 = vmatpush.bf16.xpose.msrb.mxu0 %v1971_v16 }
  0x40   : > { %717 = vmatpush.bf16.xpose.msrb.mxu1 %v1975_v17 }
  0x41   : > { %627 = vmatpush.bf16.xpose.msrb.mxu3 %v1967_v15 }
  0x47   : > { %681 = vmatpush.bf16.xpose.msrb.mxu0 %v1970_v22 }
  0x48   : > { %718 = vmatpush.bf16.xpose.msrb.mxu1 %v1974_v23 }
  0x49   : > { %628 = vmatpush.bf16.xpose.msrb.mxu3 %v1966_v21 }
  0x4f   : > { %682 = vmatpush.bf16.xpose.msrb.mxu0 %v1969_v27 }
  0x50   : > { %719 = vmatpush.bf16.xpose.msrb.mxu1 %v1973_v28 }
  0x51   : > { %629 = vmatpush.bf16.xpose.msrb.mxu3 %v1965_v26 }
  0x57   : > { %683 = vmatpush.bf16.xpose.msrb.mxu0 %v1968_v33 }
  0x58   : > { %720 = vmatpush.bf16.xpose.msrb.mxu1 %v1972_v34 }
  0x59   : > { %630 = vmatpush.bf16.xpose.msrb.mxu3 %v1964_v32 }
  0x99   : > { %v430_v30 = vpop.xlane.xlu0 %429 }
  0x9a   : > { %v438_v31 = vmul.f32 %v437_v29, %v430_v30 }
  0x9c   : > { %v443_v35 = vadd.f32 1e-06, %v438_v31 }
  0x9e   : > { %2067 = vrsqrt.f32 %v443_v35  ;;  %vm450_vm2 = vweird.f32 %v443_v35 }
  0xa4   : > { %v2068_v36 = vpop.eup %2067 }
  0xa5   : > { %v445_v37 = vmul.f32 %v2068_v36, %v443_v35  ;;  %vm451_vm1 = vweird.f32 %v2068_v36 }
  0xa6   : > { %vm452_vm3 = vmor %vm450_vm2, %vm451_vm1 }
  0xa7   : > { %v446_v38 = vmul.f32 %v2068_v36, %v445_v37 }
  0xa9   : > { %v447_v40 = vmul.f32 0.5, %v446_v38 }
  0xab   : > { %v448_v41 = vsub.f32 1.5, %v447_v40 }
  0xad   : > { %v449_v43 = vmul.f32 %v2068_v36, %v448_v41 }
  0xaf   : > { %v453_v44 = vsel %vm452_vm3, %v2068_v36, %v449_v43 }
  0xb0   : > { %v454_v45 = vmul.f32 %v453_v44, %v442_v42 }
  0xb2   : > { %v455_v46 = vpack.c.bf16 %v454_v45, %v454_v45 }
  0xb4   : > { %504 = vmatmul.bf16.vlgmr.msra.gmra.mxu0 %v455_v46  ;;  %541 = vmatmul.bf16.vlgmr.msra.gmra.mxu1 %v455_v46 }
  0xb5   : > { %594 = vmatmul.bf16.vlgmr.msra.gmra.mxu3 %v455_v46 }
  0xc4   : > { %684 = vmatmul.bf16.vlgmr.msrb.gmra.mxu0 %v455_v46  ;;  %721 = vmatmul.bf16.vlgmr.msrb.gmra.mxu1 %v455_v46 }
  0xc5   : > { %631 = vmatmul.bf16.vlgmr.msrb.gmra.mxu3 %v455_v46 }
 0x131   : > { %v2391_v47 = vpop.f32.mrf.mxu0  ;;  %v2393_v48 = vpop.f32.mrf.mxu1 }
 0x138   : > { %v595_v49 = vpop.f32.mrf.mxu3 }
 0x139   : > { %v758_v50 = vpack.c.bf16 %v595_v49, %v595_v49  ;;  %v507_v51 = vpop.f32.mrf.mxu0  ;;  %v544_v52 = vpop.f32.mrf.mxu1 }
 0x13b   : > { %v827_v53 = vsel %vm825_vm4, %v758_v50, 0 }
 0x13c   : > { %836 = vmatpush.bf16.msra.mxu2 %v827_v53 }
 0x13f   : > { %1852 = vmatmul.msk.bf16.vlgmr.msra.gmra.mxu2 %vm800_vm5, %v1976_v54 }
 0x140   : > { %v597_v55 = vpop.f32.mrf.mxu3 }
 0x141   : > { %v685_v56 = vpop.f32.mrf.mxu0  ;;  %v722_v57 = vpop.f32.mrf.mxu1 }
 0x142   : > { %v930_v58 = vpack.c.bf16 %v685_v56, %v685_v56  ;;  %v931_v59 = vpack.c.bf16 %v722_v57, %v722_v57 }
 0x144   : > { %v997_v60 = vsel %vm825_vm4, %v930_v58, 0  ;;  %v1049_v61 = vsel %vm825_vm4, %v931_v59, 0 }
 0x145   : > { %1006 = vmatpush.bf16.msra.mxu0 %v997_v60  ;;  %1058 = vmatpush.bf16.msra.mxu1 %v1049_v61 }
 0x148   : > { %v632_v62 = vpop.f32.mrf.mxu3 }
 0x149   : > { %v759_v63 = vpack.c.bf16 %v632_v62, %v632_v62  ;;  %v687_v0 = vpop.f32.mrf.mxu0  ;;  %v724_v1 = vpop.f32.mrf.mxu1 }
 0x14b   : > { %v879_v2 = vsel %vm825_vm4, %v759_v63, 0 }
 0x14c   : > { %888 = vmatpush.bf16.msra.mxu3 %v879_v2 }
 0x14f   : > { %1853 = vmatmul.msk.bf16.gmra.mxu2 %vm800_vm5, %v1977_v3  ;;  %1860 = vmatmul.msk.bf16.vlgmr.msra.gmra.mxu3 %vm800_vm5, %v1976_v54 }
 0x150   : > { %v634_v4 = vpop.f32.mrf.mxu3 }
 0x15f   : > { %1854 = vmatmul.msk.bf16.gmra.mxu2 %vm800_vm5, %v1978_v5  ;;  %1861 = vmatmul.msk.bf16.gmra.mxu3 %vm800_vm5, %v1977_v3 }
 0x16f   : > { %1855 = vmatmul.msk.bf16.gmra.mxu2 %vm800_vm5, %v1979_v6  ;;  %1862 = vmatmul.msk.bf16.gmra.mxu3 %vm800_vm5, %v1978_v5 }
 0x17f   : > { %1856 = vmatmul.msk.bf16.gmra.mxu2 %vm800_vm5, %v1980_v7  ;;  %1863 = vmatmul.msk.bf16.gmra.mxu3 %vm800_vm5, %v1979_v6 }
 0x18f   : > { %1857 = vmatmul.msk.bf16.gmra.mxu2 %vm800_vm5, %v1981_v8  ;;  %1864 = vmatmul.msk.bf16.gmra.mxu3 %vm800_vm5, %v1980_v7 }
 0x19f   : > { %1858 = vmatmul.msk.bf16.gmra.mxu2 %vm800_vm5, %v1982_v9  ;;  %1865 = vmatmul.msk.bf16.gmra.mxu3 %vm800_vm5, %v1981_v8 }
 0x1af   : > { %1859 = vmatmul.msk.bf16.gmra.mxu2 %vm800_vm5, %v1983_v10  ;;  %1866 = vmatmul.msk.bf16.gmra.mxu3 %vm800_vm5, %v1982_v9 }
 0x1bf   : > { %1867 = vmatmul.msk.bf16.gmra.mxu3 %vm800_vm5, %v1983_v10 }
 0x1c2   : > { %v838_v11 = vpop.f32.mrf.mxu2 }
 0x1c3   : > { %v1115_v43 = vpack.c.bf16 %v838_v11, %v838_v11 }
 0x1c5   : > { %v2437_v52 = vunpack.c.l.b16 %v1115_v43 }
 0x1ca   : > { %v840_v12 = vpop.f32.mrf.mxu2 }
 0x1cb   : > { %v1116_v44 = vpack.c.bf16 %v840_v12, %v840_v12 }
 0x1cd   : > { %v2439_v53 = vunpack.c.l.b16 %v1116_v44 }
 0x1cf   : > { %v1179_v57 = vpack.c.b16 %v2439_v53, %v2437_v52 }
 0x1d2   : > { %v843_v13 = vpop.f32.mrf.mxu2  ;;  %v890_v14 = vpop.f32.mrf.mxu3 }
 0x1d3   : > { %v1131_v15 = vpack.c.bf16 %v890_v14, %v890_v14  ;;  %v1117_v59 = vpack.c.bf16 %v843_v13, %v843_v13 }
 0x1d5   : > { %v2415_v19 = vunpack.c.l.b16 %v1131_v15  ;;  %v2449_v2 = vunpack.c.l.b16 %v1117_v59 }
 0x1da   : > { %v845_v16 = vpop.f32.mrf.mxu2  ;;  %v892_v17 = vpop.f32.mrf.mxu3 }
 0x1db   : > { %v1132_v18 = vpack.c.bf16 %v892_v17, %v892_v17  ;;  %v1118_v60 = vpack.c.bf16 %v845_v16, %v845_v16 }
 0x1dd   : > { %v2417_v20 = vunpack.c.l.b16 %v1132_v18  ;;  %v2451_v3 = vunpack.c.l.b16 %v1118_v60  ;;  %v1984_v18 = vld [vmem:[#allocation9] sm:$0xff] }
 0x1de   : > { %1908 = vmatmul.msk.bf16.vlgmr.msra.gmra.mxu1 %vm800_vm5, %v1984_v18  ;;  %1900 = vmatmul.msk.bf16.vlgmr.msra.gmra.mxu0 %vm800_vm5, %v1984_v18 }
 0x1df   : > { %v1260_v21 = vpack.c.b16 %v2417_v20, %v2415_v19  ;;  %v1180_v7 = vpack.c.b16 %v2451_v3, %v2449_v2 }
 0x1e2   : > { %v848_v22 = vpop.f32.mrf.mxu2  ;;  %v895_v23 = vpop.f32.mrf.mxu3 }
 0x1e3   : > { %v1133_v24 = vpack.c.bf16 %v895_v23, %v895_v23  ;;  %v1119_v8 = vpack.c.bf16 %v848_v22, %v848_v22 }
 0x1e5   : > { %v2421_v28 = vunpack.c.l.b16 %v1133_v24  ;;  %v2461_v14 = vunpack.c.l.b16 %v1119_v8 }
 0x1ea   : > { %v850_v25 = vpop.f32.mrf.mxu2  ;;  %v897_v26 = vpop.f32.mrf.mxu3 }
 0x1eb   : > { %v1134_v27 = vpack.c.bf16 %v897_v26, %v897_v26  ;;  %v1120_v9 = vpack.c.bf16 %v850_v25, %v850_v25 }
 0x1ed   : > { %v2423_v29 = vunpack.c.l.b16 %v1134_v27  ;;  %v2463_v15 = vunpack.c.l.b16 %v1120_v9 }
 0x1ef   : > { %v1261_v30 = vpack.c.b16 %v2423_v29, %v2421_v28  ;;  %v1181_v27 = vpack.c.b16 %v2463_v15, %v2461_v14  ;;  %v1991_v28 = vld [vmem:[#allocation9 + $0x38] sm:$0xff] }
 0x1f1   : > { %v1275_v52 = vsel %vm1187_vm6, %v1261_v30, 0 }
 0x1f2   : > { %v853_v31 = vpop.f32.mrf.mxu2  ;;  %v900_v32 = vpop.f32.mrf.mxu3 }
 0x1f3   : > { %v1135_v33 = vpack.c.bf16 %v900_v32, %v900_v32  ;;  %v1121_v23 = vpack.c.bf16 %v853_v31, %v853_v31 }
 0x1f5   : > { %v2427_v37 = vunpack.c.l.b16 %v1135_v33  ;;  %v1169_v32 = vunpack.c.l.b16 %v1121_v23 }
 0x1fa   : > { %v855_v34 = vpop.f32.mrf.mxu2  ;;  %v902_v35 = vpop.f32.mrf.mxu3 }
 0x1fb   : > { %v1136_v36 = vpack.c.bf16 %v902_v35, %v902_v35  ;;  %v1122_v24 = vpack.c.bf16 %v855_v34, %v855_v34 }
 0x1fd   : > { %v2429_v38 = vunpack.c.l.b16 %v1136_v36  ;;  %v1170_v33 = vunpack.c.l.b16 %v1122_v24  ;;  %v1986_v24 = vld [vmem:[#allocation9 + $0x10] sm:$0xff] }
 0x1ff   : > { %v1262_v39 = vpack.c.b16 %v2429_v38, %v2427_v37  ;;  %v1272_v37 = vsel %vm1187_vm6, %v1260_v21, 0  ;;  %v1990_v38 = vld [vmem:[#allocation9 + $0x30] sm:$0xff] }
 0x202   : > { %v858_v40 = vpop.f32.mrf.mxu2  ;;  %v905_v41 = vpop.f32.mrf.mxu3 }
 0x203   : > { %v1137_v42 = vpack.c.bf16 %v905_v41, %v905_v41  ;;  %v1123_v10 = vpack.c.bf16 %v858_v40, %v858_v40  ;;  %v1182_v41 = vpack.c.b16 %v1170_v33, %v1169_v32 }
 0x205   : > { %v2433_v50 = vunpack.c.l.b16 %v1137_v42  ;;  %v1171_v16 = vunpack.c.l.b16 %v1123_v10 }
 0x20a   : > { %v860_v45 = vpop.f32.mrf.mxu2  ;;  %v907_v46 = vpop.f32.mrf.mxu3 }
 0x20b   : > { %v1138_v49 = vpack.c.bf16 %v907_v46, %v907_v46  ;;  %v1124_v11 = vpack.c.bf16 %v860_v45, %v860_v45 }
 0x20d   : > { %v2435_v51 = vunpack.c.l.b16 %v1138_v49  ;;  %v1172_v17 = vunpack.c.l.b16 %v1124_v11  ;;  %v1985_v49 = vld [vmem:[#allocation9 + $0x8] sm:$0xff] }
 0x20e   : > { %1909 = vmatmul.msk.bf16.gmra.mxu1 %vm800_vm5, %v1985_v49  ;;  %1901 = vmatmul.msk.bf16.gmra.mxu0 %vm800_vm5, %v1985_v49  ;;  %v1987_v49 = vld [vmem:[#allocation9 + $0x18] sm:$0xff] }
 0x20f   : > { %v1263_v54 = vpack.c.b16 %v2435_v51, %v2433_v50  ;;  %v1183_v26 = vpack.c.b16 %v1172_v17, %v1171_v16  ;;  %v1989_v50 = vld [vmem:[#allocation9 + $0x28] sm:$0xff]  ;;  %v1113_v51 = vpack.c.bf16 %v2391_v47, %v2391_v47  ;;  %v1114_v47 = vpack.c.bf16 %v2393_v48, %v2393_v48 }
 0x211   : > { %v1281_v14 = vsel %vm1187_vm6, %v1263_v54, 0 }
 0x212   : > { %v863_v55 = vpop.f32.mrf.mxu2  ;;  %v910_v56 = vpop.f32.mrf.mxu3 }
 0x213   : > { %v1139_v58 = vpack.c.bf16 %v910_v56, %v910_v56  ;;  %v1125_v60 = vpack.c.bf16 %v863_v55, %v863_v55 }
 0x215   : > { %v2445_v0 = vunpack.c.l.b16 %v1139_v58 }
 0x21a   : > { %v865_v61 = vpop.f32.mrf.mxu2  ;;  %v912_v62 = vpop.f32.mrf.mxu3 }
 0x21b   : > { %v1140_v63 = vpack.c.bf16 %v912_v62, %v912_v62  ;;  %v1126_v62 = vpack.c.bf16 %v865_v61, %v865_v61 }
 0x21d   : > { %v2447_v1 = vunpack.c.l.b16 %v1140_v63  ;;  %v1174_v8 = vunpack.c.l.b16 %v1126_v62 }
 0x21e   : > { %1910 = vmatmul.msk.bf16.gmra.mxu1 %vm800_vm5, %v1986_v24  ;;  %1902 = vmatmul.msk.bf16.gmra.mxu0 %vm800_vm5, %v1986_v24  ;;  %v2256_v24 = vmov 0  }
 0x21f   : > { %v1264_v4 = vpack.c.b16 %v2447_v1, %v2445_v0  ;;  %v1192_v0 = vsel %vm1187_vm6, %v1179_v57, 0  ;;  %v1278_v1 = vsel %vm1187_vm6, %v1262_v39, 0 }
 0x222   : > { %v868_v5 = vpop.f32.mrf.mxu2  ;;  %v2455_v6 = vpop.f32.mrf.mxu3 }
 0x223   : > { %v1127_v42 = vpack.c.bf16 %v868_v5, %v868_v5  ;;  %v1173_v5 = vunpack.c.l.b16 %v1125_v60 }
 0x225   : > { %v1175_v31 = vunpack.c.l.b16 %v1127_v42  ;;  %v1184_v16 = vpack.c.b16 %v1174_v8, %v1173_v5  ;;  %v1204_v42 = vsel %vm1187_vm6, %v1183_v26, 0  ;;  %v1988_v26 = vld [vmem:[#allocation9 + $0x20] sm:$0xff] }
 0x227   : > { %v1207_v33 = vsel %vm1187_vm6, %v1184_v16, 0 }
 0x22a   : > { %v870_v12 = vpop.f32.mrf.mxu2  ;;  %v2459_v13 = vpop.f32.mrf.mxu3 }
 0x22b   : > { %v1128_v43 = vpack.c.bf16 %v870_v12, %v870_v12 }
 0x22d   : > { %v1176_v34 = vunpack.c.l.b16 %v1128_v43 }
 0x22e   : > { %1911 = vmatmul.msk.bf16.gmra.mxu1 %vm800_vm5, %v1987_v49  ;;  %1903 = vmatmul.msk.bf16.gmra.mxu0 %vm800_vm5, %v1987_v49 }
 0x22f   : > { %v1185_v63 = vpack.c.b16 %v1176_v34, %v1175_v31  ;;  %v1201_v31 = vsel %vm1187_vm6, %v1182_v41, 0  ;;  %v1195_v41 = vsel %vm1187_vm6, %v1180_v7, 0 }
 0x231   : > { %v1210_v9 = vsel %vm1187_vm6, %v1185_v63, 0 }
 0x232   : > { %v873_v22 = vpop.f32.mrf.mxu2  ;;  %v920_v25 = vpop.f32.mrf.mxu3 }
 0x233   : > { %v1129_v35 = vpack.c.bf16 %v873_v22, %v873_v22  ;;  %v1143_v22 = vpack.c.bf16 %v920_v25, %v920_v25  ;;  %v1141_v25 = vpack.c.bf16 %v2455_v6, %v2455_v6  ;;  %v1198_v6 = vsel %vm1187_vm6, %v1181_v27, 0 }
 0x235   : > { %v1177_v44 = vunpack.c.l.b16 %v1129_v35  ;;  %v1256_v35 = vunpack.c.l.b16 %v1143_v22 }
 0x23a   : > { %v875_v36 = vpop.f32.mrf.mxu2  ;;  %v922_v40 = vpop.f32.mrf.mxu3 }
 0x23b   : > { %v1130_v45 = vpack.c.bf16 %v875_v36, %v875_v36  ;;  %v1144_v17 = vpack.c.bf16 %v922_v40, %v922_v40  ;;  %v1142_v36 = vpack.c.bf16 %v2459_v13, %v2459_v13  ;;  %v1284_v13 = vsel %vm1187_vm6, %v1264_v4, 0 }
 0x23d   : > { %v1178_v46 = vunpack.c.l.b16 %v1130_v45  ;;  %v1257_v55 = vunpack.c.l.b16 %v1144_v17  ;;  %v1255_v43 = vunpack.c.l.b16 %v1142_v36  ;;  %v1254_v45 = vunpack.c.l.b16 %v1141_v25  ;;  %v1105_v17 = vld [vmem:[%s420_s29] sm:$0x1] }
 0x23e   : > { %1912 = vmatmul.msk.bf16.gmra.mxu1 %vm800_vm5, %v1988_v26  ;;  %1904 = vmatmul.msk.bf16.gmra.mxu0 %vm800_vm5, %v1988_v26  ;;  %vm1106_vm7 = vcmp.gt.f32.partialorder %v1105_v17, 0.5 }
 0x23f   : > { %v1186_v56 = vpack.c.b16 %v1178_v46, %v1177_v44  ;;  %v1266_v40 = vpack.c.b16 %v1257_v55, %v1256_v35  ;;  %v1265_v46 = vpack.c.b16 %v1255_v43, %v1254_v45  ;;  %v1107_v22 = vsel %vm1106_vm7, 1, %v2256_v24 }
 0x240   : > { %v1108_v55 = vperm.slane %v1107_v22, 0 }
 0x241   : > { %v1213_v58 = vsel %vm1187_vm6, %v1186_v56, 0  ;;  %v1290_v44 = vsel %vm1187_vm6, %v1266_v40, 0  ;;  %v1287_v34 = vsel %vm1187_vm6, %v1265_v46, 0 }
 0x242   : > { %v925_v59 = vpop.f32.mrf.mxu3  ;;  %1215 = vmatpush.bf16.xpose.msrb.mxu2 %v1213_v58  ;;  %vm1109_vm9 = vcmp.eq.s32.totalorder %v1108_v55, 1 }
 0x243   : > { %v1145_v10 = vpack.c.bf16 %v925_v59, %v925_v59 }
 0x245   : > { %v1258_v18 = vunpack.c.l.b16 %v1145_v10 }
 0x24a   : > { %v927_v11 = vpop.f32.mrf.mxu3  ;;  %1216 = vmatpush.bf16.xpose.msrb.mxu2 %v1210_v9 }
 0x24b   : > { %v1146_v12 = vpack.c.bf16 %v927_v11, %v927_v11 }
 0x24d   : > { %v1259_v23 = vunpack.c.l.b16 %v1146_v12 }
 0x24e   : > { %1913 = vmatmul.msk.bf16.gmra.mxu1 %vm800_vm5, %v1989_v50  ;;  %1905 = vmatmul.msk.bf16.gmra.mxu0 %vm800_vm5, %v1989_v50 }
 0x24f   : > { %v1267_v32 = vpack.c.b16 %v1259_v23, %v1258_v18  ;;  %v1100_v23 = vlaneseq }
 0x251   : > { %v1293_v61 = vsel %vm1187_vm6, %v1267_v32, 0  ;;  %v1101_v32 = vshrl.u32 %v1100_v23, 7 }
 0x252   : > { %1217 = vmatpush.bf16.xpose.msrb.mxu2 %v1207_v33  ;;  %1295 = vmatpush.bf16.xpose.msrb.mxu3 %v1293_v61  ;;  %v1103_v33 = vand.u32 127, %v1100_v23 }
 0x254   : > { %vm1104_vm8 = vcmp.le.s32.totalorder %v1103_v33, %v1101_v32 }
 0x255   : > { %vm2565_vm10 = vmand %vm1104_vm8, %vm1109_vm9 }
 0x25a   : > { %1218 = vmatpush.bf16.xpose.msrb.mxu2 %v1204_v42  ;;  %1296 = vmatpush.bf16.xpose.msrb.mxu3 %v1290_v44 }
 0x25b   : > { %v1060_v29 = vpop.f32.mrf.mxu1  ;;  %v1008_v61 = vpop.f32.mrf.mxu0 }
 0x25c   : > { %v1372_v19 = vpack.c.bf16 %v1060_v29, %v1060_v29  ;;  %v1356_v36 = vpack.c.bf16 %v1008_v61, %v1008_v61 }
 0x25e   : > { %1914 = vmatmul.msk.bf16.gmra.mxu1 %vm800_vm5, %v1990_v38  ;;  %1906 = vmatmul.msk.bf16.gmra.mxu0 %vm800_vm5, %v1990_v38  ;;  %v2533_v21 = vunpack.c.l.b16 %v1372_v19  ;;  %v2573_v44 = vunpack.c.l.b16 %v1356_v36 }
 0x262   : > { %1219 = vmatpush.bf16.xpose.msrb.mxu2 %v1201_v31  ;;  %1297 = vmatpush.bf16.xpose.msrb.mxu3 %v1287_v34 }
 0x263   : > { %v1062_v20 = vpop.f32.mrf.mxu1  ;;  %v1010_v42 = vpop.f32.mrf.mxu0 }
 0x264   : > { %v1373_v30 = vpack.c.bf16 %v1062_v20, %v1062_v20  ;;  %v1357_v45 = vpack.c.bf16 %v1010_v42, %v1010_v42 }
 0x266   : > { %v2535_v39 = vunpack.c.l.b16 %v1373_v30  ;;  %v2576_v49 = vunpack.c.l.b16 %v1357_v45 }
 0x268   : > { %v1481_v48 = vpack.c.b16 %v2535_v39, %v2533_v21  ;;  %v1420_v31 = vpack.c.b16 %v2576_v49, %v2573_v44 }
 0x26a   : > { %1220 = vmatpush.bf16.xpose.msrb.mxu2 %v1198_v6  ;;  %1298 = vmatpush.bf16.xpose.msrb.mxu3 %v1284_v13 }
 0x26e   : > { %1915 = vmatmul.msk.bf16.gmra.mxu1 %vm800_vm5, %v1991_v28  ;;  %1907 = vmatmul.msk.bf16.gmra.mxu0 %vm800_vm5, %v1991_v28 }
 0x272   : > { %1221 = vmatpush.bf16.xpose.msrb.mxu2 %v1195_v41  ;;  %1299 = vmatpush.bf16.xpose.msrb.mxu3 %v1281_v14 }
 0x27a   : > { %1222 = vmatpush.bf16.xpose.msrb.mxu2 %v1192_v0  ;;  %1300 = vmatpush.bf16.xpose.msrb.mxu3 %v1278_v1 }
 0x281   : > { %1916 = vmatmul.msk.bf16.vlgmr.msrb.gmra.mxu2 %vm1187_vm6, %v1113_v51 }
 0x282   : > { %1301 = vmatpush.bf16.xpose.msrb.mxu3 %v1275_v52 }
 0x28a   : > { %1302 = vmatpush.bf16.xpose.msrb.mxu3 %v1272_v37 }
 0x28b   : > { %v1065_v53 = vpop.f32.mrf.mxu1  ;;  %v1013_v6 = vpop.f32.mrf.mxu0 }
 0x28c   : > { %v1374_v54 = vpack.c.bf16 %v1065_v53, %v1065_v53  ;;  %v1358_v26 = vpack.c.bf16 %v1013_v6, %v1013_v6 }
 0x28e   : > { %v2539_v2 = vunpack.c.l.b16 %v1374_v54  ;;  %v2584_v1 = vunpack.c.l.b16 %v1358_v26 }
 0x291   : > { %1917 = vmatmul.msk.bf16.vlgmr.msrb.gmra.mxu3 %vm1187_vm6, %v1114_v47 }
 0x293   : > { %v1067_v57 = vpop.f32.mrf.mxu1  ;;  %v1015_v14 = vpop.f32.mrf.mxu0 }
 0x294   : > { %v1375_v3 = vpack.c.bf16 %v1067_v57, %v1067_v57  ;;  %v1359_v50 = vpack.c.bf16 %v1015_v14, %v1015_v14 }
 0x296   : > { %v2541_v4 = vunpack.c.l.b16 %v1375_v3  ;;  %v2587_v52 = vunpack.c.l.b16 %v1359_v50 }
 0x298   : > { %v1482_v7 = vpack.c.b16 %v2541_v4, %v2539_v2  ;;  %v1421_v37 = vpack.c.b16 %v2587_v52, %v2584_v1 }
 0x29b   : > { %v1070_v15 = vpop.f32.mrf.mxu1  ;;  %v1018_v47 = vpop.f32.mrf.mxu0 }
 0x29c   : > { %v1376_v27 = vpack.c.bf16 %v1070_v15, %v1070_v15  ;;  %v1360_v29 = vpack.c.bf16 %v1018_v47, %v1018_v47 }
 0x29e   : > { %v2545_v58 = vunpack.c.l.b16 %v1376_v27  ;;  %v2591_v54 = vunpack.c.l.b16 %v1360_v29 }
 0x2a3   : > { %v1072_v56 = vpop.f32.mrf.mxu1  ;;  %v1020_v20 = vpop.f32.mrf.mxu0 }
 0x2a4   : > { %v1377_v59 = vpack.c.bf16 %v1072_v56, %v1072_v56  ;;  %v1361_v57 = vpack.c.bf16 %v1020_v20, %v1020_v20 }
 0x2a6   : > { %v2547_v60 = vunpack.c.l.b16 %v1377_v59  ;;  %v2593_v56 = vunpack.c.l.b16 %v1361_v57 }
 0x2a8   : > { %v1483_v62 = vpack.c.b16 %v2547_v60, %v2545_v58  ;;  %v1422_v17 = vpack.c.b16 %v2593_v56, %v2591_v54 }
 0x2ab   : > { %v1075_v63 = vpop.f32.mrf.mxu1  ;;  %v1023_v22 = vpop.f32.mrf.mxu0 }
 0x2ac   : > { %v1378_v5 = vpack.c.bf16 %v1075_v63, %v1075_v63 }
 0x2ae   : > { %v2551_v9 = vunpack.c.l.b16 %v1378_v5 }
 0x2b3   : > { %v1077_v8 = vpop.f32.mrf.mxu1  ;;  %v1025_v42 = vpop.f32.mrf.mxu0 }
 0x2b4   : > { %v1379_v10 = vpack.c.bf16 %v1077_v8, %v1077_v8 }
 0x2b6   : > { %v2553_v11 = vunpack.c.l.b16 %v1379_v10 }
 0x2b8   : > { %v1484_v12 = vpack.c.b16 %v2553_v11, %v2551_v9 }
 0x2bb   : > { %v2557_v16 = vpop.f32.mrf.mxu1 }
 0x2bc   : > { %v1380_v24 = vpack.c.bf16 %v2557_v16, %v2557_v16 }
 0x2c3   : > { %v2563_v18 = vpop.f32.mrf.mxu1 }
 0x2c4   : > { %v1381_v32 = vpack.c.bf16 %v2563_v18, %v2563_v18  ;;  %v1028_v18 = vpop.f32.mrf.mxu0 }
 0x2c6   : > { %v1474_v36 = vunpack.c.l.b16 %v1381_v32 }
 0x2cb   : > { %v1085_v35 = vpop.f32.mrf.mxu1 }
 0x2cc   : > { %v1382_v59 = vpack.c.bf16 %v1085_v35, %v1085_v35  ;;  %v1473_v35 = vunpack.c.l.b16 %v1380_v24 }
 0x2ce   : > { %v1475_v33 = vunpack.c.l.b16 %v1382_v59  ;;  %v1485_v45 = vpack.c.b16 %v1474_v36, %v1473_v35 }
 0x2d3   : > { %v1087_v46 = vpop.f32.mrf.mxu1 }
 0x2d4   : > { %v1383_v63 = vpack.c.bf16 %v1087_v46, %v1087_v46 }
 0x2d6   : > { %v1476_v55 = vunpack.c.l.b16 %v1383_v63 }
 0x2d8   : > { %v1486_v40 = vpack.c.b16 %v1476_v55, %v1475_v33 }
 0x2db   : > { %v1090_v13 = vpop.f32.mrf.mxu1 }
 0x2dc   : > { %v1384_v30 = vpack.c.bf16 %v1090_v13, %v1090_v13  ;;  %v1030_v13 = vpop.f32.mrf.mxu0 }
 0x2dd   : > { %v1365_v20 = vpack.c.bf16 %v1030_v13, %v1030_v13  ;;  %v1997_v13 = vld [vmem:[%s2665_s7 + $0x28] sm:$0xff] }
 0x2de   : > { %v1477_v5 = vunpack.c.l.b16 %v1384_v30 }
 0x2e3   : > { %v1092_v51 = vpop.f32.mrf.mxu1 }
 0x2e4   : > { %v1385_v53 = vpack.c.bf16 %v1092_v51, %v1092_v51  ;;  %v1033_v26 = vpop.f32.mrf.mxu0 }
 0x2e6   : > { %v1478_v8 = vunpack.c.l.b16 %v1385_v53 }
 0x2e8   : > { %v1487_v61 = vpack.c.b16 %v1478_v8, %v1477_v5 }
 0x2eb   : > { %v1095_v28 = vpop.f32.mrf.mxu1 }
 0x2ec   : > { %v1386_v19 = vpack.c.bf16 %v1095_v28, %v1095_v28 }
 0x2ee   : > { %v1479_v15 = vunpack.c.l.b16 %v1386_v19  ;;  %v1364_v19 = vpack.c.bf16 %v1028_v18, %v1028_v18 }
 0x2f0   : > { %v1412_v57 = vunpack.c.l.b16 %v1364_v19 }
 0x2f3   : > { %v1097_v3 = vpop.f32.mrf.mxu1 }
 0x2f4   : > { %v1387_v27 = vpack.c.bf16 %v1097_v3, %v1097_v3  ;;  %v1413_v3 = vunpack.c.l.b16 %v1365_v20 }
 0x2f6   : > { %v1480_v10 = vunpack.c.l.b16 %v1387_v27  ;;  %v1424_v5 = vpack.c.b16 %v1413_v3, %v1412_v57 }
 0x2f8   : > { %v1488_v23 = vpack.c.b16 %v1480_v10, %v1479_v15 }
 0x2fa   : > { %1497 = vmatpush.bf16.msrb.mxu1 %v1488_v23 }
 0x2fe   : > { %1498 = vmatpush.bf16.msrb.mxu1 %v1487_v61 }
 0x302   : > { %1499 = vmatpush.bf16.msrb.mxu1 %v1486_v40 }
 0x304   : > { %v1224_v25 = vpop.f32.mrf.mxu2 }
 0x305   : > { %v2571_v43 = vsel %vm2565_vm10, %v1224_v25, -1e+09  ;;  %v1362_v25 = vpack.c.bf16 %v1023_v22, %v1023_v22 }
 0x306   : > { %1310 = vmax.xlane.f32.xlu1 %v2571_v43  ;;  %1500 = vmatpush.bf16.msrb.mxu1 %v1485_v45 }
 0x307   : > { %v1410_v46 = vunpack.c.l.b16 %v1362_v25 }
 0x30a   : > { %1501 = vmatpush.bf16.msrb.mxu1 %v1484_v12 }
 0x30c   : > { %v1226_v34 = vpop.f32.mrf.mxu2 }
 0x30d   : > { %v1363_v34 = vpack.c.bf16 %v1025_v42, %v1025_v42 }
 0x30e   : > { %1502 = vmatpush.bf16.msrb.mxu1 %v1483_v62 }
 0x30f   : > { %v1411_v6 = vunpack.c.l.b16 %v1363_v34 }
 0x311   : > { %v1423_v16 = vpack.c.b16 %v1411_v6, %v1410_v46  ;;  %v1999_v6 = vld [vmem:[%s2665_s7 + $0x38] sm:$0xff] }
 0x312   : > { %1503 = vmatpush.bf16.msrb.mxu1 %v1482_v7  ;;  %1580 = vmatpush.bf16.xpose.msra.mxu2 %v1999_v6 }
 0x314   : > { %v1304_v41 = vpop.f32.mrf.mxu3 }
 0x315   : > { %v2582_v0 = vsel %vm2565_vm10, %v1304_v41, -1e+09  ;;  %v1035_v41 = vpop.f32.mrf.mxu0 }
 0x316   : > { %1312 = vmax.xlane.f32.xlu0 %v2582_v0  ;;  %1504 = vmatpush.bf16.msrb.mxu1 %v1481_v48  ;;  %v1367_v21 = vpack.c.bf16 %v1035_v41, %v1035_v41  ;;  %v1996_v41 = vld [vmem:[%s2665_s7 + $0x20] sm:$0xff] }
 0x318   : > { %v1415_v53 = vunpack.c.l.b16 %v1367_v21 }
 0x31c   : > { %v1306_v38 = vpop.f32.mrf.mxu3 }
 0x31d   : > { %v1038_v14 = vpop.f32.mrf.mxu0  ;;  %v1366_v38 = vpack.c.bf16 %v1033_v26, %v1033_v26 }
 0x31e   : > { %v1368_v60 = vpack.c.bf16 %v1038_v14, %v1038_v14 }
 0x31f   : > { %v1414_v30 = vunpack.c.l.b16 %v1366_v38 }
 0x320   : > { %v1416_v39 = vunpack.c.l.b16 %v1368_v60 }
 0x321   : > { %v1425_v15 = vpack.c.b16 %v1415_v53, %v1414_v30 }
 0x325   : > { %v1040_v50 = vpop.f32.mrf.mxu0 }
 0x326   : > { %v1369_v62 = vpack.c.bf16 %v1040_v50, %v1040_v50  ;;  %v1995_v50 = vld [vmem:[%s2665_s7 + $0x18] sm:$0xff] }
 0x328   : > { %v1417_v48 = vunpack.c.l.b16 %v1369_v62 }
 0x32d   : > { %v1043_v9 = vpop.f32.mrf.mxu0 }
 0x32e   : > { %v1370_v51 = vpack.c.bf16 %v1043_v9, %v1043_v9 }
 0x330   : > { %v1418_v4 = vunpack.c.l.b16 %v1370_v51  ;;  %v1992_v51 = vld [vmem:[%s2665_s7] sm:$0xff] }
 0x335   : > { %v1045_v2 = vpop.f32.mrf.mxu0 }
 0x336   : > { %v1371_v7 = vpack.c.bf16 %v1045_v2, %v1045_v2 }
 0x338   : > { %v1419_v47 = vunpack.c.l.b16 %v1371_v7 }
 0x33a   : > { %v1427_v28 = vpack.c.b16 %v1419_v47, %v1418_v4  ;;  %v2077_v4 = vld [vmem:[%s2380_s24] sm:$0xff] }
 0x33c   : > { %1436 = vmatpush.bf16.msrb.mxu0 %v1427_v28 }
 0x379   : > { %v1311_v11 = vpop.xlane.xlu1 %1310 }
 0x37a   : > { %v1314_v12 = vsub.f32 %v2571_v43, %v1311_v11  ;;  %v1426_v43 = vpack.c.b16 %v1417_v48, %v1416_v39  ;;  %v1994_v11 = vld [vmem:[%s2665_s7 + $0x10] sm:$0xff] }
 0x37c   : > { %v1316_v58 = vmul.f32 1.442695, %v1314_v12  ;;  %1437 = vmatpush.bf16.msrb.mxu0 %v1426_v43  ;;  %v1993_v12 = vld [vmem:[%s2665_s7 + $0x8] sm:$0xff] }
 0x37e   : > { %2069 = vpow2.f32 %v1316_v58 }
 0x380   : > { %1438 = vmatpush.bf16.msrb.mxu0 %v1425_v15 }
 0x384   : > { %v2070_v29 = vpop.eup %2069  ;;  %1439 = vmatpush.bf16.msrb.mxu0 %v1424_v5 }
 0x385   : > { %1320 = vadd.xlane.f32.xlu2 %v2070_v29 }
 0x388   : > { %1440 = vmatpush.bf16.msrb.mxu0 %v1423_v16  ;;  %v1998_v16 = vld [vmem:[%s2665_s7 + $0x30] sm:$0xff] }
 0x389   : > { %v1313_v27 = vpop.xlane.xlu0 %1312  ;;  %1581 = vmatpush.bf16.xpose.msra.mxu2 %v1998_v16 }
 0x38a   : > { %v1315_v59 = vsub.f32 %v2582_v0, %v1313_v27 }
 0x38c   : > { %v1318_v63 = vmul.f32 1.442695, %v1315_v59  ;;  %1441 = vmatpush.bf16.msrb.mxu0 %v1422_v17 }
 0x38e   : > { %2071 = vpow2.f32 %v1318_v63 }
 0x390   : > { %1442 = vmatpush.bf16.msrb.mxu0 %v1421_v37 }
 0x391   : > { %1582 = vmatpush.bf16.xpose.msra.mxu2 %v1997_v13 }
 0x394   : > { %v2072_v8 = vpop.eup %2071  ;;  %1443 = vmatpush.bf16.msrb.mxu0 %v1420_v31 }
 0x395   : > { %1322 = vadd.xlane.f32.xlu1 %v2072_v8 }
 0x399   : > { %1583 = vmatpush.bf16.xpose.msra.mxu2 %v1996_v41 }
 0x3a1   : > { %1584 = vmatpush.bf16.xpose.msra.mxu2 %v1995_v50 }
 0x3a9   : > { %1585 = vmatpush.bf16.xpose.msra.mxu2 %v1994_v11 }
 0x3b1   : > { %1586 = vmatpush.bf16.xpose.msra.mxu2 %v1993_v12 }
 0x3b9   : > { %1587 = vmatpush.bf16.xpose.msra.mxu2 %v1992_v51 }
 0x3f8   : > { %v1321_v0 = vpop.xlane.xlu2 %1320 }
 0x3f9   : > { %2073 = vrcp.f32 %v1321_v0  ;;  %v1335_v32 = vand.u32 2147483648, %v1321_v0  ;;  %v1333_v33 = vand.u32 2147483647, %v1321_v0  ;;  %vm1329_vm12 = vweird.f32 %v1321_v0 }
 0x3fb   : > { %v1336_v54 = vor.u32 1.1754944e-38, %v1335_v32  ;;  %vm1334_vm14 = vcmp.eq.f32.partialorder %v1333_v33, 8.507059e+37 }
 0x3ff   : > { %v2074_v10 = vpop.eup %2073 }
 0x400   : > { %v1325_v23 = vmul.f32 %v2074_v10, %v1321_v0  ;;  %vm1330_vm11 = vweird.f32 %v2074_v10 }
 0x401   : > { %vm1331_vm13 = vmor %vm1329_vm12, %vm1330_vm11 }
 0x402   : > { %v1326_v24 = vsub.f32 1.0, %v1325_v23 }
 0x404   : > { %v1327_v22 = vmul.f32 %v2074_v10, %v1326_v24 }
 0x406   : > { %v1328_v55 = vadd.f32 %v2074_v10, %v1327_v22 }
 0x408   : > { %v1323_v56 = vpop.xlane.xlu1 %1322  ;;  %v1332_v1 = vsel %vm1331_vm13, %v2074_v10, %v1328_v55 }
 0x409   : > { %2075 = vrcp.f32 %v1323_v56  ;;  %v1337_v52 = vsel %vm1334_vm14, %v1336_v54, %v1332_v1  ;;  %v1350_v61 = vand.u32 2147483648, %v1323_v56  ;;  %v1348_v36 = vand.u32 2147483647, %v1323_v56 }
 0x40a   : > { %v1338_v44 = vmul.f32 %v2070_v29, %v1337_v52  ;;  %vm1344_vm0 = vweird.f32 %v1323_v56 }
 0x40b   : > { %v1351_v25 = vor.u32 1.1754944e-38, %v1350_v61  ;;  %vm1349_vm2 = vcmp.eq.f32.partialorder %v1348_v36, 8.507059e+37 }
 0x40c   : > { %v1354_v49 = vpack.c.bf16 %v1338_v44, %v1338_v44 }
 0x40e   : > { %1444 = vmatmul.bf16.vlgmr.msrb.gmra.mxu0 %v1354_v49 }
 0x40f   : > { %v2076_v31 = vpop.eup %2075 }
 0x410   : > { %v1340_v37 = vmul.f32 %v2076_v31, %v1323_v56  ;;  %vm1345_vm15 = vweird.f32 %v2076_v31 }
 0x411   : > { %vm1346_vm1 = vmor %vm1344_vm0, %vm1345_vm15 }
 0x412   : > { %v1341_v17 = vsub.f32 1.0, %v1340_v37 }
 0x414   : > { %v1342_v35 = vmul.f32 %v2076_v31, %v1341_v17 }
 0x416   : > { %v1343_v40 = vadd.f32 %v2076_v31, %v1342_v35 }
 0x418   : > { %v1347_v42 = vsel %vm1346_vm1, %v2076_v31, %v1343_v40 }
 0x419   : > { %v1352_v45 = vsel %vm1349_vm2, %v1351_v25, %v1347_v42 }
 0x41a   : > { %v1353_v46 = vmul.f32 %v2072_v8, %v1352_v45 }
 0x41c   : > { %v1355_v34 = vpack.c.bf16 %v1353_v46, %v1353_v46 }
 0x41e   : > { %1505 = vmatmul.bf16.vlgmr.msrb.gmra.mxu1 %v1355_v34 }
 0x48b   : > { %v1445_v18 = vpop.f32.mrf.mxu0 }
 0x493   : > { %v1447_v26 = vpop.f32.mrf.mxu0 }
 0x49b   : > { %v1506_v14 = vpop.f32.mrf.mxu1 }
 0x49c   : > { %1511 = vrot.lane.b32.xlu2 %v1506_v14, %s2257_s17 }
 0x4a3   : > { %v1508_v9 = vpop.f32.mrf.mxu1 }
 0x4f6   : > { %v1512_v58 = vpop.permute.xlu2 %1511 }
 0x4f7   : > { %v1514_v60 = vsel %vm1187_vm6, %v1445_v18, %v1512_v58 }
 0x4f8   : > { %v1531_v62 = vpack.c.bf16 %v1514_v60, %v1514_v60 }
 0x4fa   : > { %1588 = vmatmul.bf16.vlgmr.msra.gmra.mxu2 %v1531_v62 }
 0x57d   : > { %v1589_v2 = vpop.f32.mrf.mxu2 }
 0x57e   : > { %v1593_v7 = vadd.f32 %v2077_v4, %v1589_v2 }
 0x580   : > { %1594 = vst [vmem:[%s424_s15] sm:$0xff] %v1593_v7 }
 0x585   : > { %v1591_v38 = vpop.f32.mrf.mxu2 }
 0x586 PF: > { %s22_s30 = sadd.s32 1, %s2246_s30  }
 0x587   : > { %p19_p7 = scmp.ge.s32.totalorder %s22_s30, 4  }
 0x589   :  { %21 = sbr.rel (!%p19_p7) target bundleno = 3 (0x3), region = 110 }
 0x58e   :  { %1614 = vsyncpa [#allocation3], 1 }
 0x58f   :  { %1616 = vsyncpa [#allocation3 + $0x1], 1 }
 0x590   :  { %1617 = vsyncpa [#allocation5], 1 }
 0x591   :  { %1618 = vsyncpa [#allocation8], 1 }

// kernel: _lambda_.6
= control target key start
LH: loop header
LB: loop body
LE: loop exit
PB: predicated region body
PF: predicated region fallthrough
CT: control target
= control target key end

     0   :  { %14 = vsyncpa [#allocation3], 0  ;;  %s2717_s0 = inlined_call_operand.vmem [shape: f32[2,8,128], index: 0, kind: input, shape index: {}]   ;;  %s2718_s1 = inlined_call_operand.vmem [shape: f32[1,128], index: 1, kind: input, shape index: {}]   ;;  %s2719_s2 = inlined_call_operand.hbm [shape: bf16[2,64,128], index: 2, kind: input, shape index: {}]   ;;  %s2720_s3 = inlined_call_operand.hbm [shape: bf16[2,64,128], index: 3, kind: input, shape index: {}]   ;;  %s2721_s4 = inlined_call_operand.hbm [shape: bf16[2,64,128], index: 4, kind: input, shape index: {}]   ;;  %s2722_s5 = inlined_call_operand.hbm [shape: bf16[128,8], index: 5, kind: input, shape index: {}]   ;;  %s2723_s6 = inlined_call_operand.hbm [shape: bf16[128,8], index: 6, kind: input, shape index: {}]   ;;  %s2724_s7 = inlined_call_operand.hbm [shape: bf16[128,128], index: 7, kind: input, shape index: {}]   ;;  %s2725_s8 = inlined_call_operand.vmem [shape: f32[2,1,128], index: 8, kind: input, shape index: {}]   ;;  %s2726_s9 = inlined_call_operand.vmem [shape: f32[2,8,128], index: 9, kind: output, shape index: {}]  }
   0x1   :  { %15 = vsyncpa [#allocation5], 0 }
   0x2   :  { %16 = vsyncpa [#allocation8], 0 }
   0x3   :  { %17 = vsyncpa [#allocation11], 0  ;;  %s2382_s30 = smov 0  }
   0x4 LB: > { %s2388_s10 = sadd.s32 4294967295, %s2319_s30   ;;  %p1736_p0 = scmp.ge.s32.totalorder %s2319_s30, 1  ;;  %s2319_s30 = sphi %s2382_s30, %s23_s30  }
   0x5   : > { %p253_p1 = scmp.lt.s32.totalorder %s2319_s30, 3  ;;  %p2072_p2 = scmp.eq.s32.totalorder %s2388_s10, 0 }
   0x6   : > { %s281_s13 = sshll.u32 %s2720_s3, 4  ;;  %s309_s17 = sshll.u32 %s2722_s5, 4  ;;  %s282_s13 = int_to_ptr.hbm [resolvable:$true] %s281_s13  ;;  %s310_s17 = int_to_ptr.hbm [resolvable:$true] %s309_s17 }
   0x7   : > { %p2396_p3 = pnand %p1736_p0, %p253_p1  ;;  %s2321_s18 = smov [#allocation4]  }
   0x8   : > { %s283_s19 = sshll.u32 %s2321_s18, 4  ;;  %s2322_s21 = smov [#allocation7]   ;;  %s284_s19 = int_to_ptr.vmem [resolvable:$true] %s283_s19 }
   0x9   : > { %p2053_p4 = pneg %p2396_p3  ;;  %s311_s22 = sshll.u32 %s2322_s21, 4  ;;  %s312_s22 = int_to_ptr.vmem [resolvable:$true] %s311_s22 }
   0xa   : > { %s267_s25 = sshll.u32 %s2719_s2, 4  ;;  %s2323_s26 = smov 64   ;;  %s268_s25 = int_to_ptr.hbm [resolvable:$true] %s267_s25 }
   0xb   : > { %p2407_p5 = pnand %p2072_p2, %p2053_p4  ;;  %s2324_s27 = smov 4  }
   0xc   : > { %s2325_s28 = smov [#allocation2]   ;;  %s295_s15 = sshll.u32 %s2721_s4, 4  ;;  %s296_s15 = int_to_ptr.hbm [resolvable:$true] %s295_s15 }
   0xd   : > { %2059 = dma.hbm_to_vmem [thread:$0]  (!%p2407_p5), %s282_s13, 1024, %s284_s19, [#allocation5], %s2323_s26, %s2323_s26, %s2324_s27  }
   0xe   : > { %2065 = dma.hbm_to_vmem [thread:$0]  (!%p2407_p5), %s310_s17, 1024, %s312_s22, [#allocation8], %s2323_s26, %s2323_s26, %s2324_s27  }
   0xf   : > { %s269_s29 = sshll.u32 %s2325_s28, 4  ;;  %s323_s21 = sshll.u32 %s2723_s6, 4  ;;  %s270_s29 = int_to_ptr.vmem [resolvable:$true] %s269_s29  ;;  %s324_s21 = int_to_ptr.hbm [resolvable:$true] %s323_s21 }
  0x10   : > { %2056 = dma.hbm_to_vmem [thread:$0]  (!%p2407_p5), %s268_s25, 1024, %s270_s29, [#allocation3], %s2323_s26, %s2323_s26, %s2324_s27  }
  0x11   : > { %s2326_s13 = smov [#allocation6]   ;;  %s2327_s17 = smov [#allocation9]  }
  0x12   : > { %s297_s19 = sshll.u32 %s2326_s13, 4  ;;  %s325_s22 = sshll.u32 %s2327_s17, 4  ;;  %s298_s19 = int_to_ptr.vmem [resolvable:$true] %s297_s19  ;;  %s326_s22 = int_to_ptr.vmem [resolvable:$true] %s325_s22 }
  0x13   : > { %2062 = dma.hbm_to_vmem [thread:$0]  (!%p2407_p5), %s296_s15, 1024, %s298_s19, [#allocation5], %s2323_s26, %s2323_s26, %s2324_s27  }
  0x14   : > { %s337_s28 = sshll.u32 %s2724_s7, 4  ;;  %s2328_s25 = smov [#allocation10]   ;;  %s338_s28 = int_to_ptr.hbm [resolvable:$true] %s337_s28 }
  0x15   : > { %2068 = dma.hbm_to_vmem [thread:$0]  (!%p2407_p5), %s324_s21, 1024, %s326_s22, [#allocation8], %s2323_s26, %s2323_s26, %s2324_s27  }
  0x16   : > { %s339_s29 = sshll.u32 %s2328_s25, 4  ;;  %368 = sbr.rel (%p2396_p3) target bundleno = 1418 (0x58a), region = 56  ;;  %s340_s29 = int_to_ptr.vmem [resolvable:$true] %s339_s29 }
  0x17   : > { %2071 = dma.hbm_to_vmem [thread:$0]  (!%p2407_p5), %s338_s28, 1024, %s340_s29, [#allocation11], %s2323_s26, %s2323_s26, %s2324_s27  }
  0x1b   : > { %2302 = dma.done.wait (%p2072_p2), [#allocation3], 1024  }
  0x1c   : > { %2304 = vsyncadd (%p2072_p2), [#allocation3], 4294966272 }
  0x1d   : > { %2306 = dma.done.wait (%p2072_p2), [#allocation5], 2048  }
  0x1e   : > { %2308 = vsyncadd (%p2072_p2), [#allocation5], 4294965248 }
  0x1f   : > { %2310 = dma.done.wait (%p2072_p2), [#allocation8], 2048  }
  0x20   : > { %2312 = vsyncadd (%p2072_p2), [#allocation8], 4294965248 }
  0x21   : > { %2314 = dma.done.wait (%p2072_p2), [#allocation11], 1024  }
  0x22   : > { %2316 = vsyncadd (%p2072_p2), [#allocation11], 4294966272  ;;  %p431_p6 = scmp.lt.s32.totalorder %s2388_s10, 1  ;;  %v1984_v2 = vld [vmem:[#allocation2 + $0x18] sm:$0xff]  ;;  %v1983_v5 = vld [vmem:[#allocation2 + $0x10] sm:$0xff]  ;;  %v2329_v11 = vmov 128.0  }
  0x23   : > { %v1988_v3 = vld [vmem:[#allocation2 + $0x38] sm:$0xff]  ;;  %517 = vmatpush.bf16.xpose.msra.mxu0 %v1984_v2  ;;  %v1987_v6 = vld [vmem:[#allocation2 + $0x30] sm:$0xff]  ;;  %v1982_v8 = vld [vmem:[#allocation2 + $0x8] sm:$0xff]  ;;  %2104 = vrcp.f32 %v2329_v11  ;;  %vm842_vm4 = vcmask 1043456   ;;  %vm817_vm5 = vcmask 64512   ;;  %vm1204_vm6 = vcmask 523264  }
  0x24   : > { %s2732_s10 = smov (!%p431_p6, %s2388_s10), 1  ;;  %v1992_v4 = vld [vmem:[#allocation4 + $0x18] sm:$0xff]  ;;  %554 = vmatpush.bf16.xpose.msra.mxu1 %v1988_v3  ;;  %v1991_v7 = vld [vmem:[#allocation4 + $0x10] sm:$0xff]  ;;  %v1986_v9 = vld [vmem:[#allocation2 + $0x28] sm:$0xff]  ;;  %s2331_s21 = smov 64  }
  0x25   : > { %s1751_s14 = sshll.u32 %s2732_s10, 3  ;;  %607 = vmatpush.bf16.xpose.msra.mxu3 %v1992_v4  ;;  %v1990_v10 = vld [vmem:[#allocation4 + $0x8] sm:$0xff]  ;;  %v1981_v12 = vld [vmem:[#allocation2] sm:$0xff]  ;;  %v1996_v15 = vld [vmem:[#allocation4 + $0x38] sm:$0xff]  ;;  %s437_s18 = scalar_lea.vmem %s2725_s8, %s2732_s10 }
  0x26   : > { %s2463_s27 = scalar_lea.vmem %s2717_s0, %s1751_s14  ;;  %v1985_v13 = vld [vmem:[#allocation2 + $0x20] sm:$0xff]  ;;  %v2000_v16 = vld [vmem:[#allocation6 + $0x18] sm:$0xff]  ;;  %v1995_v21 = vld [vmem:[#allocation4 + $0x30] sm:$0xff]  ;;  %s441_s17 = scalar_lea.vmem %s2726_s9, %s1751_s14 }
  0x27   : > { %v2466_v0 = vld [vmem:[%s2463_s27] sm:$0xff]  ;;  %v2004_v17 = vld [vmem:[#allocation6 + $0x38] sm:$0xff]  ;;  %v1999_v22 = vld [vmem:[#allocation6 + $0x10] sm:$0xff] }
  0x28   : > { %v445_v1 = vmul.f32 %v2466_v0, %v2466_v0  ;;  %v1989_v14 = vld [vmem:[#allocation4] sm:$0xff]  ;;  %v2003_v23 = vld [vmem:[#allocation6 + $0x30] sm:$0xff]  ;;  %v1994_v26 = vld [vmem:[#allocation4 + $0x28] sm:$0xff] }
  0x29   : > { %v2105_v18 = vpop.eup %2104  ;;  %v1998_v27 = vld [vmem:[#allocation6 + $0x8] sm:$0xff]  ;;  %v1993_v32 = vld [vmem:[#allocation4 + $0x20] sm:$0xff] }
  0x2a   : > { %446 = vadd.xlane.f32.xlu0 %v445_v1  ;;  %v449_v19 = vmul.f32 128.0, %v2105_v18  ;;  %vm453_vm0 = vweird.f32 %v2105_v18  ;;  %v2002_v28 = vld [vmem:[#allocation6 + $0x28] sm:$0xff]  ;;  %v1997_v33 = vld [vmem:[#allocation6] sm:$0xff] }
  0x2b   : > { %518 = vmatpush.bf16.xpose.msra.mxu0 %v1983_v5  ;;  %v2001_v34 = vld [vmem:[#allocation6 + $0x20] sm:$0xff]  ;;  %v2006_v3 = vld [vmem:[#allocation7 + $0x8] sm:$0xff]  ;;  %v2007_v5 = vld [vmem:[#allocation7 + $0x10] sm:$0xff] }
  0x2c   : > { %555 = vmatpush.bf16.xpose.msra.mxu1 %v1987_v6  ;;  %v450_v20 = vsub.f32 1.0, %v449_v19  ;;  %v2103_v39 = vld [vmem:[%s2718_s1] ss:$0 sm:$0xff]  ;;  %v2008_v6 = vld [vmem:[#allocation7 + $0x18] sm:$0xff] }
  0x2d   : > { %608 = vmatpush.bf16.xpose.msra.mxu3 %v1991_v7  ;;  %v459_v42 = vmul.f32 %v2103_v39, %v2466_v0  ;;  %v2005_v54 = vld [vmem:[#allocation7] sm:$0xff] }
  0x2e   : > { %v451_v24 = vmul.f32 %v2105_v18, %v450_v20  ;;  %v2009_v7 = vld [vmem:[#allocation7 + $0x20] sm:$0xff] }
  0x30   : > { %v452_v25 = vadd.f32 %v2105_v18, %v451_v24 }
  0x32   : > { %v454_v29 = vsel %vm453_vm0, %v2105_v18, %v452_v25 }
  0x33   : > { %519 = vmatpush.bf16.xpose.msra.mxu0 %v1982_v8  ;;  %v2010_v8 = vld [vmem:[#allocation7 + $0x28] sm:$0xff] }
  0x34   : > { %556 = vmatpush.bf16.xpose.msra.mxu1 %v1986_v9  ;;  %v2011_v9 = vld [vmem:[#allocation7 + $0x30] sm:$0xff] }
  0x35   : > { %609 = vmatpush.bf16.xpose.msra.mxu3 %v1990_v10  ;;  %v2012_v10 = vld [vmem:[#allocation7 + $0x38] sm:$0xff] }
  0x3b   : > { %520 = vmatpush.bf16.xpose.msra.mxu0 %v1981_v12 }
  0x3c   : > { %557 = vmatpush.bf16.xpose.msra.mxu1 %v1985_v13 }
  0x3d   : > { %610 = vmatpush.bf16.xpose.msra.mxu3 %v1989_v14 }
  0x43   : > { %697 = vmatpush.bf16.xpose.msrb.mxu0 %v2000_v16 }
  0x44   : > { %734 = vmatpush.bf16.xpose.msrb.mxu1 %v2004_v17 }
  0x45   : > { %644 = vmatpush.bf16.xpose.msrb.mxu3 %v1996_v15 }
  0x4b   : > { %698 = vmatpush.bf16.xpose.msrb.mxu0 %v1999_v22 }
  0x4c   : > { %735 = vmatpush.bf16.xpose.msrb.mxu1 %v2003_v23 }
  0x4d   : > { %645 = vmatpush.bf16.xpose.msrb.mxu3 %v1995_v21 }
  0x53   : > { %699 = vmatpush.bf16.xpose.msrb.mxu0 %v1998_v27 }
  0x54   : > { %736 = vmatpush.bf16.xpose.msrb.mxu1 %v2002_v28 }
  0x55   : > { %646 = vmatpush.bf16.xpose.msrb.mxu3 %v1994_v26 }
  0x5b   : > { %700 = vmatpush.bf16.xpose.msrb.mxu0 %v1997_v33 }
  0x5c   : > { %737 = vmatpush.bf16.xpose.msrb.mxu1 %v2001_v34 }
  0x5d   : > { %647 = vmatpush.bf16.xpose.msrb.mxu3 %v1993_v32 }
  0x9d   : > { %v447_v30 = vpop.xlane.xlu0 %446 }
  0x9e   : > { %v455_v31 = vmul.f32 %v454_v29, %v447_v30 }
  0xa0   : > { %v460_v35 = vadd.f32 1e-06, %v455_v31 }
  0xa2   : > { %2106 = vrsqrt.f32 %v460_v35  ;;  %vm467_vm2 = vweird.f32 %v460_v35 }
  0xa8   : > { %v2107_v36 = vpop.eup %2106 }
  0xa9   : > { %v462_v37 = vmul.f32 %v2107_v36, %v460_v35  ;;  %vm468_vm1 = vweird.f32 %v2107_v36 }
  0xaa   : > { %vm469_vm3 = vmor %vm467_vm2, %vm468_vm1 }
  0xab   : > { %v463_v38 = vmul.f32 %v2107_v36, %v462_v37 }
  0xad   : > { %v464_v40 = vmul.f32 0.5, %v463_v38 }
  0xaf   : > { %v465_v41 = vsub.f32 1.5, %v464_v40 }
  0xb1   : > { %v466_v43 = vmul.f32 %v2107_v36, %v465_v41 }
  0xb3   : > { %v470_v44 = vsel %vm469_vm3, %v2107_v36, %v466_v43 }
  0xb4   : > { %v471_v45 = vmul.f32 %v470_v44, %v459_v42 }
  0xb6   : > { %v472_v46 = vpack.c.bf16 %v471_v45, %v471_v45 }
  0xb8   : > { %521 = vmatmul.bf16.vlgmr.msra.gmra.mxu0 %v472_v46  ;;  %558 = vmatmul.bf16.vlgmr.msra.gmra.mxu1 %v472_v46 }
  0xb9   : > { %611 = vmatmul.bf16.vlgmr.msra.gmra.mxu3 %v472_v46 }
  0xc8   : > { %701 = vmatmul.bf16.vlgmr.msrb.gmra.mxu0 %v472_v46  ;;  %738 = vmatmul.bf16.vlgmr.msrb.gmra.mxu1 %v472_v46 }
  0xc9   : > { %648 = vmatmul.bf16.vlgmr.msrb.gmra.mxu3 %v472_v46 }
 0x135   : > { %v2474_v47 = vpop.f32.mrf.mxu0  ;;  %v2476_v48 = vpop.f32.mrf.mxu1 }
 0x13c   : > { %v612_v49 = vpop.f32.mrf.mxu3 }
 0x13d   : > { %v775_v50 = vpack.c.bf16 %v612_v49, %v612_v49  ;;  %v524_v51 = vpop.f32.mrf.mxu0  ;;  %v561_v52 = vpop.f32.mrf.mxu1 }
 0x13f   : > { %v844_v53 = vsel %vm842_vm4, %v775_v50, 0 }
 0x140   : > { %853 = vmatpush.bf16.msra.mxu2 %v844_v53 }
 0x143   : > { %1881 = vmatmul.msk.bf16.vlgmr.msra.gmra.mxu2 %vm817_vm5, %v2005_v54 }
 0x144   : > { %v614_v55 = vpop.f32.mrf.mxu3 }
 0x145   : > { %v702_v56 = vpop.f32.mrf.mxu0  ;;  %v739_v57 = vpop.f32.mrf.mxu1 }
 0x146   : > { %v947_v58 = vpack.c.bf16 %v702_v56, %v702_v56  ;;  %v948_v59 = vpack.c.bf16 %v739_v57, %v739_v57 }
 0x148   : > { %v1014_v60 = vsel %vm842_vm4, %v947_v58, 0  ;;  %v1066_v61 = vsel %vm842_vm4, %v948_v59, 0 }
 0x149   : > { %1023 = vmatpush.bf16.msra.mxu0 %v1014_v60  ;;  %1075 = vmatpush.bf16.msra.mxu1 %v1066_v61 }
 0x14c   : > { %v649_v62 = vpop.f32.mrf.mxu3 }
 0x14d   : > { %v776_v63 = vpack.c.bf16 %v649_v62, %v649_v62  ;;  %v704_v0 = vpop.f32.mrf.mxu0  ;;  %v741_v1 = vpop.f32.mrf.mxu1 }
 0x14f   : > { %v896_v2 = vsel %vm842_vm4, %v776_v63, 0 }
 0x150   : > { %905 = vmatpush.bf16.msra.mxu3 %v896_v2 }
 0x153   : > { %1882 = vmatmul.msk.bf16.gmra.mxu2 %vm817_vm5, %v2006_v3  ;;  %1889 = vmatmul.msk.bf16.vlgmr.msra.gmra.mxu3 %vm817_vm5, %v2005_v54 }
 0x154   : > { %v651_v4 = vpop.f32.mrf.mxu3 }
 0x163   : > { %1883 = vmatmul.msk.bf16.gmra.mxu2 %vm817_vm5, %v2007_v5  ;;  %1890 = vmatmul.msk.bf16.gmra.mxu3 %vm817_vm5, %v2006_v3 }
 0x173   : > { %1884 = vmatmul.msk.bf16.gmra.mxu2 %vm817_vm5, %v2008_v6  ;;  %1891 = vmatmul.msk.bf16.gmra.mxu3 %vm817_vm5, %v2007_v5 }
 0x183   : > { %1885 = vmatmul.msk.bf16.gmra.mxu2 %vm817_vm5, %v2009_v7  ;;  %1892 = vmatmul.msk.bf16.gmra.mxu3 %vm817_vm5, %v2008_v6 }
 0x193   : > { %1886 = vmatmul.msk.bf16.gmra.mxu2 %vm817_vm5, %v2010_v8  ;;  %1893 = vmatmul.msk.bf16.gmra.mxu3 %vm817_vm5, %v2009_v7 }
 0x1a3   : > { %1887 = vmatmul.msk.bf16.gmra.mxu2 %vm817_vm5, %v2011_v9  ;;  %1894 = vmatmul.msk.bf16.gmra.mxu3 %vm817_vm5, %v2010_v8 }
 0x1b3   : > { %1888 = vmatmul.msk.bf16.gmra.mxu2 %vm817_vm5, %v2012_v10  ;;  %1895 = vmatmul.msk.bf16.gmra.mxu3 %vm817_vm5, %v2011_v9 }
 0x1c3   : > { %1896 = vmatmul.msk.bf16.gmra.mxu3 %vm817_vm5, %v2012_v10 }
 0x1c6   : > { %v855_v11 = vpop.f32.mrf.mxu2 }
 0x1c7   : > { %v1132_v43 = vpack.c.bf16 %v855_v11, %v855_v11 }
 0x1c9   : > { %v2520_v52 = vunpack.c.l.b16 %v1132_v43 }
 0x1ce   : > { %v857_v12 = vpop.f32.mrf.mxu2 }
 0x1cf   : > { %v1133_v44 = vpack.c.bf16 %v857_v12, %v857_v12 }
 0x1d1   : > { %v2522_v53 = vunpack.c.l.b16 %v1133_v44 }
 0x1d3   : > { %v1196_v57 = vpack.c.b16 %v2522_v53, %v2520_v52 }
 0x1d6   : > { %v860_v13 = vpop.f32.mrf.mxu2  ;;  %v907_v14 = vpop.f32.mrf.mxu3 }
 0x1d7   : > { %v1148_v15 = vpack.c.bf16 %v907_v14, %v907_v14  ;;  %v1134_v59 = vpack.c.bf16 %v860_v13, %v860_v13 }
 0x1d9   : > { %v2498_v19 = vunpack.c.l.b16 %v1148_v15  ;;  %v2532_v2 = vunpack.c.l.b16 %v1134_v59 }
 0x1de   : > { %v862_v16 = vpop.f32.mrf.mxu2  ;;  %v909_v17 = vpop.f32.mrf.mxu3 }
 0x1df   : > { %v1149_v18 = vpack.c.bf16 %v909_v17, %v909_v17  ;;  %v1135_v60 = vpack.c.bf16 %v862_v16, %v862_v16 }
 0x1e1   : > { %v2500_v20 = vunpack.c.l.b16 %v1149_v18  ;;  %v2534_v3 = vunpack.c.l.b16 %v1135_v60  ;;  %v2013_v18 = vld [vmem:[#allocation9] sm:$0xff] }
 0x1e2   : > { %1937 = vmatmul.msk.bf16.vlgmr.msra.gmra.mxu1 %vm817_vm5, %v2013_v18  ;;  %1929 = vmatmul.msk.bf16.vlgmr.msra.gmra.mxu0 %vm817_vm5, %v2013_v18 }
 0x1e3   : > { %v1277_v21 = vpack.c.b16 %v2500_v20, %v2498_v19  ;;  %v1197_v7 = vpack.c.b16 %v2534_v3, %v2532_v2 }
 0x1e6   : > { %v865_v22 = vpop.f32.mrf.mxu2  ;;  %v912_v23 = vpop.f32.mrf.mxu3 }
 0x1e7   : > { %v1150_v24 = vpack.c.bf16 %v912_v23, %v912_v23  ;;  %v1136_v8 = vpack.c.bf16 %v865_v22, %v865_v22 }
 0x1e9   : > { %v2504_v28 = vunpack.c.l.b16 %v1150_v24  ;;  %v2544_v14 = vunpack.c.l.b16 %v1136_v8 }
 0x1ee   : > { %v867_v25 = vpop.f32.mrf.mxu2  ;;  %v914_v26 = vpop.f32.mrf.mxu3 }
 0x1ef   : > { %v1151_v27 = vpack.c.bf16 %v914_v26, %v914_v26  ;;  %v1137_v9 = vpack.c.bf16 %v867_v25, %v867_v25 }
 0x1f1   : > { %v2506_v29 = vunpack.c.l.b16 %v1151_v27  ;;  %v2546_v15 = vunpack.c.l.b16 %v1137_v9 }
 0x1f3   : > { %v1278_v30 = vpack.c.b16 %v2506_v29, %v2504_v28  ;;  %v1198_v27 = vpack.c.b16 %v2546_v15, %v2544_v14  ;;  %v2020_v28 = vld [vmem:[#allocation9 + $0x38] sm:$0xff] }
 0x1f5   : > { %v1292_v52 = vsel %vm1204_vm6, %v1278_v30, 0 }
 0x1f6   : > { %v870_v31 = vpop.f32.mrf.mxu2  ;;  %v917_v32 = vpop.f32.mrf.mxu3 }
 0x1f7   : > { %v1152_v33 = vpack.c.bf16 %v917_v32, %v917_v32  ;;  %v1138_v23 = vpack.c.bf16 %v870_v31, %v870_v31 }
 0x1f9   : > { %v2510_v37 = vunpack.c.l.b16 %v1152_v33  ;;  %v1186_v32 = vunpack.c.l.b16 %v1138_v23 }
 0x1fe   : > { %v872_v34 = vpop.f32.mrf.mxu2  ;;  %v919_v35 = vpop.f32.mrf.mxu3 }
 0x1ff   : > { %v1153_v36 = vpack.c.bf16 %v919_v35, %v919_v35  ;;  %v1139_v24 = vpack.c.bf16 %v872_v34, %v872_v34 }
 0x201   : > { %v2512_v38 = vunpack.c.l.b16 %v1153_v36  ;;  %v1187_v33 = vunpack.c.l.b16 %v1139_v24  ;;  %v2015_v24 = vld [vmem:[#allocation9 + $0x10] sm:$0xff] }
 0x203   : > { %v1279_v39 = vpack.c.b16 %v2512_v38, %v2510_v37  ;;  %v1289_v37 = vsel %vm1204_vm6, %v1277_v21, 0  ;;  %v2019_v38 = vld [vmem:[#allocation9 + $0x30] sm:$0xff] }
 0x206   : > { %v875_v40 = vpop.f32.mrf.mxu2  ;;  %v922_v41 = vpop.f32.mrf.mxu3 }
 0x207   : > { %v1154_v42 = vpack.c.bf16 %v922_v41, %v922_v41  ;;  %v1140_v10 = vpack.c.bf16 %v875_v40, %v875_v40  ;;  %v1199_v41 = vpack.c.b16 %v1187_v33, %v1186_v32 }
 0x209   : > { %v2516_v50 = vunpack.c.l.b16 %v1154_v42  ;;  %v1188_v16 = vunpack.c.l.b16 %v1140_v10 }
 0x20e   : > { %v877_v45 = vpop.f32.mrf.mxu2  ;;  %v924_v46 = vpop.f32.mrf.mxu3 }
 0x20f   : > { %v1155_v49 = vpack.c.bf16 %v924_v46, %v924_v46  ;;  %v1141_v11 = vpack.c.bf16 %v877_v45, %v877_v45 }
 0x211   : > { %v2518_v51 = vunpack.c.l.b16 %v1155_v49  ;;  %v1189_v17 = vunpack.c.l.b16 %v1141_v11  ;;  %v2014_v49 = vld [vmem:[#allocation9 + $0x8] sm:$0xff] }
 0x212   : > { %1938 = vmatmul.msk.bf16.gmra.mxu1 %vm817_vm5, %v2014_v49  ;;  %1930 = vmatmul.msk.bf16.gmra.mxu0 %vm817_vm5, %v2014_v49  ;;  %v2016_v49 = vld [vmem:[#allocation9 + $0x18] sm:$0xff] }
 0x213   : > { %v1280_v54 = vpack.c.b16 %v2518_v51, %v2516_v50  ;;  %v1200_v26 = vpack.c.b16 %v1189_v17, %v1188_v16  ;;  %v2018_v50 = vld [vmem:[#allocation9 + $0x28] sm:$0xff]  ;;  %v1130_v51 = vpack.c.bf16 %v2474_v47, %v2474_v47  ;;  %v1131_v47 = vpack.c.bf16 %v2476_v48, %v2476_v48 }
 0x215   : > { %v1298_v14 = vsel %vm1204_vm6, %v1280_v54, 0 }
 0x216   : > { %v880_v55 = vpop.f32.mrf.mxu2  ;;  %v927_v56 = vpop.f32.mrf.mxu3 }
 0x217   : > { %v1156_v58 = vpack.c.bf16 %v927_v56, %v927_v56  ;;  %v1142_v60 = vpack.c.bf16 %v880_v55, %v880_v55 }
 0x219   : > { %v2528_v0 = vunpack.c.l.b16 %v1156_v58 }
 0x21e   : > { %v882_v61 = vpop.f32.mrf.mxu2  ;;  %v929_v62 = vpop.f32.mrf.mxu3 }
 0x21f   : > { %v1157_v63 = vpack.c.bf16 %v929_v62, %v929_v62  ;;  %v1143_v62 = vpack.c.bf16 %v882_v61, %v882_v61 }
 0x221   : > { %v2530_v1 = vunpack.c.l.b16 %v1157_v63  ;;  %v1191_v8 = vunpack.c.l.b16 %v1143_v62 }
 0x222   : > { %1939 = vmatmul.msk.bf16.gmra.mxu1 %vm817_vm5, %v2015_v24  ;;  %1931 = vmatmul.msk.bf16.gmra.mxu0 %vm817_vm5, %v2015_v24  ;;  %v2330_v24 = vmov 0  }
 0x223   : > { %v1281_v4 = vpack.c.b16 %v2530_v1, %v2528_v0  ;;  %v1209_v0 = vsel %vm1204_vm6, %v1196_v57, 0  ;;  %v1295_v1 = vsel %vm1204_vm6, %v1279_v39, 0 }
 0x226   : > { %v885_v5 = vpop.f32.mrf.mxu2  ;;  %v2538_v6 = vpop.f32.mrf.mxu3 }
 0x227   : > { %v1144_v42 = vpack.c.bf16 %v885_v5, %v885_v5  ;;  %v1190_v5 = vunpack.c.l.b16 %v1142_v60 }
 0x229   : > { %v1192_v31 = vunpack.c.l.b16 %v1144_v42  ;;  %v1201_v16 = vpack.c.b16 %v1191_v8, %v1190_v5  ;;  %v1221_v42 = vsel %vm1204_vm6, %v1200_v26, 0  ;;  %v2017_v26 = vld [vmem:[#allocation9 + $0x20] sm:$0xff] }
 0x22b   : > { %v1224_v33 = vsel %vm1204_vm6, %v1201_v16, 0 }
 0x22e   : > { %v887_v12 = vpop.f32.mrf.mxu2  ;;  %v2542_v13 = vpop.f32.mrf.mxu3 }
 0x22f   : > { %v1145_v43 = vpack.c.bf16 %v887_v12, %v887_v12 }
 0x231   : > { %v1193_v34 = vunpack.c.l.b16 %v1145_v43 }
 0x232   : > { %1940 = vmatmul.msk.bf16.gmra.mxu1 %vm817_vm5, %v2016_v49  ;;  %1932 = vmatmul.msk.bf16.gmra.mxu0 %vm817_vm5, %v2016_v49 }
 0x233   : > { %v1202_v63 = vpack.c.b16 %v1193_v34, %v1192_v31  ;;  %v1218_v31 = vsel %vm1204_vm6, %v1199_v41, 0  ;;  %v1212_v41 = vsel %vm1204_vm6, %v1197_v7, 0 }
 0x235   : > { %v1227_v9 = vsel %vm1204_vm6, %v1202_v63, 0 }
 0x236   : > { %v890_v22 = vpop.f32.mrf.mxu2  ;;  %v937_v25 = vpop.f32.mrf.mxu3 }
 0x237   : > { %v1146_v35 = vpack.c.bf16 %v890_v22, %v890_v22  ;;  %v1160_v22 = vpack.c.bf16 %v937_v25, %v937_v25  ;;  %v1158_v25 = vpack.c.bf16 %v2538_v6, %v2538_v6  ;;  %v1215_v6 = vsel %vm1204_vm6, %v1198_v27, 0 }
 0x239   : > { %v1194_v44 = vunpack.c.l.b16 %v1146_v35  ;;  %v1273_v35 = vunpack.c.l.b16 %v1160_v22 }
 0x23e   : > { %v892_v36 = vpop.f32.mrf.mxu2  ;;  %v939_v40 = vpop.f32.mrf.mxu3 }
 0x23f   : > { %v1147_v45 = vpack.c.bf16 %v892_v36, %v892_v36  ;;  %v1161_v17 = vpack.c.bf16 %v939_v40, %v939_v40  ;;  %v1159_v36 = vpack.c.bf16 %v2542_v13, %v2542_v13  ;;  %v1301_v13 = vsel %vm1204_vm6, %v1281_v4, 0 }
 0x241   : > { %v1195_v46 = vunpack.c.l.b16 %v1147_v45  ;;  %v1274_v55 = vunpack.c.l.b16 %v1161_v17  ;;  %v1272_v43 = vunpack.c.l.b16 %v1159_v36  ;;  %v1271_v45 = vunpack.c.l.b16 %v1158_v25  ;;  %v1122_v17 = vld [vmem:[%s437_s18] sm:$0x1] }
 0x242   : > { %1941 = vmatmul.msk.bf16.gmra.mxu1 %vm817_vm5, %v2017_v26  ;;  %1933 = vmatmul.msk.bf16.gmra.mxu0 %vm817_vm5, %v2017_v26  ;;  %vm1123_vm7 = vcmp.gt.f32.partialorder %v1122_v17, 0.5 }
 0x243   : > { %v1203_v56 = vpack.c.b16 %v1195_v46, %v1194_v44  ;;  %v1283_v40 = vpack.c.b16 %v1274_v55, %v1273_v35  ;;  %v1282_v46 = vpack.c.b16 %v1272_v43, %v1271_v45  ;;  %v1124_v22 = vsel %vm1123_vm7, 1, %v2330_v24 }
 0x244   : > { %v1125_v55 = vperm.slane %v1124_v22, 0 }
 0x245   : > { %v1230_v58 = vsel %vm1204_vm6, %v1203_v56, 0  ;;  %v1307_v44 = vsel %vm1204_vm6, %v1283_v40, 0  ;;  %v1304_v34 = vsel %vm1204_vm6, %v1282_v46, 0 }
 0x246   : > { %v942_v59 = vpop.f32.mrf.mxu3  ;;  %1232 = vmatpush.bf16.xpose.msrb.mxu2 %v1230_v58  ;;  %vm1126_vm9 = vcmp.eq.s32.totalorder %v1125_v55, 1 }
 0x247   : > { %v1162_v10 = vpack.c.bf16 %v942_v59, %v942_v59 }
 0x249   : > { %v1275_v18 = vunpack.c.l.b16 %v1162_v10 }
 0x24e   : > { %v944_v11 = vpop.f32.mrf.mxu3  ;;  %1233 = vmatpush.bf16.xpose.msrb.mxu2 %v1227_v9 }
 0x24f   : > { %v1163_v12 = vpack.c.bf16 %v944_v11, %v944_v11 }
 0x251   : > { %v1276_v23 = vunpack.c.l.b16 %v1163_v12 }
 0x252   : > { %1942 = vmatmul.msk.bf16.gmra.mxu1 %vm817_vm5, %v2018_v50  ;;  %1934 = vmatmul.msk.bf16.gmra.mxu0 %vm817_vm5, %v2018_v50 }
 0x253   : > { %v1284_v32 = vpack.c.b16 %v1276_v23, %v1275_v18  ;;  %v1117_v23 = vlaneseq }
 0x255   : > { %v1310_v61 = vsel %vm1204_vm6, %v1284_v32, 0  ;;  %v1118_v32 = vshrl.u32 %v1117_v23, 7 }
 0x256   : > { %1234 = vmatpush.bf16.xpose.msrb.mxu2 %v1224_v33  ;;  %1312 = vmatpush.bf16.xpose.msrb.mxu3 %v1310_v61  ;;  %v1120_v33 = vand.u32 127, %v1117_v23 }
 0x258   : > { %vm1121_vm8 = vcmp.le.s32.totalorder %v1120_v33, %v1118_v32 }
 0x259   : > { %vm2648_vm10 = vmand %vm1121_vm8, %vm1126_vm9 }
 0x25e   : > { %1235 = vmatpush.bf16.xpose.msrb.mxu2 %v1221_v42  ;;  %1313 = vmatpush.bf16.xpose.msrb.mxu3 %v1307_v44 }
 0x25f   : > { %v1077_v29 = vpop.f32.mrf.mxu1  ;;  %v1025_v61 = vpop.f32.mrf.mxu0 }
 0x260   : > { %v1389_v19 = vpack.c.bf16 %v1077_v29, %v1077_v29  ;;  %v1373_v36 = vpack.c.bf16 %v1025_v61, %v1025_v61 }
 0x262   : > { %1943 = vmatmul.msk.bf16.gmra.mxu1 %vm817_vm5, %v2019_v38  ;;  %1935 = vmatmul.msk.bf16.gmra.mxu0 %vm817_vm5, %v2019_v38  ;;  %v2616_v21 = vunpack.c.l.b16 %v1389_v19  ;;  %v2656_v44 = vunpack.c.l.b16 %v1373_v36 }
 0x266   : > { %1236 = vmatpush.bf16.xpose.msrb.mxu2 %v1218_v31  ;;  %1314 = vmatpush.bf16.xpose.msrb.mxu3 %v1304_v34 }
 0x267   : > { %v1079_v20 = vpop.f32.mrf.mxu1  ;;  %v1027_v42 = vpop.f32.mrf.mxu0 }
 0x268   : > { %v1390_v30 = vpack.c.bf16 %v1079_v20, %v1079_v20  ;;  %v1374_v45 = vpack.c.bf16 %v1027_v42, %v1027_v42 }
 0x26a   : > { %v2618_v39 = vunpack.c.l.b16 %v1390_v30  ;;  %v2659_v49 = vunpack.c.l.b16 %v1374_v45 }
 0x26c   : > { %v1498_v48 = vpack.c.b16 %v2618_v39, %v2616_v21  ;;  %v1437_v31 = vpack.c.b16 %v2659_v49, %v2656_v44 }
 0x26e   : > { %1237 = vmatpush.bf16.xpose.msrb.mxu2 %v1215_v6  ;;  %1315 = vmatpush.bf16.xpose.msrb.mxu3 %v1301_v13 }
 0x272   : > { %1944 = vmatmul.msk.bf16.gmra.mxu1 %vm817_vm5, %v2020_v28  ;;  %1936 = vmatmul.msk.bf16.gmra.mxu0 %vm817_vm5, %v2020_v28 }
 0x276   : > { %1238 = vmatpush.bf16.xpose.msrb.mxu2 %v1212_v41  ;;  %1316 = vmatpush.bf16.xpose.msrb.mxu3 %v1298_v14 }
 0x27e   : > { %1239 = vmatpush.bf16.xpose.msrb.mxu2 %v1209_v0  ;;  %1317 = vmatpush.bf16.xpose.msrb.mxu3 %v1295_v1 }
 0x285   : > { %1945 = vmatmul.msk.bf16.vlgmr.msrb.gmra.mxu2 %vm1204_vm6, %v1130_v51 }
 0x286   : > { %1318 = vmatpush.bf16.xpose.msrb.mxu3 %v1292_v52 }
 0x28e   : > { %1319 = vmatpush.bf16.xpose.msrb.mxu3 %v1289_v37 }
 0x28f   : > { %v1082_v53 = vpop.f32.mrf.mxu1  ;;  %v1030_v6 = vpop.f32.mrf.mxu0 }
 0x290   : > { %v1391_v54 = vpack.c.bf16 %v1082_v53, %v1082_v53  ;;  %v1375_v26 = vpack.c.bf16 %v1030_v6, %v1030_v6 }
 0x292   : > { %v2622_v2 = vunpack.c.l.b16 %v1391_v54  ;;  %v2667_v1 = vunpack.c.l.b16 %v1375_v26 }
 0x295   : > { %1946 = vmatmul.msk.bf16.vlgmr.msrb.gmra.mxu3 %vm1204_vm6, %v1131_v47 }
 0x297   : > { %v1084_v57 = vpop.f32.mrf.mxu1  ;;  %v1032_v14 = vpop.f32.mrf.mxu0 }
 0x298   : > { %v1392_v3 = vpack.c.bf16 %v1084_v57, %v1084_v57  ;;  %v1376_v50 = vpack.c.bf16 %v1032_v14, %v1032_v14 }
 0x29a   : > { %v2624_v4 = vunpack.c.l.b16 %v1392_v3  ;;  %v2670_v52 = vunpack.c.l.b16 %v1376_v50 }
 0x29c   : > { %v1499_v7 = vpack.c.b16 %v2624_v4, %v2622_v2  ;;  %v1438_v37 = vpack.c.b16 %v2670_v52, %v2667_v1 }
 0x29f   : > { %v1087_v15 = vpop.f32.mrf.mxu1  ;;  %v1035_v47 = vpop.f32.mrf.mxu0 }
 0x2a0   : > { %v1393_v27 = vpack.c.bf16 %v1087_v15, %v1087_v15  ;;  %v1377_v29 = vpack.c.bf16 %v1035_v47, %v1035_v47 }
 0x2a2   : > { %v2628_v58 = vunpack.c.l.b16 %v1393_v27  ;;  %v2674_v54 = vunpack.c.l.b16 %v1377_v29 }
 0x2a7   : > { %v1089_v56 = vpop.f32.mrf.mxu1  ;;  %v1037_v20 = vpop.f32.mrf.mxu0 }
 0x2a8   : > { %v1394_v59 = vpack.c.bf16 %v1089_v56, %v1089_v56  ;;  %v1378_v57 = vpack.c.bf16 %v1037_v20, %v1037_v20 }
 0x2aa   : > { %v2630_v60 = vunpack.c.l.b16 %v1394_v59  ;;  %v2676_v56 = vunpack.c.l.b16 %v1378_v57 }
 0x2ac   : > { %v1500_v62 = vpack.c.b16 %v2630_v60, %v2628_v58  ;;  %v1439_v17 = vpack.c.b16 %v2676_v56, %v2674_v54 }
 0x2af   : > { %v1092_v63 = vpop.f32.mrf.mxu1  ;;  %v1040_v22 = vpop.f32.mrf.mxu0 }
 0x2b0   : > { %v1395_v5 = vpack.c.bf16 %v1092_v63, %v1092_v63 }
 0x2b2   : > { %v2634_v9 = vunpack.c.l.b16 %v1395_v5 }
 0x2b7   : > { %v1094_v8 = vpop.f32.mrf.mxu1  ;;  %v1042_v42 = vpop.f32.mrf.mxu0 }
 0x2b8   : > { %v1396_v10 = vpack.c.bf16 %v1094_v8, %v1094_v8 }
 0x2ba   : > { %v2636_v11 = vunpack.c.l.b16 %v1396_v10 }
 0x2bc   : > { %v1501_v12 = vpack.c.b16 %v2636_v11, %v2634_v9 }
 0x2bf   : > { %v2640_v16 = vpop.f32.mrf.mxu1 }
 0x2c0   : > { %v1397_v24 = vpack.c.bf16 %v2640_v16, %v2640_v16 }
 0x2c7   : > { %v2646_v18 = vpop.f32.mrf.mxu1 }
 0x2c8   : > { %v1398_v32 = vpack.c.bf16 %v2646_v18, %v2646_v18  ;;  %v1045_v18 = vpop.f32.mrf.mxu0 }
 0x2ca   : > { %v1491_v36 = vunpack.c.l.b16 %v1398_v32 }
 0x2cf   : > { %v1102_v35 = vpop.f32.mrf.mxu1 }
 0x2d0   : > { %v1399_v59 = vpack.c.bf16 %v1102_v35, %v1102_v35  ;;  %v1490_v35 = vunpack.c.l.b16 %v1397_v24 }
 0x2d2   : > { %v1492_v33 = vunpack.c.l.b16 %v1399_v59  ;;  %v1502_v45 = vpack.c.b16 %v1491_v36, %v1490_v35 }
 0x2d7   : > { %v1104_v46 = vpop.f32.mrf.mxu1 }
 0x2d8   : > { %v1400_v63 = vpack.c.bf16 %v1104_v46, %v1104_v46 }
 0x2da   : > { %v1493_v55 = vunpack.c.l.b16 %v1400_v63 }
 0x2dc   : > { %v1503_v40 = vpack.c.b16 %v1493_v55, %v1492_v33 }
 0x2df   : > { %v1107_v13 = vpop.f32.mrf.mxu1 }
 0x2e0   : > { %v1401_v30 = vpack.c.bf16 %v1107_v13, %v1107_v13  ;;  %v1047_v13 = vpop.f32.mrf.mxu0 }
 0x2e1   : > { %v1382_v20 = vpack.c.bf16 %v1047_v13, %v1047_v13  ;;  %v2026_v13 = vld [vmem:[#allocation10 + $0x28] sm:$0xff] }
 0x2e2   : > { %v1494_v5 = vunpack.c.l.b16 %v1401_v30 }
 0x2e7   : > { %v1109_v51 = vpop.f32.mrf.mxu1 }
 0x2e8   : > { %v1402_v53 = vpack.c.bf16 %v1109_v51, %v1109_v51  ;;  %v1050_v26 = vpop.f32.mrf.mxu0 }
 0x2ea   : > { %v1495_v8 = vunpack.c.l.b16 %v1402_v53 }
 0x2ec   : > { %v1504_v61 = vpack.c.b16 %v1495_v8, %v1494_v5 }
 0x2ef   : > { %v1112_v28 = vpop.f32.mrf.mxu1 }
 0x2f0   : > { %v1403_v19 = vpack.c.bf16 %v1112_v28, %v1112_v28 }
 0x2f2   : > { %v1496_v15 = vunpack.c.l.b16 %v1403_v19  ;;  %v1381_v19 = vpack.c.bf16 %v1045_v18, %v1045_v18 }
 0x2f4   : > { %v1429_v57 = vunpack.c.l.b16 %v1381_v19 }
 0x2f7   : > { %v1114_v3 = vpop.f32.mrf.mxu1 }
 0x2f8   : > { %v1404_v27 = vpack.c.bf16 %v1114_v3, %v1114_v3  ;;  %v1430_v3 = vunpack.c.l.b16 %v1382_v20 }
 0x2fa   : > { %v1497_v10 = vunpack.c.l.b16 %v1404_v27  ;;  %v1441_v5 = vpack.c.b16 %v1430_v3, %v1429_v57 }
 0x2fc   : > { %v1505_v23 = vpack.c.b16 %v1497_v10, %v1496_v15 }
 0x2fe   : > { %1514 = vmatpush.bf16.msrb.mxu1 %v1505_v23 }
 0x302   : > { %1515 = vmatpush.bf16.msrb.mxu1 %v1504_v61 }
 0x306   : > { %1516 = vmatpush.bf16.msrb.mxu1 %v1503_v40 }
 0x308   : > { %v1241_v25 = vpop.f32.mrf.mxu2 }
 0x309   : > { %v2654_v43 = vsel %vm2648_vm10, %v1241_v25, -1e+09  ;;  %v1379_v25 = vpack.c.bf16 %v1040_v22, %v1040_v22 }
 0x30a   : > { %1327 = vmax.xlane.f32.xlu1 %v2654_v43  ;;  %1517 = vmatpush.bf16.msrb.mxu1 %v1502_v45 }
 0x30b   : > { %v1427_v46 = vunpack.c.l.b16 %v1379_v25 }
 0x30e   : > { %1518 = vmatpush.bf16.msrb.mxu1 %v1501_v12 }
 0x310   : > { %v1243_v34 = vpop.f32.mrf.mxu2 }
 0x311   : > { %v1380_v34 = vpack.c.bf16 %v1042_v42, %v1042_v42 }
 0x312   : > { %1519 = vmatpush.bf16.msrb.mxu1 %v1500_v62 }
 0x313   : > { %v1428_v6 = vunpack.c.l.b16 %v1380_v34 }
 0x315   : > { %v1440_v16 = vpack.c.b16 %v1428_v6, %v1427_v46  ;;  %v2028_v6 = vld [vmem:[#allocation10 + $0x38] sm:$0xff] }
 0x316   : > { %1520 = vmatpush.bf16.msrb.mxu1 %v1499_v7  ;;  %1597 = vmatpush.bf16.xpose.msra.mxu2 %v2028_v6 }
 0x318   : > { %v1321_v41 = vpop.f32.mrf.mxu3 }
 0x319   : > { %v2665_v0 = vsel %vm2648_vm10, %v1321_v41, -1e+09  ;;  %v1052_v41 = vpop.f32.mrf.mxu0 }
 0x31a   : > { %1329 = vmax.xlane.f32.xlu0 %v2665_v0  ;;  %1521 = vmatpush.bf16.msrb.mxu1 %v1498_v48  ;;  %v1384_v21 = vpack.c.bf16 %v1052_v41, %v1052_v41  ;;  %v2025_v41 = vld [vmem:[#allocation10 + $0x20] sm:$0xff] }
 0x31c   : > { %v1432_v53 = vunpack.c.l.b16 %v1384_v21 }
 0x320   : > { %v1323_v38 = vpop.f32.mrf.mxu3 }
 0x321   : > { %v1055_v14 = vpop.f32.mrf.mxu0  ;;  %v1383_v38 = vpack.c.bf16 %v1050_v26, %v1050_v26 }
 0x322   : > { %v1385_v60 = vpack.c.bf16 %v1055_v14, %v1055_v14 }
 0x323   : > { %v1431_v30 = vunpack.c.l.b16 %v1383_v38 }
 0x324   : > { %v1433_v39 = vunpack.c.l.b16 %v1385_v60 }
 0x325   : > { %v1442_v15 = vpack.c.b16 %v1432_v53, %v1431_v30 }
 0x329   : > { %v1057_v50 = vpop.f32.mrf.mxu0 }
 0x32a   : > { %v1386_v62 = vpack.c.bf16 %v1057_v50, %v1057_v50  ;;  %v2024_v50 = vld [vmem:[#allocation10 + $0x18] sm:$0xff] }
 0x32c   : > { %v1434_v48 = vunpack.c.l.b16 %v1386_v62 }
 0x331   : > { %v1060_v9 = vpop.f32.mrf.mxu0 }
 0x332   : > { %v1387_v51 = vpack.c.bf16 %v1060_v9, %v1060_v9 }
 0x334   : > { %v1435_v4 = vunpack.c.l.b16 %v1387_v51  ;;  %v2021_v51 = vld [vmem:[#allocation10] sm:$0xff] }
 0x339   : > { %v1062_v2 = vpop.f32.mrf.mxu0 }
 0x33a   : > { %v1388_v7 = vpack.c.bf16 %v1062_v2, %v1062_v2 }
 0x33c   : > { %v1436_v47 = vunpack.c.l.b16 %v1388_v7 }
 0x33e   : > { %v1444_v28 = vpack.c.b16 %v1436_v47, %v1435_v4  ;;  %v2116_v4 = vld [vmem:[%s2463_s27] sm:$0xff] }
 0x340   : > { %1453 = vmatpush.bf16.msrb.mxu0 %v1444_v28 }
 0x37d   : > { %v1328_v11 = vpop.xlane.xlu1 %1327 }
 0x37e   : > { %v1331_v12 = vsub.f32 %v2654_v43, %v1328_v11  ;;  %v1443_v43 = vpack.c.b16 %v1434_v48, %v1433_v39  ;;  %v2023_v11 = vld [vmem:[#allocation10 + $0x10] sm:$0xff] }
 0x380   : > { %v1333_v58 = vmul.f32 1.442695, %v1331_v12  ;;  %1454 = vmatpush.bf16.msrb.mxu0 %v1443_v43  ;;  %v2022_v12 = vld [vmem:[#allocation10 + $0x8] sm:$0xff] }
 0x382   : > { %2108 = vpow2.f32 %v1333_v58 }
 0x384   : > { %1455 = vmatpush.bf16.msrb.mxu0 %v1442_v15 }
 0x388   : > { %v2109_v29 = vpop.eup %2108  ;;  %1456 = vmatpush.bf16.msrb.mxu0 %v1441_v5 }
 0x389   : > { %1337 = vadd.xlane.f32.xlu2 %v2109_v29 }
 0x38c   : > { %1457 = vmatpush.bf16.msrb.mxu0 %v1440_v16  ;;  %v2027_v16 = vld [vmem:[#allocation10 + $0x30] sm:$0xff] }
 0x38d   : > { %v1330_v27 = vpop.xlane.xlu0 %1329  ;;  %1598 = vmatpush.bf16.xpose.msra.mxu2 %v2027_v16 }
 0x38e   : > { %v1332_v59 = vsub.f32 %v2665_v0, %v1330_v27 }
 0x390   : > { %v1335_v63 = vmul.f32 1.442695, %v1332_v59  ;;  %1458 = vmatpush.bf16.msrb.mxu0 %v1439_v17 }
 0x392   : > { %2110 = vpow2.f32 %v1335_v63 }
 0x394   : > { %1459 = vmatpush.bf16.msrb.mxu0 %v1438_v37 }
 0x395   : > { %1599 = vmatpush.bf16.xpose.msra.mxu2 %v2026_v13 }
 0x398   : > { %v2111_v8 = vpop.eup %2110  ;;  %1460 = vmatpush.bf16.msrb.mxu0 %v1437_v31 }
 0x399   : > { %1339 = vadd.xlane.f32.xlu1 %v2111_v8 }
 0x39d   : > { %1600 = vmatpush.bf16.xpose.msra.mxu2 %v2025_v41 }
 0x3a5   : > { %1601 = vmatpush.bf16.xpose.msra.mxu2 %v2024_v50 }
 0x3ad   : > { %1602 = vmatpush.bf16.xpose.msra.mxu2 %v2023_v11 }
 0x3b5   : > { %1603 = vmatpush.bf16.xpose.msra.mxu2 %v2022_v12 }
 0x3bd   : > { %1604 = vmatpush.bf16.xpose.msra.mxu2 %v2021_v51 }
 0x3fc   : > { %v1338_v0 = vpop.xlane.xlu2 %1337 }
 0x3fd   : > { %2112 = vrcp.f32 %v1338_v0  ;;  %v1352_v32 = vand.u32 2147483648, %v1338_v0  ;;  %v1350_v33 = vand.u32 2147483647, %v1338_v0  ;;  %vm1346_vm12 = vweird.f32 %v1338_v0 }
 0x3ff   : > { %v1353_v54 = vor.u32 1.1754944e-38, %v1352_v32  ;;  %vm1351_vm14 = vcmp.eq.f32.partialorder %v1350_v33, 8.507059e+37 }
 0x403   : > { %v2113_v10 = vpop.eup %2112 }
 0x404   : > { %v1342_v23 = vmul.f32 %v2113_v10, %v1338_v0  ;;  %vm1347_vm11 = vweird.f32 %v2113_v10 }
 0x405   : > { %vm1348_vm13 = vmor %vm1346_vm12, %vm1347_vm11 }
 0x406   : > { %v1343_v24 = vsub.f32 1.0, %v1342_v23 }
 0x408   : > { %v1344_v22 = vmul.f32 %v2113_v10, %v1343_v24 }
 0x40a   : > { %v1345_v55 = vadd.f32 %v2113_v10, %v1344_v22 }
 0x40c   : > { %v1340_v56 = vpop.xlane.xlu1 %1339  ;;  %v1349_v1 = vsel %vm1348_vm13, %v2113_v10, %v1345_v55 }
 0x40d   : > { %2114 = vrcp.f32 %v1340_v56  ;;  %v1354_v52 = vsel %vm1351_vm14, %v1353_v54, %v1349_v1  ;;  %v1367_v61 = vand.u32 2147483648, %v1340_v56  ;;  %v1365_v36 = vand.u32 2147483647, %v1340_v56 }
 0x40e   : > { %v1355_v44 = vmul.f32 %v2109_v29, %v1354_v52  ;;  %vm1361_vm0 = vweird.f32 %v1340_v56 }
 0x40f   : > { %v1368_v25 = vor.u32 1.1754944e-38, %v1367_v61  ;;  %vm1366_vm2 = vcmp.eq.f32.partialorder %v1365_v36, 8.507059e+37 }
 0x410   : > { %v1371_v49 = vpack.c.bf16 %v1355_v44, %v1355_v44 }
 0x412   : > { %1461 = vmatmul.bf16.vlgmr.msrb.gmra.mxu0 %v1371_v49 }
 0x413   : > { %v2115_v31 = vpop.eup %2114 }
 0x414   : > { %v1357_v37 = vmul.f32 %v2115_v31, %v1340_v56  ;;  %vm1362_vm15 = vweird.f32 %v2115_v31 }
 0x415   : > { %vm1363_vm1 = vmor %vm1361_vm0, %vm1362_vm15 }
 0x416   : > { %v1358_v17 = vsub.f32 1.0, %v1357_v37 }
 0x418   : > { %v1359_v35 = vmul.f32 %v2115_v31, %v1358_v17 }
 0x41a   : > { %v1360_v40 = vadd.f32 %v2115_v31, %v1359_v35 }
 0x41c   : > { %v1364_v42 = vsel %vm1363_vm1, %v2115_v31, %v1360_v40 }
 0x41d   : > { %v1369_v45 = vsel %vm1366_vm2, %v1368_v25, %v1364_v42 }
 0x41e   : > { %v1370_v46 = vmul.f32 %v2111_v8, %v1369_v45 }
 0x420   : > { %v1372_v34 = vpack.c.bf16 %v1370_v46, %v1370_v46 }
 0x422   : > { %1522 = vmatmul.bf16.vlgmr.msrb.gmra.mxu1 %v1372_v34 }
 0x48f   : > { %v1462_v18 = vpop.f32.mrf.mxu0 }
 0x497   : > { %v1464_v26 = vpop.f32.mrf.mxu0 }
 0x49f   : > { %v1523_v14 = vpop.f32.mrf.mxu1 }
 0x4a0   : > { %1528 = vrot.lane.b32.xlu2 %v1523_v14, %s2331_s21 }
 0x4a7   : > { %v1525_v9 = vpop.f32.mrf.mxu1 }
 0x4fa   : > { %v1529_v58 = vpop.permute.xlu2 %1528 }
 0x4fb   : > { %v1531_v60 = vsel %vm1204_vm6, %v1462_v18, %v1529_v58 }
 0x4fc   : > { %v1548_v62 = vpack.c.bf16 %v1531_v60, %v1531_v60 }
 0x4fe   : > { %1605 = vmatmul.bf16.vlgmr.msra.gmra.mxu2 %v1548_v62 }
 0x581   : > { %v1606_v2 = vpop.f32.mrf.mxu2 }
 0x582   : > { %v1610_v7 = vadd.f32 %v2116_v4, %v1606_v2 }
 0x584   : > { %1611 = vst [vmem:[%s441_s17] sm:$0xff] %v1610_v7 }
 0x589   : > { %v1608_v38 = vpop.f32.mrf.mxu2 }
 0x58a PF: > { %s23_s30 = sadd.s32 1, %s2319_s30  }
 0x58b   : > { %p20_p7 = scmp.ge.s32.totalorder %s23_s30, 4  }
 0x58d   :  { %22 = sbr.rel (!%p20_p7) target bundleno = 4 (0x4), region = 114 }
 0x592   :  { %1631 = vsyncpa [#allocation3], 1 }
 0x593   :  { %1633 = vsyncpa [#allocation3 + $0x1], 1 }
 0x594   :  { %1634 = vsyncpa [#allocation5], 1 }
 0x595   :  { %1635 = vsyncpa [#allocation8], 1 }
 0x596   :  { %1636 = vsyncpa [#allocation11], 1 }

// kernel: _lambda_.10
= control target key start
LH: loop header
LB: loop body
LE: loop exit
PB: predicated region body
PF: predicated region fallthrough
CT: control target
= control target key end

     0   :  { %s1720_s0 = inlined_call_operand.vmem [shape: f32[16,128], index: 0, kind: input, shape index: {}]   ;;  %s1721_s1 = inlined_call_operand.vmem [shape: f32[1,128], index: 1, kind: input, shape index: {}]   ;;  %s1722_s2 = inlined_call_operand.hbm [shape: bf16[4,256,128], index: 2, kind: input, shape index: {}]   ;;  %s1723_s3 = inlined_call_operand.hbm [shape: bf16[4,128,256], index: 3, kind: input, shape index: {}]   ;;  %s1724_s4 = inlined_call_operand.vmem [shape: f32[4,16,1], index: 4, kind: input, shape index: {}]   ;;  %s1725_s5 = inlined_call_operand.vmem [shape: f32[16,128], index: 5, kind: output, shape index: {}]  }
   0x1   :  { %1727 = sst [smem:[#allocation10_spill]] %s1722_s2 }
   0x2   :  { %10 = vsyncpa [#allocation4], 0 }
   0x3   :  { %12 = vsyncpa [#allocation4 + $0x1], 0 }
   0x4   :  { %13 = vsyncpa [#allocation6], 0 }
   0x5   :  { %15 = vsyncpa [#allocation6 + $0x1], 0  ;;  %s1451_s18 = smov 0   ;;  %s1453_s19 = smov 0  }
   0x6   :  { %s1455_s20 = smov 0   ;;  %s1457_s21 = smov 0  }
   0x7   :  { %s1459_s22 = smov 0   ;;  %s1461_s23 = smov 0  }
   0x8 LB: > { %s1016_s24 = sadd.s32 4294967295, %s1413_s23   ;;  %s30_s25 = sadd.s32 1, %s1409_s22  ;;  %s1413_s23 = sphi %s1461_s23, %s21_s23   ;;  %s1409_s22 = sphi %s1459_s22, %s1738_s22   ;;  %s1405_s21 = sphi %s1457_s21, %s1737_s21   ;;  %s1401_s20 = sphi %s1455_s20, %s1736_s20   ;;  %s1397_s19 = sphi %s1453_s19, %s1735_s19   ;;  %s1393_s18 = sphi %s1451_s18, %s1734_s18  }
   0x9   : > { %p31_p0 = scmp.ge.s32.totalorder %s30_s25, 4  ;;  %s87_s26 = sadd.s32 1, %s1401_s20 }
   0xa   : > { %p94_p1 = scmp.ne.s32.totalorder %s1401_s20, %s1397_s19  ;;  %p95_p2 = scmp.eq.s32.totalorder %s1413_s23, 0 }
   0xb   : > { %s1740_s25 = smov (%p31_p0, %s30_s25), 0  ;;  %p100_p4 = scmp.ne.s32.totalorder %s1397_s19, %s1393_s18 }
   0xc   : > { %1728 = sst [smem:[#allocation9_spill]] %s1740_s25  ;;  %p1487_p3 = por %p95_p2, %p94_p1 }
   0xd   : > { %s84_s28 = ssub.s32 %s1409_s22, %s1740_s25  ;;  %p101_p5 = scmp.eq.s32.totalorder %s1016_s24, 0 }
   0xe   : > { %p85_p6 = scmp.eq.s32.totalorder %s84_s28, 0  ;;  %p1220_p8 = scmp.lt.s32.totalorder %s1413_s23, 4 }
   0xf   : > { %p1494_p7 = por %p101_p5, %p100_p4  ;;  %s1503_s6 = sand.u32 1, %s1401_s20  }
  0x10   : > { %s1500_s30 = scalar_select %p85_p6, %s1401_s20, %s87_s26  }
  0x11   : > { %s1168_s7 = sshll.u32 %s1409_s22, 7  ;;  %s1020_s8 = sshll.u32 %s1503_s6, 7 }
  0x12   : > { %s1731_s2 = sld [smem:[#allocation10_spill]]  ;;  %s220_s13 = scalar_lea.vmem [#allocation3], %s1020_s8 }
  0x13   : > { %s228_s14 = sshll.u32 %s220_s13, 4  ;;  %p1512_p9 = pnand %p1220_p8, %p1487_p3  ;;  %s229_s14 = int_to_ptr.vmem [resolvable:$true] %s228_s14 }
  0x14   : > { %p1026_p10 = scmp.ge.s32.totalorder %s1413_s23, 1  ;;  %p271_p11 = scmp.lt.s32.totalorder %s1413_s23, 5 }
  0x15   : > { %s217_s16 = scalar_lea.sflag [#allocation4], %s1503_s6  ;;  %s1415_s17 = smov 64  }
  0x16   : > { %s1416_s18 = smov 4   ;;  %p272_p12 = pnand %p1026_p10, %p271_p11 }
  0x17   : > { %s247_s28 = scalar_lea.hbm %s1723_s3, %s1168_s7  ;;  %s242_s27 = scalar_lea.vmem [#allocation5], %s1020_s8 }
  0x18   : > { %s225_s11 = scalar_lea.hbm %s1731_s2, %s1168_s7  ;;  %s248_s9 = sshll.u32 %s247_s28, 4  ;;  %s249_s9 = int_to_ptr.hbm [resolvable:$true] %s248_s9 }
  0x19   : > { %s226_s12 = sshll.u32 %s225_s11, 4  ;;  %s250_s10 = sshll.u32 %s242_s27, 4  ;;  %s227_s12 = int_to_ptr.hbm [resolvable:$true] %s226_s12  ;;  %s251_s10 = int_to_ptr.vmem [resolvable:$true] %s250_s10 }
  0x1a   : > { %1216 = dma.hbm_to_vmem [thread:$0]  (!%p1512_p9), %s227_s12, 2048, %s229_s14, %s217_s16, %s1415_s17, %s1415_s17, %s1416_s18  }
  0x1b   : > { %s239_s11 = scalar_lea.sflag [#allocation6], %s1503_s6  ;;  %s1417_s13 = smov 128  }
  0x1c   : > { %s1418_s2 = smov 8   ;;  %275 = sbr.rel (%p272_p12) target bundleno = 600 (0x258), region = 40 }
  0x1d   : > { %1219 = dma.hbm_to_vmem [thread:$0]  (!%p1512_p9), %s249_s9, 2048, %s251_s10, %s239_s11, %s1417_s13, %s1417_s13, %s1418_s2  }
  0x1e   : > { %s277_s25 = sand.u32 (!%p272_p12), 1, %s1397_s19  }
  0x1f   : > { %s1027_s12 = sshll.u32 (!%p272_p12), %s277_s25, 7  ;;  %s278_s14 = scalar_lea.sflag (!%p272_p12), [#allocation4], %s277_s25 }
  0x20   : > { %s1528_s16 = scalar_lea.vmem (!%p272_p12), [#allocation3], %s1027_s12 }
  0x21   : > { %1384 = dma.done.wait (%p1494_p7), %s278_s14, 2048  }
  0x22   : > { %1386 = vsyncadd (%p1494_p7), %s278_s14, 4294965248  ;;  %s288_s7 = scalar_lea.sflag [#allocation6], %s277_s25  ;;  %s1534_s6 = scalar_lea.vmem [#allocation5], %s1027_s12 }
  0x23   : > { %1388 = dma.done.wait (%p1494_p7), %s288_s7, 2048  }
  0x24   : > { %1390 = vsyncadd (%p1494_p7), %s288_s7, 4294965248  ;;  %p345_p13 = scmp.lt.s32.totalorder %s1405_s21, 3  ;;  %p1031_p0 = scmp.ne.s32.totalorder %s1405_s21, 0 }
  0x26   : > { %s346_s2 = scalar_select %p345_p13, %s1405_s21, 3 }
  0x27   : > { %363 = sbr.rel (%p1031_p0) target bundleno = 198 (0xc6), region = 52 }
  0x28   : > { %s1170_s8 = sshll.u32 %s346_s2, 4 }
  0x29   : > { %s1545_s18 = scalar_lea.vmem %s1724_s4, %s1170_s8 }
  0x2c   : > { %v364_v0 = vld [vmem:[%s1720_s0] sm:$0xff]  ;;  %v365_v2 = vld [vmem:[%s1720_s0 + $0x8] sm:$0xff]  ;;  %v1419_v4 = vmov 128.0  }
  0x2d   : > { %v367_v1 = vmul.f32 %v364_v0, %v364_v0  ;;  %415 = vst [vmem:[%s1725_s5] sm:$0xff] %v364_v0  ;;  %v368_v3 = vmul.f32 %v365_v2, %v365_v2  ;;  %1276 = vrcp.f32 %v1419_v4  ;;  %v1275_v25 = vld [vmem:[%s1721_s1] ss:$0 sm:$0xff] }
  0x2e   : > { %416 = vst [vmem:[%s1725_s5 + $0x8] sm:$0xff] %v365_v2  ;;  %v385_v29 = vmul.f32 %v1275_v25, %v364_v0  ;;  %v386_v30 = vmul.f32 %v1275_v25, %v365_v2 }
  0x2f   : > { %369 = vadd.xlane.f32.xlu0 %v367_v1 }
  0x33   : > { %v1277_v5 = vpop.eup %1276 }
  0x34   : > { %v374_v6 = vmul.f32 128.0, %v1277_v5  ;;  %vm378_vm0 = vweird.f32 %v1277_v5 }
  0x36   : > { %v375_v7 = vsub.f32 1.0, %v374_v6 }
  0x37   : > { %371 = vadd.xlane.f32.xlu0 %v368_v3 }
  0x38   : > { %v376_v8 = vmul.f32 %v1277_v5, %v375_v7 }
  0x3a   : > { %v377_v9 = vadd.f32 %v1277_v5, %v376_v8 }
  0x3c   : > { %v379_v10 = vsel %vm378_vm0, %v1277_v5, %v377_v9 }
  0xa2   : > { %v370_v11 = vpop.xlane.xlu0 %369 }
  0xa3   : > { %v380_v12 = vmul.f32 %v379_v10, %v370_v11 }
  0xa5   : > { %v387_v13 = vadd.f32 1e-06, %v380_v12 }
  0xa7   : > { %1278 = vrsqrt.f32 %v387_v13  ;;  %vm395_vm2 = vweird.f32 %v387_v13 }
  0xaa   : > { %v372_v14 = vpop.xlane.xlu0 %371 }
  0xab   : > { %v381_v15 = vmul.f32 %v379_v10, %v372_v14 }
  0xad   : > { %v1279_v16 = vpop.eup %1278  ;;  %v388_v17 = vadd.f32 1e-06, %v381_v15 }
  0xae   : > { %v390_v18 = vmul.f32 %v1279_v16, %v387_v13  ;;  %vm396_vm1 = vweird.f32 %v1279_v16 }
  0xaf   : > { %1280 = vrsqrt.f32 %v388_v17  ;;  %vm397_vm4 = vmor %vm395_vm2, %vm396_vm1  ;;  %vm405_vm5 = vweird.f32 %v388_v17 }
  0xb0   : > { %v391_v19 = vmul.f32 %v1279_v16, %v390_v18 }
  0xb2   : > { %v392_v20 = vmul.f32 0.5, %v391_v19 }
  0xb4   : > { %v393_v22 = vsub.f32 1.5, %v392_v20 }
  0xb5   : > { %v1281_v21 = vpop.eup %1280 }
  0xb6   : > { %v400_v23 = vmul.f32 %v1281_v21, %v388_v17  ;;  %v394_v26 = vmul.f32 %v1279_v16, %v393_v22  ;;  %vm406_vm3 = vweird.f32 %v1281_v21 }
  0xb7   : > { %vm407_vm6 = vmor %vm405_vm5, %vm406_vm3 }
  0xb8   : > { %v401_v24 = vmul.f32 %v1281_v21, %v400_v23  ;;  %v398_v31 = vsel %vm397_vm4, %v1279_v16, %v394_v26 }
  0xb9   : > { %v409_v34 = vmul.f32 %v398_v31, %v385_v29 }
  0xba   : > { %v402_v27 = vmul.f32 0.5, %v401_v24 }
  0xbc   : > { %v403_v28 = vsub.f32 1.5, %v402_v27 }
  0xbe   : > { %v404_v32 = vmul.f32 %v1281_v21, %v403_v28 }
  0xc0   : > { %v408_v33 = vsel %vm407_vm6, %v1281_v21, %v404_v32 }
  0xc1   : > { %v410_v35 = vmul.f32 %v408_v33, %v386_v30 }
  0xc3   : > { %v1207_v36 = vpack.c.bf16 %v410_v35, %v409_v34 }
  0xc5   : > { %1208 = vst [vmem:[#allocation2] sm:$0xff] %v1207_v36  }
  0xc6 PF: > { %v1179_v37 = vld [vmem:[%s1528_s16 + $0x38] sm:$0xff]  ;;  %v1178_v39 = vld [vmem:[%s1528_s16 + $0x30] sm:$0xff]  ;;  %v1177_v41 = vld [vmem:[%s1528_s16 + $0x28] sm:$0xff] }
  0xc7   : > { %v1187_v38 = vld [vmem:[%s1528_s16 + $0x78] sm:$0xff]  ;;  %553 = vmatpush.bf16.xpose.msra.mxu0 %v1179_v37  ;;  %v1186_v40 = vld [vmem:[%s1528_s16 + $0x70] sm:$0xff]  ;;  %v1185_v42 = vld [vmem:[%s1528_s16 + $0x68] sm:$0xff] }
  0xc8   : > { %567 = vmatpush.bf16.xpose.msra.mxu1 %v1187_v38  ;;  %v1176_v43 = vld [vmem:[%s1528_s16 + $0x20] sm:$0xff]  ;;  %v1175_v45 = vld [vmem:[%s1528_s16 + $0x18] sm:$0xff]  ;;  %v1174_v47 = vld [vmem:[%s1528_s16 + $0x10] sm:$0xff] }
  0xc9   : > { %v1184_v44 = vld [vmem:[%s1528_s16 + $0x60] sm:$0xff]  ;;  %v1183_v46 = vld [vmem:[%s1528_s16 + $0x58] sm:$0xff]  ;;  %v1182_v48 = vld [vmem:[%s1528_s16 + $0x50] sm:$0xff] }
  0xca   : > { %v1173_v49 = vld [vmem:[%s1528_s16 + $0x8] sm:$0xff]  ;;  %v1172_v51 = vld [vmem:[%s1528_s16] sm:$0xff]  ;;  %v1158_v54 = vld [vmem:[%s1534_s6 + $0x70] sm:$0xf] }
  0xcb   : > { %v1181_v50 = vld [vmem:[%s1528_s16 + $0x48] sm:$0xff]  ;;  %v1180_v52 = vld [vmem:[%s1528_s16 + $0x40] sm:$0xff]  ;;  %v1203_v55 = vld [vmem:[%s1534_s6 + $0x74] sm:$0xf0] }
  0xcc   : > { %v1171_v53 = vld [vmem:[#allocation2] sm:$0xff]  ;;  %v1202_v56 = vld [vmem:[%s1534_s6 + $0x74] sm:$0xf]  ;;  %v1159_v57 = vor.u32 %v1203_v55, %v1158_v54  ;;  %v1150_v60 = vld [vmem:[%s1534_s6 + $0x60] sm:$0xf] }
  0xcd   : > { %v1160_v58 = vld [vmem:[%s1534_s6 + $0x78] sm:$0xf0]  ;;  %v1201_v61 = vld [vmem:[%s1534_s6 + $0x64] sm:$0xf0]  ;;  %v1200_v62 = vld [vmem:[%s1534_s6 + $0x64] sm:$0xf] }
  0xce   : > { %v1163_v59 = vor.u32 %v1202_v56, %v1160_v58  ;;  %839 = vmatpush.bf16.xpose.msra.mxu2 %v1159_v57  ;;  %v1151_v63 = vor.u32 %v1201_v61, %v1150_v60  ;;  %v1152_v0 = vld [vmem:[%s1534_s6 + $0x68] sm:$0xf0]  ;;  %v1142_v2 = vld [vmem:[%s1534_s6 + $0x50] sm:$0xf]  ;;  %v1199_v3 = vld [vmem:[%s1534_s6 + $0x54] sm:$0xf0] }
  0xcf   : > { %554 = vmatpush.bf16.xpose.msra.mxu0 %v1178_v39  ;;  %v1155_v1 = vor.u32 %v1200_v62, %v1152_v0  ;;  %v1198_v4 = vld [vmem:[%s1534_s6 + $0x54] sm:$0xf]  ;;  %v1143_v5 = vor.u32 %v1199_v3, %v1142_v2  ;;  %v1144_v6 = vld [vmem:[%s1534_s6 + $0x58] sm:$0xf0]  ;;  %v1134_v8 = vld [vmem:[%s1534_s6 + $0x40] sm:$0xf] }
  0xd0   : > { %568 = vmatpush.bf16.xpose.msra.mxu1 %v1186_v40  ;;  %853 = vmatpush.bf16.xpose.msra.mxu3 %v1163_v59  ;;  %v1147_v7 = vor.u32 %v1198_v4, %v1144_v6  ;;  %v1197_v9 = vld [vmem:[%s1534_s6 + $0x44] sm:$0xf0]  ;;  %v1196_v10 = vld [vmem:[%s1534_s6 + $0x44] sm:$0xf]  ;;  %v1136_v12 = vld [vmem:[%s1534_s6 + $0x48] sm:$0xf0] }
  0xd1   : > { %v1135_v11 = vor.u32 %v1197_v9, %v1134_v8  ;;  %v1139_v13 = vor.u32 %v1196_v10, %v1136_v12  ;;  %v1126_v20 = vld [vmem:[%s1534_s6 + $0x30] sm:$0xf]  ;;  %v1195_v21 = vld [vmem:[%s1534_s6 + $0x34] sm:$0xf0]  ;;  %v1194_v22 = vld [vmem:[%s1534_s6 + $0x34] sm:$0xf] }
  0xd2   : > { %v1128_v25 = vld [vmem:[%s1534_s6 + $0x38] sm:$0xf0]  ;;  %v1127_v26 = vor.u32 %v1195_v21, %v1126_v20  ;;  %v1118_v34 = vld [vmem:[%s1534_s6 + $0x20] sm:$0xf]  ;;  %v1193_v36 = vld [vmem:[%s1534_s6 + $0x24] sm:$0xf0] }
  0xd3   : > { %v1131_v27 = vor.u32 %v1194_v22, %v1128_v25  ;;  %v1119_v38 = vor.u32 %v1193_v36, %v1118_v34  ;;  %v1192_v39 = vld [vmem:[%s1534_s6 + $0x24] sm:$0xf]  ;;  %v1191_v57 = vld [vmem:[%s1534_s6 + $0x14] sm:$0xf0]  ;;  %v1190_v60 = vld [vmem:[%s1534_s6 + $0x14] sm:$0xf] }
  0xd6   : > { %840 = vmatpush.bf16.xpose.msra.mxu2 %v1151_v63  ;;  %v1112_v63 = vld [vmem:[%s1534_s6 + $0x18] sm:$0xf0] }
  0xd7   : > { %555 = vmatpush.bf16.xpose.msra.mxu0 %v1177_v41  ;;  %v1120_v41 = vld [vmem:[%s1534_s6 + $0x28] sm:$0xf0]  ;;  %v1115_v3 = vor.u32 %v1190_v60, %v1112_v63 }
  0xd8   : > { %569 = vmatpush.bf16.xpose.msra.mxu1 %v1185_v42  ;;  %854 = vmatpush.bf16.xpose.msra.mxu3 %v1155_v1 }
  0xde   : > { %841 = vmatpush.bf16.xpose.msra.mxu2 %v1143_v5 }
  0xdf   : > { %556 = vmatpush.bf16.xpose.msra.mxu0 %v1176_v43 }
  0xe0   : > { %570 = vmatpush.bf16.xpose.msra.mxu1 %v1184_v44  ;;  %855 = vmatpush.bf16.xpose.msra.mxu3 %v1147_v7  ;;  %v1123_v44 = vor.u32 %v1192_v39, %v1120_v41 }
  0xe6   : > { %842 = vmatpush.bf16.xpose.msra.mxu2 %v1135_v11 }
  0xe7   : > { %557 = vmatpush.bf16.xpose.msra.mxu0 %v1175_v45 }
  0xe8   : > { %571 = vmatpush.bf16.xpose.msra.mxu1 %v1183_v46  ;;  %856 = vmatpush.bf16.xpose.msra.mxu3 %v1139_v13 }
  0xee   : > { %843 = vmatpush.bf16.xpose.msra.mxu2 %v1127_v26 }
  0xef   : > { %558 = vmatpush.bf16.xpose.msra.mxu0 %v1174_v47 }
  0xf0   : > { %572 = vmatpush.bf16.xpose.msra.mxu1 %v1182_v48  ;;  %857 = vmatpush.bf16.xpose.msra.mxu3 %v1131_v27 }
  0xf6   : > { %844 = vmatpush.bf16.xpose.msra.mxu2 %v1119_v38 }
  0xf7   : > { %559 = vmatpush.bf16.xpose.msra.mxu0 %v1173_v49 }
  0xf8   : > { %573 = vmatpush.bf16.xpose.msra.mxu1 %v1181_v50  ;;  %858 = vmatpush.bf16.xpose.msra.mxu3 %v1123_v44 }
  0xff   : > { %560 = vmatpush.bf16.xpose.msra.mxu0 %v1172_v51 }
 0x100   : > { %574 = vmatpush.bf16.xpose.msra.mxu1 %v1180_v52  ;;  %859 = vmatpush.bf16.xpose.msra.mxu3 %v1115_v3 }
 0x106   : > { %561 = vmatmul.bf16.vlgmr.msra.gmra.mxu0 %v1171_v53 }
 0x107   : > { %575 = vmatmul.bf16.vlgmr.msra.gmra.mxu1 %v1171_v53  ;;  %v1110_v53 = vld [vmem:[%s1534_s6 + $0x10] sm:$0xf] }
 0x108   : > { %v1111_v62 = vor.u32 %v1191_v57, %v1110_v53 }
 0x10a   : > { %845 = vmatpush.bf16.xpose.msra.mxu2 %v1111_v62 }
 0x183   : > { %v1595_v14 = vpop.f32.mrf.mxu0 }
 0x184   : > { %v1597_v15 = vpop.f32.mrf.mxu1  ;;  %v1600_v16 = vmul.f32 0.70710677, %v1595_v14 }
 0x185   : > { %v1603_v17 = vmul.f32 0.70710677, %v1597_v15 }
 0x186   : > { %v589_v18 = vand.u32 2147483647, %v1600_v16  ;;  %v697_v48 = vsub.f32 0.0, %v1600_v16 }
 0x187   : > { %v590_v19 = vand.u32 2147483647, %v1603_v17  ;;  %v698_v2 = vsub.f32 0.0, %v1603_v17 }
 0x188   : > { %v593_v23 = vmul.f32 0.3275911, %v589_v18  ;;  %v701_v58 = vmul.f32 %v697_v48, %v1600_v16 }
 0x189   : > { %v594_v24 = vmul.f32 0.3275911, %v590_v19  ;;  %v702_v26 = vmul.f32 %v698_v2, %v1603_v17 }
 0x18a   : > { %v597_v28 = vadd.f32 1.0, %v593_v23  ;;  %v705_v8 = vmul.f32 1.442695, %v701_v58  ;;  %v1102_v23 = vld [vmem:[%s1534_s6] sm:$0xf] }
 0x18b   : > { %v1611_v29 = vadd.f32 1.0, %v594_v24  ;;  %v1613_v30 = vpop.f32.mrf.mxu0  ;;  %v1189_v24 = vld [vmem:[%s1534_s6 + $0x4] sm:$0xf0] }
 0x18c   : > { %v1615_v31 = vpop.f32.mrf.mxu1  ;;  %1283 = vrcp.f32 %v597_v28  ;;  %v1618_v32 = vmul.f32 0.70710677, %v1613_v30  ;;  %v612_v52 = vand.u32 2147483648, %v597_v28  ;;  %v610_v54 = vand.u32 2147483647, %v597_v28 }
 0x18d   : > { %1285 = vrcp.f32 %v1611_v29  ;;  %v1622_v33 = vmul.f32 0.70710677, %v1615_v31  ;;  %vm606_vm8 = vweird.f32 %v597_v28  ;;  %v627_v59 = vand.u32 2147483648, %v1611_v29 }
 0x18e   : > { %v591_v35 = vand.u32 2147483647, %v1618_v32  ;;  %v625_v1 = vand.u32 2147483647, %v1611_v29  ;;  %v613_v4 = vor.u32 1.1754944e-38, %v612_v52  ;;  %vm621_vm11 = vweird.f32 %v1611_v29 }
 0x18f   : > { %v592_v37 = vand.u32 2147483647, %v1622_v33  ;;  %vm611_vm12 = vcmp.eq.f32.partialorder %v610_v54, 8.507059e+37  ;;  %v628_v11 = vor.u32 1.1754944e-38, %v627_v59  ;;  %v1103_v27 = vor.u32 %v1189_v24, %v1102_v23  ;;  %v870_v23 = vld [vmem:[%s1545_s18 + $0x8] sm:$0xff] }
 0x190   : > { %v595_v40 = vmul.f32 0.3275911, %v591_v35  ;;  %vm626_vm14 = vcmp.eq.f32.partialorder %v625_v1, 8.507059e+37  ;;  %v699_v53 = vsub.f32 0.0, %v1618_v32  ;;  %v700_v59 = vsub.f32 0.0, %v1622_v33 }
 0x191   : > { %v596_v43 = vmul.f32 0.3275911, %v592_v37  ;;  %846 = vmatpush.bf16.xpose.msra.mxu2 %v1103_v27  ;;  %v1420_v1 = vmov 0  }
 0x192   : > { %v1284_v42 = vpop.eup %1283  ;;  %v1630_v46 = vadd.f32 1.0, %v595_v40  ;;  %1282 = vset.pattern.permute.xlu0 %v1420_v1  ;;  %v703_v2 = vmul.f32 %v699_v53, %v1618_v32 }
 0x193   : > { %v602_v45 = vmul.f32 %v1284_v42, %v597_v28  ;;  %v1286_v47 = vpop.eup %1285  ;;  %v1633_v49 = vadd.f32 1.0, %v596_v43  ;;  %vm607_vm7 = vweird.f32 %v1284_v42  ;;  %v1188_v28 = vld [vmem:[%s1534_s6 + $0x4] sm:$0xf] }
 0x194   : > { %v617_v51 = vmul.f32 %v1286_v47, %v1611_v29  ;;  %1287 = vrcp.f32 %v1630_v46  ;;  %vm608_vm9 = vmor %vm606_vm8, %vm607_vm7  ;;  %vm622_vm10 = vweird.f32 %v1286_v47  ;;  %v640_v13 = vand.u32 2147483647, %v1630_v46  ;;  %v1104_v29 = vld [vmem:[%s1534_s6 + $0x8] sm:$0xf0] }
 0x195   : > { %v603_v50 = vsub.f32 1.0, %v602_v45  ;;  %1289 = vrcp.f32 %v1633_v49  ;;  %vm623_vm13 = vmor %vm621_vm11, %vm622_vm10  ;;  %v642_v21 = vand.u32 2147483648, %v1630_v46  ;;  %v1107_v37 = vor.u32 %v1188_v28, %v1104_v29 }
 0x196   : > { %v618_v56 = vsub.f32 1.0, %v617_v51  ;;  %vm636_vm0 = vweird.f32 %v1630_v46  ;;  %v655_v39 = vand.u32 2147483647, %v1633_v49  ;;  %v657_v40 = vand.u32 2147483648, %v1633_v49 }
 0x197   : > { %v604_v55 = vmul.f32 %v1284_v42, %v603_v50  ;;  %v707_v45 = vmul.f32 1.442695, %v702_v26  ;;  %vm651_vm3 = vweird.f32 %v1633_v49  ;;  %vm641_vm4 = vcmp.eq.f32.partialorder %v640_v13, 8.507059e+37  ;;  %860 = vmatpush.bf16.xpose.msra.mxu3 %v1107_v37 }
 0x198   : > { %v619_v61 = vmul.f32 %v1286_v47, %v618_v56  ;;  %v658_v54 = vor.u32 1.1754944e-38, %v657_v40  ;;  %vm656_vm6 = vcmp.eq.f32.partialorder %v655_v39, 8.507059e+37  ;;  %1291 = vpow2.f32 %v705_v8 }
 0x199   : > { %v605_v0 = vadd.f32 %v1284_v42, %v604_v55  ;;  %1293 = vpow2.f32 %v707_v45  ;;  %v709_v13 = vmul.f32 1.442695, %v703_v2  ;;  %vm721_vm7 = vcmp.ge.f32.partialorder %v1600_v16, 0.0 }
 0x19a   : > { %v1288_v5 = vpop.eup %1287  ;;  %v620_v7 = vadd.f32 %v1286_v47, %v619_v61  ;;  %v869_v61 = vld [vmem:[%s1545_s18] sm:$0xff]  ;;  %vm722_vm8 = vcmp.ge.f32.partialorder %v1603_v17, 0.0  ;;  %vm724_vm10 = vcmp.ge.f32.partialorder %v1622_v33, 0.0 }
 0x19b   : > { %v609_v6 = vsel %vm608_vm9, %v1284_v42, %v605_v0  ;;  %v632_v9 = vmul.f32 %v1288_v5, %v1630_v46  ;;  %v1290_v12 = vpop.eup %1289  ;;  %vm637_vm15 = vweird.f32 %v1288_v5  ;;  %873 = vperm.xlu0 %1282, %v869_v61   ;;  %1295 = vpow2.f32 %v709_v13 }
 0x19c   : > { %v1648_v10 = vsel %vm611_vm12, %v613_v4, %v609_v6  ;;  %v624_v19 = vsel %vm623_vm13, %v1286_v47, %v620_v7  ;;  %v647_v22 = vmul.f32 %v1290_v12, %v1633_v49  ;;  %vm652_vm1 = vweird.f32 %v1290_v12  ;;  %vm638_vm2 = vmor %vm636_vm0, %vm637_vm15 }
 0x19d   : > { %v661_v18 = vmul.f32 1.0614054, %v1648_v10  ;;  %v633_v20 = vsub.f32 1.0, %v632_v9  ;;  %v1656_v25 = vsel %vm626_vm14, %v628_v11, %v624_v19  ;;  %v643_v47 = vor.u32 1.1754944e-38, %v642_v21  ;;  %vm653_vm5 = vmor %vm651_vm3, %vm652_vm1 }
 0x19e   : > { %v648_v36 = vsub.f32 1.0, %v647_v22  ;;  %v662_v38 = vmul.f32 1.0614054, %v1656_v25  ;;  %v704_v7 = vmul.f32 %v700_v59, %v1622_v33  ;;  %v1292_v19 = vpop.eup %1291  ;;  %vm723_vm9 = vcmp.ge.f32.partialorder %v1618_v32, 0.0 }
 0x19f   : > { %v665_v34 = vadd.f32 -1.4531521, %v661_v18  ;;  %v634_v35 = vmul.f32 %v1288_v5, %v633_v20 }
 0x1a0   : > { %v649_v43 = vmul.f32 %v1290_v12, %v648_v36  ;;  %v666_v44 = vadd.f32 -1.4531521, %v662_v38  ;;  %v711_v24 = vmul.f32 1.442695, %v704_v7 }
 0x1a1   : > { %v669_v41 = vmul.f32 %v665_v34, %v1648_v10  ;;  %v635_v42 = vadd.f32 %v1288_v5, %v634_v35  ;;  %v1294_v34 = vpop.eup %1293 }
 0x1a2   : > { %v650_v46 = vadd.f32 %v1290_v12, %v649_v43  ;;  %v670_v51 = vmul.f32 %v666_v44, %v1656_v25  ;;  %1297 = vpow2.f32 %v711_v24  ;;  %v1296_v44 = vpop.eup %1295 }
 0x1a3   : > { %v673_v48 = vadd.f32 1.4214138, %v669_v41  ;;  %v639_v50 = vsel %vm638_vm2, %v1288_v5, %v635_v42  ;;  %878 = vperm.xlu0 %1282, %v870_v23  }
 0x1a4   : > { %v644_v52 = vsel %vm641_vm4, %v643_v47, %v639_v50  ;;  %v654_v57 = vsel %vm653_vm5, %v1290_v12, %v650_v46  ;;  %v674_v49 = vadd.f32 1.4214138, %v670_v51 }
 0x1a5   : > { %v677_v55 = vmul.f32 %v673_v48, %v1648_v10  ;;  %v663_v56 = vmul.f32 1.0614054, %v644_v52  ;;  %v659_v58 = vsel %vm656_vm6, %v658_v54, %v654_v57 }
 0x1a6   : > { %v664_v63 = vmul.f32 1.0614054, %v659_v58  ;;  %v678_v0 = vmul.f32 %v674_v49, %v1656_v25 }
 0x1a7   : > { %v681_v60 = vadd.f32 -0.28449672, %v677_v55  ;;  %v667_v62 = vadd.f32 -1.4531521, %v663_v56  ;;  %v581_v56 = vmul.f32 0.5, %v1595_v14 }
 0x1a8   : > { %v668_v5 = vadd.f32 -1.4531521, %v664_v63  ;;  %v682_v6 = vadd.f32 -0.28449672, %v678_v0  ;;  %v1298_v50 = vpop.eup %1297 }
 0x1a9   : > { %v685_v3 = vmul.f32 %v681_v60, %v1648_v10  ;;  %v671_v4 = vmul.f32 %v667_v62, %v644_v52  ;;  %v582_v60 = vmul.f32 0.5, %v1597_v15  ;;  %v584_v62 = vmul.f32 0.5, %v1615_v31  ;;  %v867_v15 = vld [vmem:[%s1725_s5] sm:$0xff] }
 0x1aa   : > { %v672_v11 = vmul.f32 %v668_v5, %v659_v58  ;;  %v686_v12 = vmul.f32 %v682_v6, %v1656_v25 }
 0x1ab   : > { %v689_v9 = vadd.f32 0.2548296, %v685_v3  ;;  %v675_v8 = vadd.f32 1.4214138, %v671_v4 }
 0x1ac   : > { %v676_v21 = vadd.f32 1.4214138, %v672_v11  ;;  %v690_v22 = vadd.f32 0.2548296, %v686_v12  ;;  %v868_v11 = vld [vmem:[%s1725_s5 + $0x8] sm:$0xff] }
 0x1ad   : > { %v693_v18 = vmul.f32 %v689_v9, %v1648_v10  ;;  %v679_v20 = vmul.f32 %v675_v8, %v644_v52 }
 0x1ae   : > { %v680_v28 = vmul.f32 %v676_v21, %v659_v58  ;;  %v694_v29 = vmul.f32 %v690_v22, %v1656_v25 }
 0x1af   : > { %v713_v26 = vmul.f32 %v1292_v19, %v693_v18  ;;  %v683_v27 = vadd.f32 -0.28449672, %v679_v20 }
 0x1b0   : > { %v684_v36 = vadd.f32 -0.28449672, %v680_v28  ;;  %v714_v38 = vmul.f32 %v1294_v34, %v694_v29 }
 0x1b1   : > { %v687_v35 = vmul.f32 %v683_v27, %v644_v52  ;;  %v717_v37 = vsub.f32 1.0, %v713_v26 }
 0x1b2   : > { %v688_v39 = vmul.f32 %v684_v36, %v659_v58  ;;  %v718_v40 = vsub.f32 1.0, %v714_v38 }
 0x1b3   : > { %v691_v10 = vadd.f32 0.2548296, %v687_v35  ;;  %v725_v43 = vsub.f32 0.0, %v717_v37 }
 0x1b4   : > { %v692_v42 = vadd.f32 0.2548296, %v688_v39  ;;  %v726_v48 = vsub.f32 0.0, %v718_v40 }
 0x1b5   : > { %v695_v41 = vmul.f32 %v691_v10, %v644_v52  ;;  %v729_v51 = vsel %vm721_vm7, %v717_v37, %v725_v43 }
 0x1b6   : > { %v696_v47 = vmul.f32 %v692_v42, %v659_v58  ;;  %v730_v55 = vsel %vm722_vm8, %v718_v40, %v726_v48  ;;  %v733_v52 = vadd.f32 1.0, %v729_v51  ;;  %v583_v58 = vmul.f32 0.5, %v1613_v30 }
 0x1b7   : > { %v715_v45 = vmul.f32 %v1296_v44, %v695_v41  ;;  %v734_v16 = vadd.f32 1.0, %v730_v55 }
 0x1b8   : > { %v716_v46 = vmul.f32 %v1298_v50, %v696_v47  ;;  %v737_v0 = vmul.f32 %v733_v52, %v581_v56 }
 0x1b9   : > { %v719_v25 = vsub.f32 1.0, %v715_v45  ;;  %v738_v2 = vmul.f32 %v734_v16, %v582_v60 }
 0x1ba   : > { %v720_v54 = vsub.f32 1.0, %v716_v46 }
 0x1bb   : > { %v727_v53 = vsub.f32 0.0, %v719_v25 }
 0x1bc   : > { %v728_v49 = vsub.f32 0.0, %v720_v54 }
 0x1bd   : > { %v731_v57 = vsel %vm723_vm9, %v719_v25, %v727_v53 }
 0x1be   : > { %v735_v59 = vadd.f32 1.0, %v731_v57  ;;  %v732_v61 = vsel %vm724_vm10, %v720_v54, %v728_v49 }
 0x1bf   : > { %v736_v63 = vadd.f32 1.0, %v732_v61 }
 0x1c0   : > { %v739_v17 = vmul.f32 %v735_v59, %v583_v58 }
 0x1c1   : > { %v740_v32 = vmul.f32 %v736_v63, %v584_v62 }
 0x1c2   : > { %v757_v1 = vpack.c.bf16 %v739_v17, %v737_v0 }
 0x1c3   : > { %v758_v14 = vpack.c.bf16 %v740_v32, %v738_v2 }
 0x1c4   : > { %847 = vmatmul.bf16.vlgmr.msra.gmra.mxu2 %v757_v1 }
 0x1c5   : > { %861 = vmatmul.bf16.vlgmr.msra.gmra.mxu3 %v758_v14 }
 0x20d   : > { %v874_v30 = vpop.permute.xlu0 %873 }
 0x215   : > { %v879_v8 = vpop.permute.xlu0 %878 }
 0x247   : > { %v848_v3 = vpop.f32.mrf.mxu2 }
 0x248   : > { %v862_v4 = vpop.f32.mrf.mxu3 }
 0x249   : > { %v863_v5 = vadd.f32 %v862_v4, %v848_v3 }
 0x24b   : > { %v881_v33 = vmul.f32 %v874_v30, %v863_v5 }
 0x24d   : > { %v883_v6 = vadd.f32 %v881_v33, %v867_v15 }
 0x24f   : > { %v850_v7 = vpop.f32.mrf.mxu2  ;;  %885 = vst [vmem:[%s1725_s5] sm:$0xff] %v883_v6 }
 0x250   : > { %v864_v31 = vpop.f32.mrf.mxu3 }
 0x251   : > { %v865_v9 = vadd.f32 %v864_v31, %v850_v7 }
 0x253   : > { %v882_v12 = vmul.f32 %v879_v8, %v865_v9 }
 0x255   : > { %v884_v13 = vadd.f32 %v882_v12, %v868_v11 }
 0x257   : > { %886 = vst [vmem:[%s1725_s5 + $0x8] sm:$0xff] %v884_v13 }
 0x258 PF: > { %s21_s23 = sadd.s32 1, %s1413_s23   ;;  %s1733_s15 = sld [smem:[#allocation9_spill]] }
 0x259   : > { %p18_p1 = scmp.ge.s32.totalorder %s21_s23, 6   ;;  %s1734_s18 = smov %s1397_s19 }
 0x25a   : > { %s1735_s19 = smov %s1401_s20  ;;  %s1736_s20 = smov %s1500_s30 }
 0x25b   : > { %s1737_s21 = smov %s1409_s22  ;;  %20 = sbr.rel (!%p18_p1) target bundleno = 8 (0x8), region = 103 }
 0x25e   : > { %s1738_s22 = smov %s1733_s15 }
 0x260   :  { %909 = vsyncpa [#allocation4], 1 }
 0x261   :  { %911 = vsyncpa [#allocation4 + $0x1], 1 }
 0x262   :  { %912 = vsyncpa [#allocation6], 1 }
 0x263   :  { %914 = vsyncpa [#allocation6 + $0x1], 1 }

</bundles_post_ra>
